<compile_context>
chip_gen: v7x
topology: tpu7x:2x2x1
jax: 0.10.0
libtpu: 0.0.40
codegen_flags: <defaults>
</compile_context>

<pallas_src>
import jax
import jax.numpy as jnp
from jax import lax
from jax.experimental import pallas as pl
from jax.experimental.pallas import tpu as pltpu


def _round_up(x, m):
    return ((x + m - 1) // m) * m


def encoder_vid_kernel(vid_ref, w1_ref, b1_ref, wih_ref, whh_ref,
                       bgi_ref, bhn_ref, fout_ref, fhid_ref):
    tb, seq, dv = vid_ref.shape
    H2 = wih_ref.shape[1]            # 2*H, lanes packed as [fwd | bwd]
    H = H2 // 2

    # ---- vid2hid: Linear + ReLU over all tb*seq rows (one bulk MXU matmul) -
    x2 = vid_ref[...].reshape(tb * seq, dv)
    proj = jnp.dot(x2, w1_ref[...], preferred_element_type=jnp.float32)
    proj = jnp.maximum(proj + b1_ref[...], 0.0)          # Dropout = id (eval)
    proj3 = proj.reshape(tb, seq, H)

    # ---- lane-pack [forward time order | reversed time order] ONCE so a
    #      single fused recurrence drives both directions.  seq is a small
    #      static constant -> static slices, one-time, pre-loop.
    xp_rows = [jnp.concatenate([proj3[:, s, :], proj3[:, seq - 1 - s, :]],
                               axis=-1) for s in range(seq)]
    xp = jnp.concatenate(xp_rows, axis=0)                # (seq*tb, 2H), s-major
    xp = xp.astype(wih_ref.dtype)

    # ---- input-to-hidden pre-activations for all steps, one matmul per gate
    #      (block-diagonal fwd/bwd weights -> gates come out already
    #      direction-packed, no gate slicing).  r/z hidden biases are folded.
    bgi = bgi_ref[...]

    def gate_pre(k):
        y = jnp.dot(xp, wih_ref[k], preferred_element_type=jnp.float32)
        return (y + bgi[k][None, :]).reshape(seq, tb, H2)

    gi_r, gi_z, gi_n = gate_pre(0), gate_pre(1), gate_pre(2)

    w_r, w_z, w_n = whh_ref[0], whh_ref[1], whh_ref[2]   # (2H, 2H) block-diag
    bhn = jnp.broadcast_to(bhn_ref[...], (tb, H2))       # hoisted broadcast

    # ---- fused bidirectional recurrence: h = [h_f(s) | h_b(seq-1-s)].
    #      Fully unrolled (seq is static and small); per-step states stay in
    #      registers — no ref stores inside the loop.
    # TODO(synk): for seq >~ 64, switch to lax.fori_loop(unroll=8) writing
    #             per-chunk states into a VMEM scratch to bound live ranges.
    h = jnp.zeros((tb, H2), jnp.float32)
    hs = []
    for s in range(seq):
        r = jax.nn.sigmoid(gi_r[s] +
                           jnp.dot(h, w_r, preferred_element_type=jnp.float32))
        z = jax.nn.sigmoid(gi_z[s] +
                           jnp.dot(h, w_z, preferred_element_type=jnp.float32))
        n = jnp.tanh(gi_n[s] + r *
                     (jnp.dot(h, w_n, preferred_element_type=jnp.float32) + bhn))
        h = (1.0 - z) * n + z * h
        hs.append(h)

    # ---- fhidden = cat(h_fwd_last, h_bwd_last) = final fused state ---------
    fhid_ref[...] = hs[seq - 1]

    # ---- foutput row t = [h_f(t) | h_b(t)];  h_b(t) lives at fused step
    #      seq-1-t.  LayerNorm (no affine, eps=1e-5, two-pass variance) in
    #      registers, then ONE lane-dense store of the whole (tb, seq*2H)
    #      block — no per-timestep masked stores, no read-back.
    out_rows = []
    for t in range(seq):
        row = jnp.concatenate([hs[t][:, :H], hs[seq - 1 - t][:, H:]], axis=-1)
        mu = jnp.mean(row, axis=-1, keepdims=True)
        var = jnp.mean((row - mu) * (row - mu), axis=-1, keepdims=True)
        out_rows.append((row - mu) * lax.rsqrt(var + 1e-5))
    fout_ref[...] = jnp.concatenate(out_rows, axis=-1)    # (tb, seq*2H)


def encoder_vid_hga(vid, w1, b1, wih_f, whh_f, bih_f, bhh_f,
                    wih_b, whh_b, bih_b, bhh_b, *,
                    block_batch=None, use_bf16=False):
    bs, seq, dv = vid.shape
    H = w1.shape[1]
    H2 = 2 * H

    # ---- batch tile: multiple of 8 sublanes, as large as the batch allows --
    tb = 128 if block_batch is None else block_batch
    tb = min(_round_up(tb, 8), _round_up(bs, 8))
    bs_pad = _round_up(bs, tb)
    grid = (bs_pad // tb,)
    vid_p = vid if bs_pad == bs else jnp.pad(vid, ((0, bs_pad - bs), (0, 0), (0, 0)))

    # ---- one-time host-side weight repacking (plain JAX) -------------------
    def g(w, k):                            # gate-k columns of a (.., 3H) tensor
        return w[:, k * H:(k + 1) * H]

    def blockdiag(a, b):                    # (H,H),(H,H) -> (2H,2H)
        z = jnp.zeros((H, H), a.dtype)
        return jnp.concatenate([jnp.concatenate([a, z], axis=1),
                                jnp.concatenate([z, b], axis=1)], axis=0)

    wih_pack = jnp.stack([blockdiag(g(wih_f, k), g(wih_b, k)) for k in range(3)])
    whh_pack = jnp.stack([blockdiag(g(whh_f, k), g(whh_b, k)) for k in range(3)])
    # Biases, lane-packed [fwd | bwd].  b_hh of r/z folds into the precomputed
    # gate term; b_hh of n stays separate (PyTorch puts it inside r * (...)).
    b_r = jnp.concatenate([g(bih_f, 0) + g(bhh_f, 0),
                           g(bih_b, 0) + g(bhh_b, 0)], axis=1)
    b_z = jnp.concatenate([g(bih_f, 1) + g(bhh_f, 1),
                           g(bih_b, 1) + g(bhh_b, 1)], axis=1)
    b_n = jnp.concatenate([g(bih_f, 2), g(bih_b, 2)], axis=1)
    bgi = jnp.concatenate([b_r, b_z, b_n], axis=0)            # (3, 2H)
    bhn = jnp.concatenate([g(bhh_f, 2), g(bhh_b, 2)], axis=1)  # (1, 2H)

    w1_c = w1
    if use_bf16:
        # Bulk MXU operands in bf16 (f32 accumulation stays); recurrent path,
        # nonlinearities and LayerNorm stay f32 (v5e has no bf16 VPU/EUP).
        vid_p = vid_p.astype(jnp.bfloat16)
        w1_c = w1.astype(jnp.bfloat16)
        wih_pack = wih_pack.astype(jnp.bfloat16)

    # TODO(synk): on v7x, verify both TensorCores pick up grid steps under
    #             "parallel"; otherwise shard the batch-tile axis with core_map.
    fout_flat, fhid = pl.pallas_call(
        encoder_vid_kernel,
        grid=grid,
        in_specs=[
            pl.BlockSpec((tb, seq, dv), lambda b: (b, 0, 0)),   # vid tile
            pl.BlockSpec((dv, H), lambda b: (0, 0)),            # w1
            pl.BlockSpec((1, H), lambda b: (0, 0)),             # b1
            pl.BlockSpec((3, H2, H2), lambda b: (0, 0, 0)),     # W_ih per gate
            pl.BlockSpec((3, H2, H2), lambda b: (0, 0, 0)),     # W_hh per gate
            pl.BlockSpec((3, H2), lambda b: (0, 0)),            # folded gi biases
            pl.BlockSpec((1, H2), lambda b: (0, 0)),            # b_hn (packed)
        ],
        out_specs=(
            pl.BlockSpec((tb, seq * H2), lambda b: (b, 0)),     # foutput, lane-dense
            pl.BlockSpec((tb, H2), lambda b: (b, 0)),           # fhidden
        ),
        out_shape=(jax.ShapeDtypeStruct((bs_pad, seq * H2), jnp.float32),
                   jax.ShapeDtypeStruct((bs_pad, H2), jnp.float32)),
        compiler_params=pltpu.CompilerParams(
            dimension_semantics=("parallel",)),
    )(vid_p, w1_c, b1, wih_pack, whh_pack, bgi, bhn)

    fout = fout_flat[:bs].reshape(bs, seq, H2)
    return fout, fhid[:bs]


def reference(vid, w1, b1, wih_f, whh_f, bih_f, bhh_f, wih_b, whh_b, bih_b, bhh_b):
    """Pure-JAX reference mirroring the PyTorch forward (fg_mask=None, eval)."""
    bs, seq, dv = vid.shape
    H = w1.shape[1]
    proj = jax.nn.relu(vid.reshape(-1, dv) @ w1 + b1).reshape(bs, seq, H)

    def gru_dir(wih, whh, bih, bhh, xs):
        def step(h, x_t):
            gi = x_t @ wih + bih
            gh = h @ whh + bhh
            r = jax.nn.sigmoid(gi[:, :H] + gh[:, :H])
            z = jax.nn.sigmoid(gi[:, H:2 * H] + gh[:, H:2 * H])
            n = jnp.tanh(gi[:, 2 * H:] + r * gh[:, 2 * H:])
            h_new = (1.0 - z) * n + z * h
            return h_new, h_new
        h0 = jnp.zeros((bs, H), jnp.float32)
        h_last, ys = lax.scan(step, h0, jnp.swapaxes(xs, 0, 1))
        return h_last, jnp.swapaxes(ys, 0, 1)

    hf, of = gru_dir(wih_f, whh_f, bih_f, bhh_f, proj)
    hb, ob_rev = gru_dir(wih_b, whh_b, bih_b, bhh_b, proj[:, ::-1, :])
    ob = ob_rev[:, ::-1, :]
    fout = jnp.concatenate([of, ob], axis=-1)
    fhid = jnp.concatenate([hf, hb], axis=-1)
    mu = fout.mean(-1, keepdims=True)
    var = ((fout - mu) ** 2).mean(-1, keepdims=True)
    return (fout - mu) / jnp.sqrt(var + 1e-5), fhid


if __name__ == "__main__":
    bs, seq, dim_vid, H = 10, 8, 64, 32

    key = jax.random.PRNGKey(0)
    ks = jax.random.split(key, 12)
    vid = jax.random.normal(ks[0], (bs, seq, dim_vid), jnp.float32)

    # vid2hid Linear: xavier-normal weight (stored as (dim_vid, H)), small bias
    std_w1 = (2.0 / (dim_vid + H)) ** 0.5
    w1 = std_w1 * jax.random.normal(ks[1], (dim_vid, H), jnp.float32)
    b1 = 0.1 * jax.random.normal(ks[2], (1, H), jnp.float32)

    # GRU params (PyTorch default init: U(-1/sqrt(H), 1/sqrt(H))), pre-transposed
    bound = 1.0 / (H ** 0.5)
    u = lambda k_, s: jax.random.uniform(k_, s, jnp.float32, -bound, bound)
    wih_f = u(ks[3], (H, 3 * H)); whh_f = u(ks[4], (H, 3 * H))
    bih_f = u(ks[5], (1, 3 * H)); bhh_f = u(ks[6], (1, 3 * H))
    wih_b = u(ks[7], (H, 3 * H)); whh_b = u(ks[8], (H, 3 * H))
    bih_b = u(ks[9], (1, 3 * H)); bhh_b = u(ks[10], (1, 3 * H))

    args = (vid, w1, b1, wih_f, whh_f, bih_f, bhh_f, wih_b, whh_b, bih_b, bhh_b)

    # block_batch=8 -> batch padded 10 -> 16, grid=(2,), "parallel" batch axis.
    fout, fhid = encoder_vid_hga(*args, block_batch=8)
    jax.block_until_ready((fout, fhid))

    rout, rhid = reference(*args)
    assert fout.shape == (bs, seq, 2 * H) and fhid.shape == (bs, 2 * H)
    assert float(jnp.max(jnp.abs(fout - rout))) < 1e-3
    assert float(jnp.max(jnp.abs(fhid - rhid))) < 1e-3

    print("KERNEL_OK")
</pallas_src>

<mosaic_0001>
module attributes {stable_mosaic.version = 11 : i64} {
  func.func @encoder_vid_kernel(%arg0: i32, %arg1: memref<8x8x64xf32, #tpu.memory_space<vmem>>, %arg2: memref<64x32xf32, #tpu.memory_space<vmem>>, %arg3: memref<1x32xf32, #tpu.memory_space<vmem>>, %arg4: memref<3x64x64xf32, #tpu.memory_space<vmem>>, %arg5: memref<3x64x64xf32, #tpu.memory_space<vmem>>, %arg6: memref<3x64xf32, #tpu.memory_space<vmem>>, %arg7: memref<1x64xf32, #tpu.memory_space<vmem>>, %arg8: memref<8x512xf32, #tpu.memory_space<vmem>>, %arg9: memref<8x64xf32, #tpu.memory_space<vmem>>) attributes {dimension_semantics = [#tpu.dimension_semantics<parallel>], iteration_bounds = array<i64: 2>, scalar_prefetch = 0 : i64, scratch_operands = 0 : i64, tpu.core_type = #tpu.core_type<tc>, window_params = [{transform_indices = @transform_0, window_bounds = array<i64: 8, 8, 64>}, {pipeline_mode = #tpu.pipeline_mode<synchronous>, transform_indices = @transform_1, window_bounds = array<i64: 64, 32>}, {pipeline_mode = #tpu.pipeline_mode<synchronous>, transform_indices = @transform_2, window_bounds = array<i64: 1, 32>}, {pipeline_mode = #tpu.pipeline_mode<synchronous>, transform_indices = @transform_3, window_bounds = array<i64: 3, 64, 64>}, {pipeline_mode = #tpu.pipeline_mode<synchronous>, transform_indices = @transform_4, window_bounds = array<i64: 3, 64, 64>}, {pipeline_mode = #tpu.pipeline_mode<synchronous>, transform_indices = @transform_5, window_bounds = array<i64: 3, 64>}, {pipeline_mode = #tpu.pipeline_mode<synchronous>, transform_indices = @transform_6, window_bounds = array<i64: 1, 64>}, {transform_indices = @transform_7, window_bounds = array<i64: 8, 512>}, {transform_indices = @transform_8, window_bounds = array<i64: 8, 64>}]} {
    %c0 = arith.constant 0 : index
    %c0_0 = arith.constant 0 : index
    %c0_1 = arith.constant 0 : index
    %0 = vector.load %arg1[%c0, %c0_0, %c0_1] : memref<8x8x64xf32, #tpu.memory_space<vmem>>, vector<8x8x64xf32>
    %1 = vector.shape_cast %0 : vector<8x8x64xf32> to vector<64x64xf32>
    %c0_2 = arith.constant 0 : index
    %c0_3 = arith.constant 0 : index
    %2 = vector.load %arg2[%c0_2, %c0_3] : memref<64x32xf32, #tpu.memory_space<vmem>>, vector<64x32xf32>
    %cst = arith.constant dense<0.000000e+00> : vector<64x32xf32>
    %3 = tpu.matmul %1, %2, %cst {dimension_numbers = #tpu.dot_dimension_numbers<[1], [0], [0], [1], [0, 0, 1, 1], [], []>} : vector<64x64xf32>, vector<64x32xf32>, vector<64x32xf32> -> vector<64x32xf32>
    %c0_4 = arith.constant 0 : index
    %c0_5 = arith.constant 0 : index
    %4 = vector.load %arg3[%c0_4, %c0_5] : memref<1x32xf32, #tpu.memory_space<vmem>>, vector<1x32xf32>
    %5 = vector.broadcast %4 : vector<1x32xf32> to vector<64x32xf32>
    %6 = arith.addf %3, %5 : vector<64x32xf32>
    %cst_6 = arith.constant 0.000000e+00 : f32
    %7 = vector.broadcast %cst_6 : f32 to vector<64x32xf32>
    %8 = arith.maximumf %6, %7 : vector<64x32xf32>
    %9 = vector.shape_cast %8 : vector<64x32xf32> to vector<8x8x32xf32>
    %10 = vector.extract_strided_slice %9 {offsets = [0, 0, 0], sizes = [8, 1, 32], strides = [1, 1, 1]} : vector<8x8x32xf32> to vector<8x1x32xf32>
    %11 = vector.shape_cast %10 : vector<8x1x32xf32> to vector<8x32xf32>
    %12 = vector.extract_strided_slice %9 {offsets = [0, 7, 0], sizes = [8, 1, 32], strides = [1, 1, 1]} : vector<8x8x32xf32> to vector<8x1x32xf32>
    %13 = vector.shape_cast %12 : vector<8x1x32xf32> to vector<8x32xf32>
    %14 = tpu.concatenate %11, %13 in 1 : vector<8x32xf32>, vector<8x32xf32> -> vector<8x64xf32>
    %15 = vector.extract_strided_slice %9 {offsets = [0, 1, 0], sizes = [8, 1, 32], strides = [1, 1, 1]} : vector<8x8x32xf32> to vector<8x1x32xf32>
    %16 = vector.shape_cast %15 : vector<8x1x32xf32> to vector<8x32xf32>
    %17 = vector.extract_strided_slice %9 {offsets = [0, 6, 0], sizes = [8, 1, 32], strides = [1, 1, 1]} : vector<8x8x32xf32> to vector<8x1x32xf32>
    %18 = vector.shape_cast %17 : vector<8x1x32xf32> to vector<8x32xf32>
    %19 = tpu.concatenate %16, %18 in 1 : vector<8x32xf32>, vector<8x32xf32> -> vector<8x64xf32>
    %20 = vector.extract_strided_slice %9 {offsets = [0, 2, 0], sizes = [8, 1, 32], strides = [1, 1, 1]} : vector<8x8x32xf32> to vector<8x1x32xf32>
    %21 = vector.shape_cast %20 : vector<8x1x32xf32> to vector<8x32xf32>
    %22 = vector.extract_strided_slice %9 {offsets = [0, 5, 0], sizes = [8, 1, 32], strides = [1, 1, 1]} : vector<8x8x32xf32> to vector<8x1x32xf32>
    %23 = vector.shape_cast %22 : vector<8x1x32xf32> to vector<8x32xf32>
    %24 = tpu.concatenate %21, %23 in 1 : vector<8x32xf32>, vector<8x32xf32> -> vector<8x64xf32>
    %25 = vector.extract_strided_slice %9 {offsets = [0, 3, 0], sizes = [8, 1, 32], strides = [1, 1, 1]} : vector<8x8x32xf32> to vector<8x1x32xf32>
    %26 = vector.shape_cast %25 : vector<8x1x32xf32> to vector<8x32xf32>
    %27 = vector.extract_strided_slice %9 {offsets = [0, 4, 0], sizes = [8, 1, 32], strides = [1, 1, 1]} : vector<8x8x32xf32> to vector<8x1x32xf32>
    %28 = vector.shape_cast %27 : vector<8x1x32xf32> to vector<8x32xf32>
    %29 = tpu.concatenate %26, %28 in 1 : vector<8x32xf32>, vector<8x32xf32> -> vector<8x64xf32>
    %30 = vector.extract_strided_slice %9 {offsets = [0, 4, 0], sizes = [8, 1, 32], strides = [1, 1, 1]} : vector<8x8x32xf32> to vector<8x1x32xf32>
    %31 = vector.shape_cast %30 : vector<8x1x32xf32> to vector<8x32xf32>
    %32 = vector.extract_strided_slice %9 {offsets = [0, 3, 0], sizes = [8, 1, 32], strides = [1, 1, 1]} : vector<8x8x32xf32> to vector<8x1x32xf32>
    %33 = vector.shape_cast %32 : vector<8x1x32xf32> to vector<8x32xf32>
    %34 = tpu.concatenate %31, %33 in 1 : vector<8x32xf32>, vector<8x32xf32> -> vector<8x64xf32>
    %35 = vector.extract_strided_slice %9 {offsets = [0, 5, 0], sizes = [8, 1, 32], strides = [1, 1, 1]} : vector<8x8x32xf32> to vector<8x1x32xf32>
    %36 = vector.shape_cast %35 : vector<8x1x32xf32> to vector<8x32xf32>
    %37 = vector.extract_strided_slice %9 {offsets = [0, 2, 0], sizes = [8, 1, 32], strides = [1, 1, 1]} : vector<8x8x32xf32> to vector<8x1x32xf32>
    %38 = vector.shape_cast %37 : vector<8x1x32xf32> to vector<8x32xf32>
    %39 = tpu.concatenate %36, %38 in 1 : vector<8x32xf32>, vector<8x32xf32> -> vector<8x64xf32>
    %40 = vector.extract_strided_slice %9 {offsets = [0, 6, 0], sizes = [8, 1, 32], strides = [1, 1, 1]} : vector<8x8x32xf32> to vector<8x1x32xf32>
    %41 = vector.shape_cast %40 : vector<8x1x32xf32> to vector<8x32xf32>
    %42 = vector.extract_strided_slice %9 {offsets = [0, 1, 0], sizes = [8, 1, 32], strides = [1, 1, 1]} : vector<8x8x32xf32> to vector<8x1x32xf32>
    %43 = vector.shape_cast %42 : vector<8x1x32xf32> to vector<8x32xf32>
    %44 = tpu.concatenate %41, %43 in 1 : vector<8x32xf32>, vector<8x32xf32> -> vector<8x64xf32>
    %45 = vector.extract_strided_slice %9 {offsets = [0, 7, 0], sizes = [8, 1, 32], strides = [1, 1, 1]} : vector<8x8x32xf32> to vector<8x1x32xf32>
    %46 = vector.shape_cast %45 : vector<8x1x32xf32> to vector<8x32xf32>
    %47 = vector.extract_strided_slice %9 {offsets = [0, 0, 0], sizes = [8, 1, 32], strides = [1, 1, 1]} : vector<8x8x32xf32> to vector<8x1x32xf32>
    %48 = vector.shape_cast %47 : vector<8x1x32xf32> to vector<8x32xf32>
    %49 = tpu.concatenate %46, %48 in 1 : vector<8x32xf32>, vector<8x32xf32> -> vector<8x64xf32>
    %50 = tpu.concatenate %14, %19, %24, %29, %34, %39, %44, %49 in 0 : vector<8x64xf32>, vector<8x64xf32>, vector<8x64xf32>, vector<8x64xf32>, vector<8x64xf32>, vector<8x64xf32>, vector<8x64xf32>, vector<8x64xf32> -> vector<64x64xf32>
    %c0_7 = arith.constant 0 : index
    %c0_8 = arith.constant 0 : index
    %51 = vector.load %arg6[%c0_7, %c0_8] : memref<3x64xf32, #tpu.memory_space<vmem>>, vector<3x64xf32>
    %c0_9 = arith.constant 0 : index
    %c0_10 = arith.constant 0 : index
    %c0_11 = arith.constant 0 : index
    %52 = vector.load %arg4[%c0_9, %c0_10, %c0_11] : memref<3x64x64xf32, #tpu.memory_space<vmem>>, vector<1x64x64xf32>
    %53 = vector.shape_cast %52 : vector<1x64x64xf32> to vector<64x64xf32>
    %cst_12 = arith.constant dense<0.000000e+00> : vector<64x64xf32>
    %54 = tpu.matmul %50, %53, %cst_12 {dimension_numbers = #tpu.dot_dimension_numbers<[1], [0], [0], [1], [0, 0, 1, 1], [], []>} : vector<64x64xf32>, vector<64x64xf32>, vector<64x64xf32> -> vector<64x64xf32>
    %55 = vector.extract_strided_slice %51 {offsets = [0, 0], sizes = [1, 64], strides = [1, 1]} : vector<3x64xf32> to vector<1x64xf32>
    %56 = vector.shape_cast %55 : vector<1x64xf32> to vector<64xf32>
    %57 = vector.shape_cast %56 : vector<64xf32> to vector<1x64xf32>
    %58 = vector.broadcast %57 : vector<1x64xf32> to vector<64x64xf32>
    %59 = arith.addf %54, %58 : vector<64x64xf32>
    %60 = vector.shape_cast %59 : vector<64x64xf32> to vector<8x8x64xf32>
    %c1 = arith.constant 1 : index
    %c0_13 = arith.constant 0 : index
    %c0_14 = arith.constant 0 : index
    %61 = vector.load %arg4[%c1, %c0_13, %c0_14] : memref<3x64x64xf32, #tpu.memory_space<vmem>>, vector<1x64x64xf32>
    %62 = vector.shape_cast %61 : vector<1x64x64xf32> to vector<64x64xf32>
    %cst_15 = arith.constant dense<0.000000e+00> : vector<64x64xf32>
    %63 = tpu.matmul %50, %62, %cst_15 {dimension_numbers = #tpu.dot_dimension_numbers<[1], [0], [0], [1], [0, 0, 1, 1], [], []>} : vector<64x64xf32>, vector<64x64xf32>, vector<64x64xf32> -> vector<64x64xf32>
    %64 = vector.extract_strided_slice %51 {offsets = [1, 0], sizes = [1, 64], strides = [1, 1]} : vector<3x64xf32> to vector<1x64xf32>
    %65 = vector.shape_cast %64 : vector<1x64xf32> to vector<64xf32>
    %66 = vector.shape_cast %65 : vector<64xf32> to vector<1x64xf32>
    %67 = vector.broadcast %66 : vector<1x64xf32> to vector<64x64xf32>
    %68 = arith.addf %63, %67 : vector<64x64xf32>
    %69 = vector.shape_cast %68 : vector<64x64xf32> to vector<8x8x64xf32>
    %c2 = arith.constant 2 : index
    %c0_16 = arith.constant 0 : index
    %c0_17 = arith.constant 0 : index
    %70 = vector.load %arg4[%c2, %c0_16, %c0_17] : memref<3x64x64xf32, #tpu.memory_space<vmem>>, vector<1x64x64xf32>
    %71 = vector.shape_cast %70 : vector<1x64x64xf32> to vector<64x64xf32>
    %cst_18 = arith.constant dense<0.000000e+00> : vector<64x64xf32>
    %72 = tpu.matmul %50, %71, %cst_18 {dimension_numbers = #tpu.dot_dimension_numbers<[1], [0], [0], [1], [0, 0, 1, 1], [], []>} : vector<64x64xf32>, vector<64x64xf32>, vector<64x64xf32> -> vector<64x64xf32>
    %73 = vector.extract_strided_slice %51 {offsets = [2, 0], sizes = [1, 64], strides = [1, 1]} : vector<3x64xf32> to vector<1x64xf32>
    %74 = vector.shape_cast %73 : vector<1x64xf32> to vector<64xf32>
    %75 = vector.shape_cast %74 : vector<64xf32> to vector<1x64xf32>
    %76 = vector.broadcast %75 : vector<1x64xf32> to vector<64x64xf32>
    %77 = arith.addf %72, %76 : vector<64x64xf32>
    %78 = vector.shape_cast %77 : vector<64x64xf32> to vector<8x8x64xf32>
    %c0_19 = arith.constant 0 : index
    %c0_20 = arith.constant 0 : index
    %c0_21 = arith.constant 0 : index
    %79 = vector.load %arg5[%c0_19, %c0_20, %c0_21] : memref<3x64x64xf32, #tpu.memory_space<vmem>>, vector<1x64x64xf32>
    %80 = vector.shape_cast %79 : vector<1x64x64xf32> to vector<64x64xf32>
    %c1_22 = arith.constant 1 : index
    %c0_23 = arith.constant 0 : index
    %c0_24 = arith.constant 0 : index
    %81 = vector.load %arg5[%c1_22, %c0_23, %c0_24] : memref<3x64x64xf32, #tpu.memory_space<vmem>>, vector<1x64x64xf32>
    %82 = vector.shape_cast %81 : vector<1x64x64xf32> to vector<64x64xf32>
    %c2_25 = arith.constant 2 : index
    %c0_26 = arith.constant 0 : index
    %c0_27 = arith.constant 0 : index
    %83 = vector.load %arg5[%c2_25, %c0_26, %c0_27] : memref<3x64x64xf32, #tpu.memory_space<vmem>>, vector<1x64x64xf32>
    %84 = vector.shape_cast %83 : vector<1x64x64xf32> to vector<64x64xf32>
    %c0_28 = arith.constant 0 : index
    %c0_29 = arith.constant 0 : index
    %85 = vector.load %arg7[%c0_28, %c0_29] : memref<1x64xf32, #tpu.memory_space<vmem>>, vector<1x64xf32>
    %86 = vector.shape_cast %85 : vector<1x64xf32> to vector<1x64xf32>
    %87 = vector.broadcast %86 : vector<1x64xf32> to vector<8x64xf32>
    %cst_30 = arith.constant 0.000000e+00 : f32
    %88 = vector.broadcast %cst_30 : f32 to vector<8x64xf32>
    %89 = vector.extract_strided_slice %60 {offsets = [0, 0, 0], sizes = [1, 8, 64], strides = [1, 1, 1]} : vector<8x8x64xf32> to vector<1x8x64xf32>
    %90 = vector.shape_cast %89 : vector<1x8x64xf32> to vector<8x64xf32>
    %cst_31 = arith.constant dense<0.000000e+00> : vector<8x64xf32>
    %91 = tpu.matmul %88, %80, %cst_31 {dimension_numbers = #tpu.dot_dimension_numbers<[1], [0], [0], [1], [0, 0, 1, 1], [], []>} : vector<8x64xf32>, vector<64x64xf32>, vector<8x64xf32> -> vector<8x64xf32>
    %92 = arith.addf %90, %91 : vector<8x64xf32>
    %93 = arith.negf %92 : vector<8x64xf32>
    %94 = math.exp %93 : vector<8x64xf32>
    %cst_32 = arith.constant 1.000000e+00 : f32
    %95 = vector.broadcast %cst_32 : f32 to vector<8x64xf32>
    %96 = arith.addf %95, %94 : vector<8x64xf32>
    %97 = arith.divf %95, %96 : vector<8x64xf32>
    %98 = vector.extract_strided_slice %69 {offsets = [0, 0, 0], sizes = [1, 8, 64], strides = [1, 1, 1]} : vector<8x8x64xf32> to vector<1x8x64xf32>
    %99 = vector.shape_cast %98 : vector<1x8x64xf32> to vector<8x64xf32>
    %cst_33 = arith.constant dense<0.000000e+00> : vector<8x64xf32>
    %100 = tpu.matmul %88, %82, %cst_33 {dimension_numbers = #tpu.dot_dimension_numbers<[1], [0], [0], [1], [0, 0, 1, 1], [], []>} : vector<8x64xf32>, vector<64x64xf32>, vector<8x64xf32> -> vector<8x64xf32>
    %101 = arith.addf %99, %100 : vector<8x64xf32>
    %102 = arith.negf %101 : vector<8x64xf32>
    %103 = math.exp %102 : vector<8x64xf32>
    %cst_34 = arith.constant 1.000000e+00 : f32
    %104 = vector.broadcast %cst_34 : f32 to vector<8x64xf32>
    %105 = arith.addf %104, %103 : vector<8x64xf32>
    %106 = arith.divf %104, %105 : vector<8x64xf32>
    %107 = vector.extract_strided_slice %78 {offsets = [0, 0, 0], sizes = [1, 8, 64], strides = [1, 1, 1]} : vector<8x8x64xf32> to vector<1x8x64xf32>
    %108 = vector.shape_cast %107 : vector<1x8x64xf32> to vector<8x64xf32>
    %cst_35 = arith.constant dense<0.000000e+00> : vector<8x64xf32>
    %109 = tpu.matmul %88, %84, %cst_35 {dimension_numbers = #tpu.dot_dimension_numbers<[1], [0], [0], [1], [0, 0, 1, 1], [], []>} : vector<8x64xf32>, vector<64x64xf32>, vector<8x64xf32> -> vector<8x64xf32>
    %110 = arith.addf %109, %87 : vector<8x64xf32>
    %111 = arith.mulf %97, %110 : vector<8x64xf32>
    %112 = arith.addf %108, %111 : vector<8x64xf32>
    %113 = math.tanh %112 : vector<8x64xf32>
    %cst_36 = arith.constant 1.000000e+00 : f32
    %114 = vector.broadcast %cst_36 : f32 to vector<8x64xf32>
    %115 = arith.subf %114, %106 : vector<8x64xf32>
    %116 = arith.mulf %115, %113 : vector<8x64xf32>
    %117 = arith.mulf %106, %88 : vector<8x64xf32>
    %118 = arith.addf %116, %117 : vector<8x64xf32>
    %119 = vector.extract_strided_slice %60 {offsets = [1, 0, 0], sizes = [1, 8, 64], strides = [1, 1, 1]} : vector<8x8x64xf32> to vector<1x8x64xf32>
    %120 = vector.shape_cast %119 : vector<1x8x64xf32> to vector<8x64xf32>
    %cst_37 = arith.constant dense<0.000000e+00> : vector<8x64xf32>
    %121 = tpu.matmul %118, %80, %cst_37 {dimension_numbers = #tpu.dot_dimension_numbers<[1], [0], [0], [1], [0, 0, 1, 1], [], []>} : vector<8x64xf32>, vector<64x64xf32>, vector<8x64xf32> -> vector<8x64xf32>
    %122 = arith.addf %120, %121 : vector<8x64xf32>
    %123 = arith.negf %122 : vector<8x64xf32>
    %124 = math.exp %123 : vector<8x64xf32>
    %cst_38 = arith.constant 1.000000e+00 : f32
    %125 = vector.broadcast %cst_38 : f32 to vector<8x64xf32>
    %126 = arith.addf %125, %124 : vector<8x64xf32>
    %127 = arith.divf %125, %126 : vector<8x64xf32>
    %128 = vector.extract_strided_slice %69 {offsets = [1, 0, 0], sizes = [1, 8, 64], strides = [1, 1, 1]} : vector<8x8x64xf32> to vector<1x8x64xf32>
    %129 = vector.shape_cast %128 : vector<1x8x64xf32> to vector<8x64xf32>
    %cst_39 = arith.constant dense<0.000000e+00> : vector<8x64xf32>
    %130 = tpu.matmul %118, %82, %cst_39 {dimension_numbers = #tpu.dot_dimension_numbers<[1], [0], [0], [1], [0, 0, 1, 1], [], []>} : vector<8x64xf32>, vector<64x64xf32>, vector<8x64xf32> -> vector<8x64xf32>
    %131 = arith.addf %129, %130 : vector<8x64xf32>
    %132 = arith.negf %131 : vector<8x64xf32>
    %133 = math.exp %132 : vector<8x64xf32>
    %cst_40 = arith.constant 1.000000e+00 : f32
    %134 = vector.broadcast %cst_40 : f32 to vector<8x64xf32>
    %135 = arith.addf %134, %133 : vector<8x64xf32>
    %136 = arith.divf %134, %135 : vector<8x64xf32>
    %137 = vector.extract_strided_slice %78 {offsets = [1, 0, 0], sizes = [1, 8, 64], strides = [1, 1, 1]} : vector<8x8x64xf32> to vector<1x8x64xf32>
    %138 = vector.shape_cast %137 : vector<1x8x64xf32> to vector<8x64xf32>
    %cst_41 = arith.constant dense<0.000000e+00> : vector<8x64xf32>
    %139 = tpu.matmul %118, %84, %cst_41 {dimension_numbers = #tpu.dot_dimension_numbers<[1], [0], [0], [1], [0, 0, 1, 1], [], []>} : vector<8x64xf32>, vector<64x64xf32>, vector<8x64xf32> -> vector<8x64xf32>
    %140 = arith.addf %139, %87 : vector<8x64xf32>
    %141 = arith.mulf %127, %140 : vector<8x64xf32>
    %142 = arith.addf %138, %141 : vector<8x64xf32>
    %143 = math.tanh %142 : vector<8x64xf32>
    %cst_42 = arith.constant 1.000000e+00 : f32
    %144 = vector.broadcast %cst_42 : f32 to vector<8x64xf32>
    %145 = arith.subf %144, %136 : vector<8x64xf32>
    %146 = arith.mulf %145, %143 : vector<8x64xf32>
    %147 = arith.mulf %136, %118 : vector<8x64xf32>
    %148 = arith.addf %146, %147 : vector<8x64xf32>
    %149 = vector.extract_strided_slice %60 {offsets = [2, 0, 0], sizes = [1, 8, 64], strides = [1, 1, 1]} : vector<8x8x64xf32> to vector<1x8x64xf32>
    %150 = vector.shape_cast %149 : vector<1x8x64xf32> to vector<8x64xf32>
    %cst_43 = arith.constant dense<0.000000e+00> : vector<8x64xf32>
    %151 = tpu.matmul %148, %80, %cst_43 {dimension_numbers = #tpu.dot_dimension_numbers<[1], [0], [0], [1], [0, 0, 1, 1], [], []>} : vector<8x64xf32>, vector<64x64xf32>, vector<8x64xf32> -> vector<8x64xf32>
    %152 = arith.addf %150, %151 : vector<8x64xf32>
    %153 = arith.negf %152 : vector<8x64xf32>
    %154 = math.exp %153 : vector<8x64xf32>
    %cst_44 = arith.constant 1.000000e+00 : f32
    %155 = vector.broadcast %cst_44 : f32 to vector<8x64xf32>
    %156 = arith.addf %155, %154 : vector<8x64xf32>
    %157 = arith.divf %155, %156 : vector<8x64xf32>
    %158 = vector.extract_strided_slice %69 {offsets = [2, 0, 0], sizes = [1, 8, 64], strides = [1, 1, 1]} : vector<8x8x64xf32> to vector<1x8x64xf32>
    %159 = vector.shape_cast %158 : vector<1x8x64xf32> to vector<8x64xf32>
    %cst_45 = arith.constant dense<0.000000e+00> : vector<8x64xf32>
    %160 = tpu.matmul %148, %82, %cst_45 {dimension_numbers = #tpu.dot_dimension_numbers<[1], [0], [0], [1], [0, 0, 1, 1], [], []>} : vector<8x64xf32>, vector<64x64xf32>, vector<8x64xf32> -> vector<8x64xf32>
    %161 = arith.addf %159, %160 : vector<8x64xf32>
    %162 = arith.negf %161 : vector<8x64xf32>
    %163 = math.exp %162 : vector<8x64xf32>
    %cst_46 = arith.constant 1.000000e+00 : f32
    %164 = vector.broadcast %cst_46 : f32 to vector<8x64xf32>
    %165 = arith.addf %164, %163 : vector<8x64xf32>
    %166 = arith.divf %164, %165 : vector<8x64xf32>
    %167 = vector.extract_strided_slice %78 {offsets = [2, 0, 0], sizes = [1, 8, 64], strides = [1, 1, 1]} : vector<8x8x64xf32> to vector<1x8x64xf32>
    %168 = vector.shape_cast %167 : vector<1x8x64xf32> to vector<8x64xf32>
    %cst_47 = arith.constant dense<0.000000e+00> : vector<8x64xf32>
    %169 = tpu.matmul %148, %84, %cst_47 {dimension_numbers = #tpu.dot_dimension_numbers<[1], [0], [0], [1], [0, 0, 1, 1], [], []>} : vector<8x64xf32>, vector<64x64xf32>, vector<8x64xf32> -> vector<8x64xf32>
    %170 = arith.addf %169, %87 : vector<8x64xf32>
    %171 = arith.mulf %157, %170 : vector<8x64xf32>
    %172 = arith.addf %168, %171 : vector<8x64xf32>
    %173 = math.tanh %172 : vector<8x64xf32>
    %cst_48 = arith.constant 1.000000e+00 : f32
    %174 = vector.broadcast %cst_48 : f32 to vector<8x64xf32>
    %175 = arith.subf %174, %166 : vector<8x64xf32>
    %176 = arith.mulf %175, %173 : vector<8x64xf32>
    %177 = arith.mulf %166, %148 : vector<8x64xf32>
    %178 = arith.addf %176, %177 : vector<8x64xf32>
    %179 = vector.extract_strided_slice %60 {offsets = [3, 0, 0], sizes = [1, 8, 64], strides = [1, 1, 1]} : vector<8x8x64xf32> to vector<1x8x64xf32>
    %180 = vector.shape_cast %179 : vector<1x8x64xf32> to vector<8x64xf32>
    %cst_49 = arith.constant dense<0.000000e+00> : vector<8x64xf32>
    %181 = tpu.matmul %178, %80, %cst_49 {dimension_numbers = #tpu.dot_dimension_numbers<[1], [0], [0], [1], [0, 0, 1, 1], [], []>} : vector<8x64xf32>, vector<64x64xf32>, vector<8x64xf32> -> vector<8x64xf32>
    %182 = arith.addf %180, %181 : vector<8x64xf32>
    %183 = arith.negf %182 : vector<8x64xf32>
    %184 = math.exp %183 : vector<8x64xf32>
    %cst_50 = arith.constant 1.000000e+00 : f32
    %185 = vector.broadcast %cst_50 : f32 to vector<8x64xf32>
    %186 = arith.addf %185, %184 : vector<8x64xf32>
    %187 = arith.divf %185, %186 : vector<8x64xf32>
    %188 = vector.extract_strided_slice %69 {offsets = [3, 0, 0], sizes = [1, 8, 64], strides = [1, 1, 1]} : vector<8x8x64xf32> to vector<1x8x64xf32>
    %189 = vector.shape_cast %188 : vector<1x8x64xf32> to vector<8x64xf32>
    %cst_51 = arith.constant dense<0.000000e+00> : vector<8x64xf32>
    %190 = tpu.matmul %178, %82, %cst_51 {dimension_numbers = #tpu.dot_dimension_numbers<[1], [0], [0], [1], [0, 0, 1, 1], [], []>} : vector<8x64xf32>, vector<64x64xf32>, vector<8x64xf32> -> vector<8x64xf32>
    %191 = arith.addf %189, %190 : vector<8x64xf32>
    %192 = arith.negf %191 : vector<8x64xf32>
    %193 = math.exp %192 : vector<8x64xf32>
    %cst_52 = arith.constant 1.000000e+00 : f32
    %194 = vector.broadcast %cst_52 : f32 to vector<8x64xf32>
    %195 = arith.addf %194, %193 : vector<8x64xf32>
    %196 = arith.divf %194, %195 : vector<8x64xf32>
    %197 = vector.extract_strided_slice %78 {offsets = [3, 0, 0], sizes = [1, 8, 64], strides = [1, 1, 1]} : vector<8x8x64xf32> to vector<1x8x64xf32>
    %198 = vector.shape_cast %197 : vector<1x8x64xf32> to vector<8x64xf32>
    %cst_53 = arith.constant dense<0.000000e+00> : vector<8x64xf32>
    %199 = tpu.matmul %178, %84, %cst_53 {dimension_numbers = #tpu.dot_dimension_numbers<[1], [0], [0], [1], [0, 0, 1, 1], [], []>} : vector<8x64xf32>, vector<64x64xf32>, vector<8x64xf32> -> vector<8x64xf32>
    %200 = arith.addf %199, %87 : vector<8x64xf32>
    %201 = arith.mulf %187, %200 : vector<8x64xf32>
    %202 = arith.addf %198, %201 : vector<8x64xf32>
    %203 = math.tanh %202 : vector<8x64xf32>
    %cst_54 = arith.constant 1.000000e+00 : f32
    %204 = vector.broadcast %cst_54 : f32 to vector<8x64xf32>
    %205 = arith.subf %204, %196 : vector<8x64xf32>
    %206 = arith.mulf %205, %203 : vector<8x64xf32>
    %207 = arith.mulf %196, %178 : vector<8x64xf32>
    %208 = arith.addf %206, %207 : vector<8x64xf32>
    %209 = vector.extract_strided_slice %60 {offsets = [4, 0, 0], sizes = [1, 8, 64], strides = [1, 1, 1]} : vector<8x8x64xf32> to vector<1x8x64xf32>
    %210 = vector.shape_cast %209 : vector<1x8x64xf32> to vector<8x64xf32>
    %cst_55 = arith.constant dense<0.000000e+00> : vector<8x64xf32>
    %211 = tpu.matmul %208, %80, %cst_55 {dimension_numbers = #tpu.dot_dimension_numbers<[1], [0], [0], [1], [0, 0, 1, 1], [], []>} : vector<8x64xf32>, vector<64x64xf32>, vector<8x64xf32> -> vector<8x64xf32>
    %212 = arith.addf %210, %211 : vector<8x64xf32>
    %213 = arith.negf %212 : vector<8x64xf32>
    %214 = math.exp %213 : vector<8x64xf32>
    %cst_56 = arith.constant 1.000000e+00 : f32
    %215 = vector.broadcast %cst_56 : f32 to vector<8x64xf32>
    %216 = arith.addf %215, %214 : vector<8x64xf32>
    %217 = arith.divf %215, %216 : vector<8x64xf32>
    %218 = vector.extract_strided_slice %69 {offsets = [4, 0, 0], sizes = [1, 8, 64], strides = [1, 1, 1]} : vector<8x8x64xf32> to vector<1x8x64xf32>
    %219 = vector.shape_cast %218 : vector<1x8x64xf32> to vector<8x64xf32>
    %cst_57 = arith.constant dense<0.000000e+00> : vector<8x64xf32>
    %220 = tpu.matmul %208, %82, %cst_57 {dimension_numbers = #tpu.dot_dimension_numbers<[1], [0], [0], [1], [0, 0, 1, 1], [], []>} : vector<8x64xf32>, vector<64x64xf32>, vector<8x64xf32> -> vector<8x64xf32>
    %221 = arith.addf %219, %220 : vector<8x64xf32>
    %222 = arith.negf %221 : vector<8x64xf32>
    %223 = math.exp %222 : vector<8x64xf32>
    %cst_58 = arith.constant 1.000000e+00 : f32
    %224 = vector.broadcast %cst_58 : f32 to vector<8x64xf32>
    %225 = arith.addf %224, %223 : vector<8x64xf32>
    %226 = arith.divf %224, %225 : vector<8x64xf32>
    %227 = vector.extract_strided_slice %78 {offsets = [4, 0, 0], sizes = [1, 8, 64], strides = [1, 1, 1]} : vector<8x8x64xf32> to vector<1x8x64xf32>
    %228 = vector.shape_cast %227 : vector<1x8x64xf32> to vector<8x64xf32>
    %cst_59 = arith.constant dense<0.000000e+00> : vector<8x64xf32>
    %229 = tpu.matmul %208, %84, %cst_59 {dimension_numbers = #tpu.dot_dimension_numbers<[1], [0], [0], [1], [0, 0, 1, 1], [], []>} : vector<8x64xf32>, vector<64x64xf32>, vector<8x64xf32> -> vector<8x64xf32>
    %230 = arith.addf %229, %87 : vector<8x64xf32>
    %231 = arith.mulf %217, %230 : vector<8x64xf32>
    %232 = arith.addf %228, %231 : vector<8x64xf32>
    %233 = math.tanh %232 : vector<8x64xf32>
    %cst_60 = arith.constant 1.000000e+00 : f32
    %234 = vector.broadcast %cst_60 : f32 to vector<8x64xf32>
    %235 = arith.subf %234, %226 : vector<8x64xf32>
    %236 = arith.mulf %235, %233 : vector<8x64xf32>
    %237 = arith.mulf %226, %208 : vector<8x64xf32>
    %238 = arith.addf %236, %237 : vector<8x64xf32>
    %239 = vector.extract_strided_slice %60 {offsets = [5, 0, 0], sizes = [1, 8, 64], strides = [1, 1, 1]} : vector<8x8x64xf32> to vector<1x8x64xf32>
    %240 = vector.shape_cast %239 : vector<1x8x64xf32> to vector<8x64xf32>
    %cst_61 = arith.constant dense<0.000000e+00> : vector<8x64xf32>
    %241 = tpu.matmul %238, %80, %cst_61 {dimension_numbers = #tpu.dot_dimension_numbers<[1], [0], [0], [1], [0, 0, 1, 1], [], []>} : vector<8x64xf32>, vector<64x64xf32>, vector<8x64xf32> -> vector<8x64xf32>
    %242 = arith.addf %240, %241 : vector<8x64xf32>
    %243 = arith.negf %242 : vector<8x64xf32>
    %244 = math.exp %243 : vector<8x64xf32>
    %cst_62 = arith.constant 1.000000e+00 : f32
    %245 = vector.broadcast %cst_62 : f32 to vector<8x64xf32>
    %246 = arith.addf %245, %244 : vector<8x64xf32>
    %247 = arith.divf %245, %246 : vector<8x64xf32>
    %248 = vector.extract_strided_slice %69 {offsets = [5, 0, 0], sizes = [1, 8, 64], strides = [1, 1, 1]} : vector<8x8x64xf32> to vector<1x8x64xf32>
    %249 = vector.shape_cast %248 : vector<1x8x64xf32> to vector<8x64xf32>
    %cst_63 = arith.constant dense<0.000000e+00> : vector<8x64xf32>
    %250 = tpu.matmul %238, %82, %cst_63 {dimension_numbers = #tpu.dot_dimension_numbers<[1], [0], [0], [1], [0, 0, 1, 1], [], []>} : vector<8x64xf32>, vector<64x64xf32>, vector<8x64xf32> -> vector<8x64xf32>
    %251 = arith.addf %249, %250 : vector<8x64xf32>
    %252 = arith.negf %251 : vector<8x64xf32>
    %253 = math.exp %252 : vector<8x64xf32>
    %cst_64 = arith.constant 1.000000e+00 : f32
    %254 = vector.broadcast %cst_64 : f32 to vector<8x64xf32>
    %255 = arith.addf %254, %253 : vector<8x64xf32>
    %256 = arith.divf %254, %255 : vector<8x64xf32>
    %257 = vector.extract_strided_slice %78 {offsets = [5, 0, 0], sizes = [1, 8, 64], strides = [1, 1, 1]} : vector<8x8x64xf32> to vector<1x8x64xf32>
    %258 = vector.shape_cast %257 : vector<1x8x64xf32> to vector<8x64xf32>
    %cst_65 = arith.constant dense<0.000000e+00> : vector<8x64xf32>
    %259 = tpu.matmul %238, %84, %cst_65 {dimension_numbers = #tpu.dot_dimension_numbers<[1], [0], [0], [1], [0, 0, 1, 1], [], []>} : vector<8x64xf32>, vector<64x64xf32>, vector<8x64xf32> -> vector<8x64xf32>
    %260 = arith.addf %259, %87 : vector<8x64xf32>
    %261 = arith.mulf %247, %260 : vector<8x64xf32>
    %262 = arith.addf %258, %261 : vector<8x64xf32>
    %263 = math.tanh %262 : vector<8x64xf32>
    %cst_66 = arith.constant 1.000000e+00 : f32
    %264 = vector.broadcast %cst_66 : f32 to vector<8x64xf32>
    %265 = arith.subf %264, %256 : vector<8x64xf32>
    %266 = arith.mulf %265, %263 : vector<8x64xf32>
    %267 = arith.mulf %256, %238 : vector<8x64xf32>
    %268 = arith.addf %266, %267 : vector<8x64xf32>
    %269 = vector.extract_strided_slice %60 {offsets = [6, 0, 0], sizes = [1, 8, 64], strides = [1, 1, 1]} : vector<8x8x64xf32> to vector<1x8x64xf32>
    %270 = vector.shape_cast %269 : vector<1x8x64xf32> to vector<8x64xf32>
    %cst_67 = arith.constant dense<0.000000e+00> : vector<8x64xf32>
    %271 = tpu.matmul %268, %80, %cst_67 {dimension_numbers = #tpu.dot_dimension_numbers<[1], [0], [0], [1], [0, 0, 1, 1], [], []>} : vector<8x64xf32>, vector<64x64xf32>, vector<8x64xf32> -> vector<8x64xf32>
    %272 = arith.addf %270, %271 : vector<8x64xf32>
    %273 = arith.negf %272 : vector<8x64xf32>
    %274 = math.exp %273 : vector<8x64xf32>
    %cst_68 = arith.constant 1.000000e+00 : f32
    %275 = vector.broadcast %cst_68 : f32 to vector<8x64xf32>
    %276 = arith.addf %275, %274 : vector<8x64xf32>
    %277 = arith.divf %275, %276 : vector<8x64xf32>
    %278 = vector.extract_strided_slice %69 {offsets = [6, 0, 0], sizes = [1, 8, 64], strides = [1, 1, 1]} : vector<8x8x64xf32> to vector<1x8x64xf32>
    %279 = vector.shape_cast %278 : vector<1x8x64xf32> to vector<8x64xf32>
    %cst_69 = arith.constant dense<0.000000e+00> : vector<8x64xf32>
    %280 = tpu.matmul %268, %82, %cst_69 {dimension_numbers = #tpu.dot_dimension_numbers<[1], [0], [0], [1], [0, 0, 1, 1], [], []>} : vector<8x64xf32>, vector<64x64xf32>, vector<8x64xf32> -> vector<8x64xf32>
    %281 = arith.addf %279, %280 : vector<8x64xf32>
    %282 = arith.negf %281 : vector<8x64xf32>
    %283 = math.exp %282 : vector<8x64xf32>
    %cst_70 = arith.constant 1.000000e+00 : f32
    %284 = vector.broadcast %cst_70 : f32 to vector<8x64xf32>
    %285 = arith.addf %284, %283 : vector<8x64xf32>
    %286 = arith.divf %284, %285 : vector<8x64xf32>
    %287 = vector.extract_strided_slice %78 {offsets = [6, 0, 0], sizes = [1, 8, 64], strides = [1, 1, 1]} : vector<8x8x64xf32> to vector<1x8x64xf32>
    %288 = vector.shape_cast %287 : vector<1x8x64xf32> to vector<8x64xf32>
    %cst_71 = arith.constant dense<0.000000e+00> : vector<8x64xf32>
    %289 = tpu.matmul %268, %84, %cst_71 {dimension_numbers = #tpu.dot_dimension_numbers<[1], [0], [0], [1], [0, 0, 1, 1], [], []>} : vector<8x64xf32>, vector<64x64xf32>, vector<8x64xf32> -> vector<8x64xf32>
    %290 = arith.addf %289, %87 : vector<8x64xf32>
    %291 = arith.mulf %277, %290 : vector<8x64xf32>
    %292 = arith.addf %288, %291 : vector<8x64xf32>
    %293 = math.tanh %292 : vector<8x64xf32>
    %cst_72 = arith.constant 1.000000e+00 : f32
    %294 = vector.broadcast %cst_72 : f32 to vector<8x64xf32>
    %295 = arith.subf %294, %286 : vector<8x64xf32>
    %296 = arith.mulf %295, %293 : vector<8x64xf32>
    %297 = arith.mulf %286, %268 : vector<8x64xf32>
    %298 = arith.addf %296, %297 : vector<8x64xf32>
    %299 = vector.extract_strided_slice %60 {offsets = [7, 0, 0], sizes = [1, 8, 64], strides = [1, 1, 1]} : vector<8x8x64xf32> to vector<1x8x64xf32>
    %300 = vector.shape_cast %299 : vector<1x8x64xf32> to vector<8x64xf32>
    %cst_73 = arith.constant dense<0.000000e+00> : vector<8x64xf32>
    %301 = tpu.matmul %298, %80, %cst_73 {dimension_numbers = #tpu.dot_dimension_numbers<[1], [0], [0], [1], [0, 0, 1, 1], [], []>} : vector<8x64xf32>, vector<64x64xf32>, vector<8x64xf32> -> vector<8x64xf32>
    %302 = arith.addf %300, %301 : vector<8x64xf32>
    %303 = arith.negf %302 : vector<8x64xf32>
    %304 = math.exp %303 : vector<8x64xf32>
    %cst_74 = arith.constant 1.000000e+00 : f32
    %305 = vector.broadcast %cst_74 : f32 to vector<8x64xf32>
    %306 = arith.addf %305, %304 : vector<8x64xf32>
    %307 = arith.divf %305, %306 : vector<8x64xf32>
    %308 = vector.extract_strided_slice %69 {offsets = [7, 0, 0], sizes = [1, 8, 64], strides = [1, 1, 1]} : vector<8x8x64xf32> to vector<1x8x64xf32>
    %309 = vector.shape_cast %308 : vector<1x8x64xf32> to vector<8x64xf32>
    %cst_75 = arith.constant dense<0.000000e+00> : vector<8x64xf32>
    %310 = tpu.matmul %298, %82, %cst_75 {dimension_numbers = #tpu.dot_dimension_numbers<[1], [0], [0], [1], [0, 0, 1, 1], [], []>} : vector<8x64xf32>, vector<64x64xf32>, vector<8x64xf32> -> vector<8x64xf32>
    %311 = arith.addf %309, %310 : vector<8x64xf32>
    %312 = arith.negf %311 : vector<8x64xf32>
    %313 = math.exp %312 : vector<8x64xf32>
    %cst_76 = arith.constant 1.000000e+00 : f32
    %314 = vector.broadcast %cst_76 : f32 to vector<8x64xf32>
    %315 = arith.addf %314, %313 : vector<8x64xf32>
    %316 = arith.divf %314, %315 : vector<8x64xf32>
    %317 = vector.extract_strided_slice %78 {offsets = [7, 0, 0], sizes = [1, 8, 64], strides = [1, 1, 1]} : vector<8x8x64xf32> to vector<1x8x64xf32>
    %318 = vector.shape_cast %317 : vector<1x8x64xf32> to vector<8x64xf32>
    %cst_77 = arith.constant dense<0.000000e+00> : vector<8x64xf32>
    %319 = tpu.matmul %298, %84, %cst_77 {dimension_numbers = #tpu.dot_dimension_numbers<[1], [0], [0], [1], [0, 0, 1, 1], [], []>} : vector<8x64xf32>, vector<64x64xf32>, vector<8x64xf32> -> vector<8x64xf32>
    %320 = arith.addf %319, %87 : vector<8x64xf32>
    %321 = arith.mulf %307, %320 : vector<8x64xf32>
    %322 = arith.addf %318, %321 : vector<8x64xf32>
    %323 = math.tanh %322 : vector<8x64xf32>
    %cst_78 = arith.constant 1.000000e+00 : f32
    %324 = vector.broadcast %cst_78 : f32 to vector<8x64xf32>
    %325 = arith.subf %324, %316 : vector<8x64xf32>
    %326 = arith.mulf %325, %323 : vector<8x64xf32>
    %327 = arith.mulf %316, %298 : vector<8x64xf32>
    %328 = arith.addf %326, %327 : vector<8x64xf32>
    %c0_79 = arith.constant 0 : index
    %c0_80 = arith.constant 0 : index
    %329 = vector.load %arg9[%c0_79, %c0_80] : memref<8x64xf32, #tpu.memory_space<vmem>>, vector<8x64xf32>
    tpu.vector_store %arg9[%c0_79, %c0_80], %328 {strides = array<i32>} : memref<8x64xf32, #tpu.memory_space<vmem>>, vector<8x64xf32>,
    %330 = vector.extract_strided_slice %118 {offsets = [0, 0], sizes = [8, 32], strides = [1, 1]} : vector<8x64xf32> to vector<8x32xf32>
    %331 = vector.extract_strided_slice %328 {offsets = [0, 32], sizes = [8, 32], strides = [1, 1]} : vector<8x64xf32> to vector<8x32xf32>
    %332 = tpu.concatenate %330, %331 in 1 : vector<8x32xf32>, vector<8x32xf32> -> vector<8x64xf32>
    %cst_81 = arith.constant dense<0.000000e+00> : vector<8xf32>
    %333 = vector.multi_reduction <add>, %332, %cst_81 [1] : vector<8x64xf32> to vector<8xf32>
    %334 = vector.shape_cast %333 : vector<8xf32> to vector<8x1xf32>
    %cst_82 = arith.constant 6.400000e+01 : f32
    %335 = vector.broadcast %cst_82 : f32 to vector<8x1xf32>
    %336 = arith.divf %334, %335 : vector<8x1xf32>
    %337 = vector.broadcast %336 : vector<8x1xf32> to vector<8x64xf32>
    %338 = arith.subf %332, %337 : vector<8x64xf32>
    %339 = vector.broadcast %336 : vector<8x1xf32> to vector<8x64xf32>
    %340 = arith.subf %332, %339 : vector<8x64xf32>
    %341 = arith.mulf %338, %340 : vector<8x64xf32>
    %cst_83 = arith.constant dense<0.000000e+00> : vector<8xf32>
    %342 = vector.multi_reduction <add>, %341, %cst_83 [1] : vector<8x64xf32> to vector<8xf32>
    %343 = vector.shape_cast %342 : vector<8xf32> to vector<8x1xf32>
    %cst_84 = arith.constant 6.400000e+01 : f32
    %344 = vector.broadcast %cst_84 : f32 to vector<8x1xf32>
    %345 = arith.divf %343, %344 : vector<8x1xf32>
    %346 = vector.broadcast %336 : vector<8x1xf32> to vector<8x64xf32>
    %347 = arith.subf %332, %346 : vector<8x64xf32>
    %cst_85 = arith.constant 9.99999974E-6 : f32
    %348 = vector.broadcast %cst_85 : f32 to vector<8x1xf32>
    %349 = arith.addf %345, %348 : vector<8x1xf32>
    %350 = math.rsqrt %349 : vector<8x1xf32>
    %351 = vector.broadcast %350 : vector<8x1xf32> to vector<8x64xf32>
    %352 = arith.mulf %347, %351 : vector<8x64xf32>
    %353 = vector.extract_strided_slice %148 {offsets = [0, 0], sizes = [8, 32], strides = [1, 1]} : vector<8x64xf32> to vector<8x32xf32>
    %354 = vector.extract_strided_slice %298 {offsets = [0, 32], sizes = [8, 32], strides = [1, 1]} : vector<8x64xf32> to vector<8x32xf32>
    %355 = tpu.concatenate %353, %354 in 1 : vector<8x32xf32>, vector<8x32xf32> -> vector<8x64xf32>
    %cst_86 = arith.constant dense<0.000000e+00> : vector<8xf32>
    %356 = vector.multi_reduction <add>, %355, %cst_86 [1] : vector<8x64xf32> to vector<8xf32>
    %357 = vector.shape_cast %356 : vector<8xf32> to vector<8x1xf32>
    %cst_87 = arith.constant 6.400000e+01 : f32
    %358 = vector.broadcast %cst_87 : f32 to vector<8x1xf32>
    %359 = arith.divf %357, %358 : vector<8x1xf32>
    %360 = vector.broadcast %359 : vector<8x1xf32> to vector<8x64xf32>
    %361 = arith.subf %355, %360 : vector<8x64xf32>
    %362 = vector.broadcast %359 : vector<8x1xf32> to vector<8x64xf32>
    %363 = arith.subf %355, %362 : vector<8x64xf32>
    %364 = arith.mulf %361, %363 : vector<8x64xf32>
    %cst_88 = arith.constant dense<0.000000e+00> : vector<8xf32>
    %365 = vector.multi_reduction <add>, %364, %cst_88 [1] : vector<8x64xf32> to vector<8xf32>
    %366 = vector.shape_cast %365 : vector<8xf32> to vector<8x1xf32>
    %cst_89 = arith.constant 6.400000e+01 : f32
    %367 = vector.broadcast %cst_89 : f32 to vector<8x1xf32>
    %368 = arith.divf %366, %367 : vector<8x1xf32>
    %369 = vector.broadcast %359 : vector<8x1xf32> to vector<8x64xf32>
    %370 = arith.subf %355, %369 : vector<8x64xf32>
    %cst_90 = arith.constant 9.99999974E-6 : f32
    %371 = vector.broadcast %cst_90 : f32 to vector<8x1xf32>
    %372 = arith.addf %368, %371 : vector<8x1xf32>
    %373 = math.rsqrt %372 : vector<8x1xf32>
    %374 = vector.broadcast %373 : vector<8x1xf32> to vector<8x64xf32>
    %375 = arith.mulf %370, %374 : vector<8x64xf32>
    %376 = vector.extract_strided_slice %178 {offsets = [0, 0], sizes = [8, 32], strides = [1, 1]} : vector<8x64xf32> to vector<8x32xf32>
    %377 = vector.extract_strided_slice %268 {offsets = [0, 32], sizes = [8, 32], strides = [1, 1]} : vector<8x64xf32> to vector<8x32xf32>
    %378 = tpu.concatenate %376, %377 in 1 : vector<8x32xf32>, vector<8x32xf32> -> vector<8x64xf32>
    %cst_91 = arith.constant dense<0.000000e+00> : vector<8xf32>
    %379 = vector.multi_reduction <add>, %378, %cst_91 [1] : vector<8x64xf32> to vector<8xf32>
    %380 = vector.shape_cast %379 : vector<8xf32> to vector<8x1xf32>
    %cst_92 = arith.constant 6.400000e+01 : f32
    %381 = vector.broadcast %cst_92 : f32 to vector<8x1xf32>
    %382 = arith.divf %380, %381 : vector<8x1xf32>
    %383 = vector.broadcast %382 : vector<8x1xf32> to vector<8x64xf32>
    %384 = arith.subf %378, %383 : vector<8x64xf32>
    %385 = vector.broadcast %382 : vector<8x1xf32> to vector<8x64xf32>
    %386 = arith.subf %378, %385 : vector<8x64xf32>
    %387 = arith.mulf %384, %386 : vector<8x64xf32>
    %cst_93 = arith.constant dense<0.000000e+00> : vector<8xf32>
    %388 = vector.multi_reduction <add>, %387, %cst_93 [1] : vector<8x64xf32> to vector<8xf32>
    %389 = vector.shape_cast %388 : vector<8xf32> to vector<8x1xf32>
    %cst_94 = arith.constant 6.400000e+01 : f32
    %390 = vector.broadcast %cst_94 : f32 to vector<8x1xf32>
    %391 = arith.divf %389, %390 : vector<8x1xf32>
    %392 = vector.broadcast %382 : vector<8x1xf32> to vector<8x64xf32>
    %393 = arith.subf %378, %392 : vector<8x64xf32>
    %cst_95 = arith.constant 9.99999974E-6 : f32
    %394 = vector.broadcast %cst_95 : f32 to vector<8x1xf32>
    %395 = arith.addf %391, %394 : vector<8x1xf32>
    %396 = math.rsqrt %395 : vector<8x1xf32>
    %397 = vector.broadcast %396 : vector<8x1xf32> to vector<8x64xf32>
    %398 = arith.mulf %393, %397 : vector<8x64xf32>
    %399 = vector.extract_strided_slice %208 {offsets = [0, 0], sizes = [8, 32], strides = [1, 1]} : vector<8x64xf32> to vector<8x32xf32>
    %400 = vector.extract_strided_slice %238 {offsets = [0, 32], sizes = [8, 32], strides = [1, 1]} : vector<8x64xf32> to vector<8x32xf32>
    %401 = tpu.concatenate %399, %400 in 1 : vector<8x32xf32>, vector<8x32xf32> -> vector<8x64xf32>
    %cst_96 = arith.constant dense<0.000000e+00> : vector<8xf32>
    %402 = vector.multi_reduction <add>, %401, %cst_96 [1] : vector<8x64xf32> to vector<8xf32>
    %403 = vector.shape_cast %402 : vector<8xf32> to vector<8x1xf32>
    %cst_97 = arith.constant 6.400000e+01 : f32
    %404 = vector.broadcast %cst_97 : f32 to vector<8x1xf32>
    %405 = arith.divf %403, %404 : vector<8x1xf32>
    %406 = vector.broadcast %405 : vector<8x1xf32> to vector<8x64xf32>
    %407 = arith.subf %401, %406 : vector<8x64xf32>
    %408 = vector.broadcast %405 : vector<8x1xf32> to vector<8x64xf32>
    %409 = arith.subf %401, %408 : vector<8x64xf32>
    %410 = arith.mulf %407, %409 : vector<8x64xf32>
    %cst_98 = arith.constant dense<0.000000e+00> : vector<8xf32>
    %411 = vector.multi_reduction <add>, %410, %cst_98 [1] : vector<8x64xf32> to vector<8xf32>
    %412 = vector.shape_cast %411 : vector<8xf32> to vector<8x1xf32>
    %cst_99 = arith.constant 6.400000e+01 : f32
    %413 = vector.broadcast %cst_99 : f32 to vector<8x1xf32>
    %414 = arith.divf %412, %413 : vector<8x1xf32>
    %415 = vector.broadcast %405 : vector<8x1xf32> to vector<8x64xf32>
    %416 = arith.subf %401, %415 : vector<8x64xf32>
    %cst_100 = arith.constant 9.99999974E-6 : f32
    %417 = vector.broadcast %cst_100 : f32 to vector<8x1xf32>
    %418 = arith.addf %414, %417 : vector<8x1xf32>
    %419 = math.rsqrt %418 : vector<8x1xf32>
    %420 = vector.broadcast %419 : vector<8x1xf32> to vector<8x64xf32>
    %421 = arith.mulf %416, %420 : vector<8x64xf32>
    %422 = vector.extract_strided_slice %238 {offsets = [0, 0], sizes = [8, 32], strides = [1, 1]} : vector<8x64xf32> to vector<8x32xf32>
    %423 = vector.extract_strided_slice %208 {offsets = [0, 32], sizes = [8, 32], strides = [1, 1]} : vector<8x64xf32> to vector<8x32xf32>
    %424 = tpu.concatenate %422, %423 in 1 : vector<8x32xf32>, vector<8x32xf32> -> vector<8x64xf32>
    %cst_101 = arith.constant dense<0.000000e+00> : vector<8xf32>
    %425 = vector.multi_reduction <add>, %424, %cst_101 [1] : vector<8x64xf32> to vector<8xf32>
    %426 = vector.shape_cast %425 : vector<8xf32> to vector<8x1xf32>
    %cst_102 = arith.constant 6.400000e+01 : f32
    %427 = vector.broadcast %cst_102 : f32 to vector<8x1xf32>
    %428 = arith.divf %426, %427 : vector<8x1xf32>
    %429 = vector.broadcast %428 : vector<8x1xf32> to vector<8x64xf32>
    %430 = arith.subf %424, %429 : vector<8x64xf32>
    %431 = vector.broadcast %428 : vector<8x1xf32> to vector<8x64xf32>
    %432 = arith.subf %424, %431 : vector<8x64xf32>
    %433 = arith.mulf %430, %432 : vector<8x64xf32>
    %cst_103 = arith.constant dense<0.000000e+00> : vector<8xf32>
    %434 = vector.multi_reduction <add>, %433, %cst_103 [1] : vector<8x64xf32> to vector<8xf32>
    %435 = vector.shape_cast %434 : vector<8xf32> to vector<8x1xf32>
    %cst_104 = arith.constant 6.400000e+01 : f32
    %436 = vector.broadcast %cst_104 : f32 to vector<8x1xf32>
    %437 = arith.divf %435, %436 : vector<8x1xf32>
    %438 = vector.broadcast %428 : vector<8x1xf32> to vector<8x64xf32>
    %439 = arith.subf %424, %438 : vector<8x64xf32>
    %cst_105 = arith.constant 9.99999974E-6 : f32
    %440 = vector.broadcast %cst_105 : f32 to vector<8x1xf32>
    %441 = arith.addf %437, %440 : vector<8x1xf32>
    %442 = math.rsqrt %441 : vector<8x1xf32>
    %443 = vector.broadcast %442 : vector<8x1xf32> to vector<8x64xf32>
    %444 = arith.mulf %439, %443 : vector<8x64xf32>
    %445 = vector.extract_strided_slice %268 {offsets = [0, 0], sizes = [8, 32], strides = [1, 1]} : vector<8x64xf32> to vector<8x32xf32>
    %446 = vector.extract_strided_slice %178 {offsets = [0, 32], sizes = [8, 32], strides = [1, 1]} : vector<8x64xf32> to vector<8x32xf32>
    %447 = tpu.concatenate %445, %446 in 1 : vector<8x32xf32>, vector<8x32xf32> -> vector<8x64xf32>
    %cst_106 = arith.constant dense<0.000000e+00> : vector<8xf32>
    %448 = vector.multi_reduction <add>, %447, %cst_106 [1] : vector<8x64xf32> to vector<8xf32>
    %449 = vector.shape_cast %448 : vector<8xf32> to vector<8x1xf32>
    %cst_107 = arith.constant 6.400000e+01 : f32
    %450 = vector.broadcast %cst_107 : f32 to vector<8x1xf32>
    %451 = arith.divf %449, %450 : vector<8x1xf32>
    %452 = vector.broadcast %451 : vector<8x1xf32> to vector<8x64xf32>
    %453 = arith.subf %447, %452 : vector<8x64xf32>
    %454 = vector.broadcast %451 : vector<8x1xf32> to vector<8x64xf32>
    %455 = arith.subf %447, %454 : vector<8x64xf32>
    %456 = arith.mulf %453, %455 : vector<8x64xf32>
    %cst_108 = arith.constant dense<0.000000e+00> : vector<8xf32>
    %457 = vector.multi_reduction <add>, %456, %cst_108 [1] : vector<8x64xf32> to vector<8xf32>
    %458 = vector.shape_cast %457 : vector<8xf32> to vector<8x1xf32>
    %cst_109 = arith.constant 6.400000e+01 : f32
    %459 = vector.broadcast %cst_109 : f32 to vector<8x1xf32>
    %460 = arith.divf %458, %459 : vector<8x1xf32>
    %461 = vector.broadcast %451 : vector<8x1xf32> to vector<8x64xf32>
    %462 = arith.subf %447, %461 : vector<8x64xf32>
    %cst_110 = arith.constant 9.99999974E-6 : f32
    %463 = vector.broadcast %cst_110 : f32 to vector<8x1xf32>
    %464 = arith.addf %460, %463 : vector<8x1xf32>
    %465 = math.rsqrt %464 : vector<8x1xf32>
    %466 = vector.broadcast %465 : vector<8x1xf32> to vector<8x64xf32>
    %467 = arith.mulf %462, %466 : vector<8x64xf32>
    %468 = vector.extract_strided_slice %298 {offsets = [0, 0], sizes = [8, 32], strides = [1, 1]} : vector<8x64xf32> to vector<8x32xf32>
    %469 = vector.extract_strided_slice %148 {offsets = [0, 32], sizes = [8, 32], strides = [1, 1]} : vector<8x64xf32> to vector<8x32xf32>
    %470 = tpu.concatenate %468, %469 in 1 : vector<8x32xf32>, vector<8x32xf32> -> vector<8x64xf32>
    %cst_111 = arith.constant dense<0.000000e+00> : vector<8xf32>
    %471 = vector.multi_reduction <add>, %470, %cst_111 [1] : vector<8x64xf32> to vector<8xf32>
    %472 = vector.shape_cast %471 : vector<8xf32> to vector<8x1xf32>
    %cst_112 = arith.constant 6.400000e+01 : f32
    %473 = vector.broadcast %cst_112 : f32 to vector<8x1xf32>
    %474 = arith.divf %472, %473 : vector<8x1xf32>
    %475 = vector.broadcast %474 : vector<8x1xf32> to vector<8x64xf32>
    %476 = arith.subf %470, %475 : vector<8x64xf32>
    %477 = vector.broadcast %474 : vector<8x1xf32> to vector<8x64xf32>
    %478 = arith.subf %470, %477 : vector<8x64xf32>
    %479 = arith.mulf %476, %478 : vector<8x64xf32>
    %cst_113 = arith.constant dense<0.000000e+00> : vector<8xf32>
    %480 = vector.multi_reduction <add>, %479, %cst_113 [1] : vector<8x64xf32> to vector<8xf32>
    %481 = vector.shape_cast %480 : vector<8xf32> to vector<8x1xf32>
    %cst_114 = arith.constant 6.400000e+01 : f32
    %482 = vector.broadcast %cst_114 : f32 to vector<8x1xf32>
    %483 = arith.divf %481, %482 : vector<8x1xf32>
    %484 = vector.broadcast %474 : vector<8x1xf32> to vector<8x64xf32>
    %485 = arith.subf %470, %484 : vector<8x64xf32>
    %cst_115 = arith.constant 9.99999974E-6 : f32
    %486 = vector.broadcast %cst_115 : f32 to vector<8x1xf32>
    %487 = arith.addf %483, %486 : vector<8x1xf32>
    %488 = math.rsqrt %487 : vector<8x1xf32>
    %489 = vector.broadcast %488 : vector<8x1xf32> to vector<8x64xf32>
    %490 = arith.mulf %485, %489 : vector<8x64xf32>
    %491 = vector.extract_strided_slice %328 {offsets = [0, 0], sizes = [8, 32], strides = [1, 1]} : vector<8x64xf32> to vector<8x32xf32>
    %492 = vector.extract_strided_slice %118 {offsets = [0, 32], sizes = [8, 32], strides = [1, 1]} : vector<8x64xf32> to vector<8x32xf32>
    %493 = tpu.concatenate %491, %492 in 1 : vector<8x32xf32>, vector<8x32xf32> -> vector<8x64xf32>
    %cst_116 = arith.constant dense<0.000000e+00> : vector<8xf32>
    %494 = vector.multi_reduction <add>, %493, %cst_116 [1] : vector<8x64xf32> to vector<8xf32>
    %495 = vector.shape_cast %494 : vector<8xf32> to vector<8x1xf32>
    %cst_117 = arith.constant 6.400000e+01 : f32
    %496 = vector.broadcast %cst_117 : f32 to vector<8x1xf32>
    %497 = arith.divf %495, %496 : vector<8x1xf32>
    %498 = vector.broadcast %497 : vector<8x1xf32> to vector<8x64xf32>
    %499 = arith.subf %493, %498 : vector<8x64xf32>
    %500 = vector.broadcast %497 : vector<8x1xf32> to vector<8x64xf32>
    %501 = arith.subf %493, %500 : vector<8x64xf32>
    %502 = arith.mulf %499, %501 : vector<8x64xf32>
    %cst_118 = arith.constant dense<0.000000e+00> : vector<8xf32>
    %503 = vector.multi_reduction <add>, %502, %cst_118 [1] : vector<8x64xf32> to vector<8xf32>
    %504 = vector.shape_cast %503 : vector<8xf32> to vector<8x1xf32>
    %cst_119 = arith.constant 6.400000e+01 : f32
    %505 = vector.broadcast %cst_119 : f32 to vector<8x1xf32>
    %506 = arith.divf %504, %505 : vector<8x1xf32>
    %507 = vector.broadcast %497 : vector<8x1xf32> to vector<8x64xf32>
    %508 = arith.subf %493, %507 : vector<8x64xf32>
    %cst_120 = arith.constant 9.99999974E-6 : f32
    %509 = vector.broadcast %cst_120 : f32 to vector<8x1xf32>
    %510 = arith.addf %506, %509 : vector<8x1xf32>
    %511 = math.rsqrt %510 : vector<8x1xf32>
    %512 = vector.broadcast %511 : vector<8x1xf32> to vector<8x64xf32>
    %513 = arith.mulf %508, %512 : vector<8x64xf32>
    %514 = tpu.concatenate %352, %375, %398, %421, %444, %467, %490, %513 in 1 : vector<8x64xf32>, vector<8x64xf32>, vector<8x64xf32>, vector<8x64xf32>, vector<8x64xf32>, vector<8x64xf32>, vector<8x64xf32>, vector<8x64xf32> -> vector<8x512xf32>
    %c0_121 = arith.constant 0 : index
    %c0_122 = arith.constant 0 : index
    %515 = vector.load %arg8[%c0_121, %c0_122] : memref<8x512xf32, #tpu.memory_space<vmem>>, vector<8x512xf32>
    tpu.vector_store %arg8[%c0_121, %c0_122], %514 {strides = array<i32>} : memref<8x512xf32, #tpu.memory_space<vmem>>, vector<8x512xf32>,
    return
  }
  func.func @transform_0(%arg0: i32) -> (i32, i32, i32) {
    %c0_i32 = arith.constant 0 : i32
    %c0_i32_0 = arith.constant 0 : i32
    %c0_i32_1 = arith.constant 0 : i32
    return %arg0, %c0_i32, %c0_i32_0 : i32, i32, i32
  }
  func.func @transform_1(%arg0: i32) -> (i32, i32) {
    %c0_i32 = arith.constant 0 : i32
    %c0_i32_0 = arith.constant 0 : i32
    %c0_i32_1 = arith.constant 0 : i32
    return %c0_i32, %c0_i32_0 : i32, i32
  }
  func.func @transform_2(%arg0: i32) -> (i32, i32) {
    %c0_i32 = arith.constant 0 : i32
    %c0_i32_0 = arith.constant 0 : i32
    %c0_i32_1 = arith.constant 0 : i32
    return %c0_i32, %c0_i32_0 : i32, i32
  }
  func.func @transform_3(%arg0: i32) -> (i32, i32, i32) {
    %c0_i32 = arith.constant 0 : i32
    %c0_i32_0 = arith.constant 0 : i32
    %c0_i32_1 = arith.constant 0 : i32
    %c0_i32_2 = arith.constant 0 : i32
    return %c0_i32, %c0_i32_0, %c0_i32_1 : i32, i32, i32
  }
  func.func @transform_4(%arg0: i32) -> (i32, i32, i32) {
    %c0_i32 = arith.constant 0 : i32
    %c0_i32_0 = arith.constant 0 : i32
    %c0_i32_1 = arith.constant 0 : i32
    %c0_i32_2 = arith.constant 0 : i32
    return %c0_i32, %c0_i32_0, %c0_i32_1 : i32, i32, i32
  }
  func.func @transform_5(%arg0: i32) -> (i32, i32) {
    %c0_i32 = arith.constant 0 : i32
    %c0_i32_0 = arith.constant 0 : i32
    %c0_i32_1 = arith.constant 0 : i32
    return %c0_i32, %c0_i32_0 : i32, i32
  }
  func.func @transform_6(%arg0: i32) -> (i32, i32) {
    %c0_i32 = arith.constant 0 : i32
    %c0_i32_0 = arith.constant 0 : i32
    %c0_i32_1 = arith.constant 0 : i32
    return %c0_i32, %c0_i32_0 : i32, i32
  }
  func.func @transform_7(%arg0: i32) -> (i32, i32) {
    %c0_i32 = arith.constant 0 : i32
    %c0_i32_0 = arith.constant 0 : i32
    return %arg0, %c0_i32 : i32, i32
  }
  func.func @transform_8(%arg0: i32) -> (i32, i32) {
    %c0_i32 = arith.constant 0 : i32
    %c0_i32_0 = arith.constant 0 : i32
    return %arg0, %c0_i32 : i32, i32
  }
}

</mosaic_0001>

<bundles_post_ra>
// kernel: tpu_custom_call.1
= control target key start
LH: loop header
LB: loop body
LE: loop exit
PB: predicated region body
PF: predicated region fallthrough
CT: control target
= control target key end

     0   :  { %14 = vsyncpa [#allocation3], 0  ;;  %s6281_s0 = inlined_call_operand.hbm [shape: f32[16,8,64], index: 0, kind: input, shape index: {}]   ;;  %s6282_s1 = inlined_call_operand.vmem [shape: f32[64,32], index: 1, kind: input, shape index: {}]   ;;  %s6283_s2 = inlined_call_operand.vmem [shape: f32[1,32], index: 2, kind: input, shape index: {}]   ;;  %s6284_s3 = inlined_call_operand.hbm [shape: f32[3,64,64], index: 3, kind: input, shape index: {}]   ;;  %s6285_s4 = inlined_call_operand.hbm [shape: f32[3,64,64], index: 4, kind: input, shape index: {}]   ;;  %s6286_s5 = inlined_call_operand.vmem [shape: f32[3,64], index: 5, kind: input, shape index: {}]   ;;  %s6287_s6 = inlined_call_operand.vmem [shape: f32[1,64], index: 6, kind: input, shape index: {}]   ;;  %s6288_s7 = inlined_call_operand.hbm [shape: f32[16,512], index: 7, kind: output, shape index: {0}]   ;;  %s6289_s8 = inlined_call_operand.hbm [shape: f32[16,64], index: 8, kind: output, shape index: {1}]  }
   0x1   :  { %16 = vsyncpa [#allocation3 + $0x1], 0 }
   0x2   :  { %17 = vsyncpa [#allocation6], 0 }
   0x3   :  { %18 = vsyncpa [#allocation4], 0 }
   0x4   :  { %20 = vsyncpa [#allocation4 + $0x1], 0 }
   0x5   :  { %21 = vsyncpa [#allocation10], 0 }
   0x6   :  { %23 = vsyncpa [#allocation10 + $0x1], 0  ;;  %s5076_s27 = smov 0   ;;  %s5078_s28 = smov 0  }
   0x7   :  { %s5080_s29 = smov 0   ;;  %s5082_s30 = smov 0  }
   0x8 LB: > { %s5097_s9 = sadd.s32 4294967295, %s5017_s30   ;;  %s3360_s10 = sadd.s32 4294967294, %s5017_s30   ;;  %s5017_s30 = sphi %s5082_s30, %s6313_s30   ;;  %s5013_s29 = sphi %s5080_s29, %s6312_s29   ;;  %s5009_s28 = sphi %s5078_s28, %s6311_s28   ;;  %s5005_s27 = sphi %s5076_s27, %s6310_s27  }
   0x9   : > { %p49_p0 = scmp.ne.s32.totalorder %s5009_s28, %s5005_s27  ;;  %p6290_p1 = scmp.eq.s32.totalorder %s5097_s9, 0 }
   0xa   : > { %p205_p3 = scmp.eq.s32.totalorder %s3360_s10, 1  ;;  %p3361_p5 = scmp.ge.s32.totalorder %s5017_s30, 1 }
   0xb   : > { %p5106_p4 = por %p6290_p1, %p49_p0  ;;  %p238_p7 = scmp.lt.s32.totalorder %s5017_s30, 3 }
   0xc   : > { %p5111_p6 = por %p205_p3, %p49_p0  ;;  %s5019_s14 = smov [#allocation5]  }
   0xd   : > { %s6295_s11 = scalar_select %p5106_p4, 1, 0 }
   0xe   : > { %s6296_s12 = scalar_select %p5111_p6, 1, 0 }
   0xf   : > { %p5116_p8 = pnand %p3361_p5, %p238_p7  ;;  %s256_s15 = sshll.u32 %s5019_s14, 4  ;;  %s5120_s15 = int_to_ptr.vmem [resolvable:$true] %s256_s15 }
  0x10   : > { %s5020_s17 = smov [#allocation7]   ;;  %s4829_s21 = scalar_lea.hbm %s6284_s3, 3072 }
  0x11   : > { %p4668_p9 = pneg %p5116_p8  ;;  %s269_s18 = sshll.u32 %s5020_s17, 4  ;;  %s5131_s18 = int_to_ptr.vmem [resolvable:$true] %s269_s18 }
  0x12   : > { %p4830_p12 = scmp.ne.s32.totalorder %s6284_s3, %s4829_s21  ;;  %p4836_p5 = scmp.lt.u32.totalorder %s4829_s21, %s6284_s3 }
  0x13   : > { %p5127_p11 = pnand %p4668_p9, %p6290_p1 }
  0x15   : > { %p4831_p13 = pneg %p5127_p11 }
  0x17   : > { %p4832_p0 = pnand %p4831_p13, %p4830_p12 }
  0x19   : > { %p4833_p3 = pneg %p4832_p0 }
  0x1b   : > { %p4838_p7 = pnand %p4836_p5, %p4833_p3 }
  0x1d   : > { %4841 = shalt.err (!%p4838_p7)
}
  0x1e   : > { %s4842_s26 = scalar_lea.vmem %s5120_s15, 3072  ;;  %p4850_p2 = scmp.lt.s32.totalorder %s5120_s15, %s5120_s15 }
  0x1f   : > { %p4843_p9 = scmp.ne.s32.totalorder %s5120_s15, %s4842_s26  ;;  %p4851_p12 = scmp.lt.s32.totalorder %s4842_s26, %s4842_s26 }
  0x21   : > { %p4845_p10 = pnand %p4843_p9, %p4831_p13  ;;  %p4852_p0 = por %p4851_p12, %p4850_p2 }
  0x23   : > { %p4846_p1 = pneg %p4845_p10 }
  0x25   : > { %p4853_p6 = pnand %p4852_p0, %p4846_p1 }
  0x27   : > { %4856 = shalt.err (!%p4853_p6)
}
  0x28   : > { %s6291_s10 = smov 128   ;;  %s6292_s14 = smov 8  }
  0x29   : > { %4671 = dma.hbm_to_vmem [thread:$0]  (!%p5127_p11), %s6284_s3, 3072, %s5120_s15, [#allocation6], %s6291_s10, %s6291_s10, %s6292_s14  }
  0x2a   : > { %s4857_s22 = scalar_lea.hbm %s6285_s4, 3072 }
  0x2b   : > { %p4858_p1 = scmp.ne.s32.totalorder %s6285_s4, %s4857_s22  ;;  %p4864_p10 = scmp.lt.u32.totalorder %s4857_s22, %s6285_s4 }
  0x2d   : > { %p4860_p2 = pnand %p4858_p1, %p4831_p13 }
  0x2f   : > { %p4861_p6 = pneg %p4860_p2 }
  0x31   : > { %p4866_p3 = pnand %p4864_p10, %p4861_p6 }
  0x33   : > { %4869 = shalt.err (!%p4866_p3)
}
  0x34   : > { %s4870_s15 = scalar_lea.vmem %s5131_s18, 3072  ;;  %p4878_p12 = scmp.lt.s32.totalorder %s5131_s18, %s5131_s18 }
  0x35   : > { %p4871_p5 = scmp.ne.s32.totalorder %s5131_s18, %s4870_s15  ;;  %p4879_p0 = scmp.lt.s32.totalorder %s4870_s15, %s4870_s15 }
  0x37   : > { %p4873_p7 = pnand %p4871_p5, %p4831_p13  ;;  %p4880_p1 = por %p4879_p0, %p4878_p12 }
  0x39   : > { %p4874_p9 = pneg %p4873_p7 }
  0x3b   : > { %p4881_p2 = pnand %p4880_p1, %p4874_p9 }
  0x3d   : > { %4884 = shalt.err (!%p4881_p2)
}
  0x3e   : > { %4674 = dma.hbm_to_vmem [thread:$0]  (!%p5127_p11), %s6285_s4, 3072, %s5131_s18, [#allocation6], %s6291_s10, %s6291_s10, %s6292_s14  }
  0x3f   : > { %s5192_s16 = sadd.s32 1, %s5017_s30   ;;  %s36_s20 = sadd.s32 1, %s5013_s29 }
  0x40   : > { %s33_s21 = ssub.s32 %s5017_s30, %s5192_s16  ;;  %p43_p13 = scmp.ne.s32.totalorder %s5013_s29, %s5009_s28 }
  0x41   : > { %p34_p6 = scmp.eq.s32.totalorder %s33_s21, 0  ;;  %p44_p10 = scmp.eq.s32.totalorder %s5017_s30, 0 }
  0x42   : > { %p6299_p3 = scmp.eq.s32.totalorder %s5097_s9, 1  ;;  %p4688_p7 = scmp.lt.s32.totalorder %s5017_s30, 2 }
  0x43   : > { %s5208_s23 = scalar_select %p34_p6, %s5013_s29, %s36_s20  }
  0x44   : > { %p5202_p5 = por %p6299_p3, %p43_p13  ;;  %p45_p9 = por %p44_p10, %p43_p13 }
  0x45   : > { %s289_s24 = sand.u32 1, %s5013_s29   ;;  %s3452_s18 = sshll.u32 %s5017_s30, 10 }
  0x46   : > { %s6300_s22 = scalar_select %p5202_p5, 1, 0 }
  0x47   : > { %s3365_s25 = sshll.u32 %s289_s24, 6  ;;  %s5215_s17 = scalar_lea.hbm %s6281_s0, %s3452_s18 }
  0x48   : > { %s293_s19 = scalar_lea.vmem [#allocation2], %s3365_s25  ;;  %p5219_p11 = pnand %p4688_p7, %p45_p9 }
  0x49   : > { %s300_s21 = sshll.u32 %s293_s19, 4  ;;  %s5223_s10 = scalar_lea.sflag [#allocation3], %s289_s24  ;;  %s5217_s21 = int_to_ptr.vmem [resolvable:$true] %s300_s21 }
  0x4a   : > { %s4885_s14 = scalar_lea.hbm %s5215_s17, 1024  ;;  %p4887_p0 = pneg %p5219_p11 }
  0x4b   : > { %p4886_p12 = scmp.ne.s32.totalorder %s5215_s17, %s4885_s14  ;;  %s4890_s26 = scalar_lea.hbm %s6281_s0, 2048 }
  0x4c   : > { %p4891_p13 = scmp.lt.u32.totalorder %s5215_s17, %s6281_s0  ;;  %p4892_p6 = scmp.lt.u32.totalorder %s4890_s26, %s4885_s14 }
  0x4d   : > { %p4888_p1 = pnand %p4887_p0, %p4886_p12  ;;  %p4894_p3 = scmp.lt.u32.totalorder %s4885_s14, %s5215_s17 }
  0x4e   : > { %p4893_p10 = por %p4892_p6, %p4891_p13 }
  0x4f   : > { %p4889_p2 = pneg %p4888_p1 }
  0x50   : > { %p4895_p7 = por %p4894_p3, %p4893_p10 }
  0x52   : > { %p4896_p9 = pnand %p4895_p7, %p4889_p2 }
  0x54   : > { %4899 = shalt.err (!%p4896_p9)
}
  0x55   : > { %s4900_s24 = scalar_lea.vmem %s5217_s21, 1024  ;;  %s5023_s25 = smov [#allocation2]  }
  0x56   : > { %p4901_p12 = scmp.ne.s32.totalorder %s5217_s21, %s4900_s24  ;;  %s4905_s18 = sshll.u32 %s5023_s25, 4  ;;  %s4906_s18 = int_to_ptr.vmem [resolvable:$false] %s4905_s18 }
  0x57   : > { %s4907_s15 = scalar_lea.vmem %s4906_s18, 2048  ;;  %p4908_p4 = scmp.lt.s32.totalorder %s5217_s21, %s4906_s18 }
  0x58   : > { %p4903_p1 = pnand %p4901_p12, %p4887_p0  ;;  %p4909_p13 = scmp.lt.s32.totalorder %s4907_s15, %s4900_s24 }
  0x5a   : > { %p4904_p5 = pneg %p4903_p1  ;;  %p4910_p6 = por %p4909_p13, %p4908_p4 }
  0x5c   : > { %p4911_p10 = pnand %p4910_p6, %p4904_p5 }
  0x5e   : > { %4914 = shalt.err (!%p4911_p10)
}
  0x5f   : > { %s6302_s14 = smov 8   ;;  %s6303_s26 = smov 128  }
  0x60   : > { %4678 = dma.hbm_to_vmem [thread:$0]  (!%p5219_p11), %s5215_s17, 1024, %s5217_s21, %s5223_s10, %s6303_s26, %s6303_s26, %s6302_s14  }
  0x61   : > { %312 = sbr.rel (%p5116_p8) target bundleno = 3031 (0xbd7), region = 48  ;;  %s5257_s19 = sand.u32 (!%p5116_p8), 1, %s5009_s28  }
  0x62   : > { %s3369_s24 = sshll.u32 (!%p5116_p8), %s5257_s19, 6  ;;  %s315_s25 = scalar_lea.sflag (!%p5116_p8), [#allocation3], %s5257_s19 }
  0x63   : > { %s5261_s18 = scalar_lea.vmem (!%p5116_p8), [#allocation2], %s3369_s24  ;;  %p6304_p4 = scmp.ne.s32.totalorder (!%p5116_p8), %s6295_s11, 0 }
  0x68   : > { %4988 = dma.done.wait (%p6304_p4), %s315_s25, 1024  }
  0x69   : > { %4990 = vsyncadd (%p6304_p4), %s315_s25, 4294966272  ;;  %p6305_p5 = scmp.eq.s32.totalorder %s5097_s9, 0 }
  0x6b   : > { %4992 = dma.done.wait (%p6305_p5), [#allocation6], 6144   ;;  %p6306_p8 = pmov %p6305_p5 }
  0x6c   : > { %v373_v0 = vld [vmem:[%s6282_s1] sm:$0xff]  ;;  %v374_v1 = vld [vmem:[%s6282_s1 + $0x8] sm:$0xff]  ;;  %v375_v2 = vld [vmem:[%s6282_s1 + $0x10] sm:$0xff]  ;;  %vm388_vm0 = vcmask 523264   ;;  %vm535_vm1 = vcmask 1041409   ;;  %vm538_vm2 = vcmask 1042434  }
  0x6d   : > { %4994 = vsyncadd (%p6306_p8), [#allocation6], 4294961152  ;;  %v4302_v3 = vpack.c.bf16 %v374_v1, %v373_v0  ;;  %v376_v4 = vld [vmem:[%s6282_s1 + $0x18] sm:$0xff]  ;;  %v377_v6 = vld [vmem:[%s6282_s1 + $0x20] sm:$0xff]  ;;  %vm541_vm3 = vcmask 1043459   ;;  %vm547_vm4 = vcmask 1045509  }
  0x6e   : > { %v4306_v5 = vpack.c.bf16 %v376_v4, %v375_v2  ;;  %v378_v7 = vld [vmem:[%s6282_s1 + $0x28] sm:$0xff]  ;;  %v365_v8 = vld [vmem:[%s5261_s18] sm:$0xff]  ;;  %v379_v10 = vld [vmem:[%s6282_s1 + $0x30] sm:$0xff]  ;;  %vm550_vm5 = vcmask 1046534   ;;  %vm553_vm6 = vcmask 1047559   ;;  %vm544_vm7 = vcmask 1044484  }
  0x6f   : > { %4303 = vmatprep.subr.bf16.mxu0 %v4302_v3  ;;  %3750 = vmatprep.mubr.msk.f32.mxu0 %vm388_vm0, %v365_v8  ;;  %v4310_v9 = vpack.c.bf16 %v378_v7, %v377_v6  ;;  %v380_v11 = vld [vmem:[%s6282_s1 + $0x38] sm:$0xff]  ;;  %v366_v13 = vld [vmem:[%s5261_s18 + $0x8] sm:$0xff]  ;;  %v367_v14 = vld [vmem:[%s5261_s18 + $0x10] sm:$0xff]  ;;  %vm573_vm8 = vcmask 261120   ;;  %vm752_vm9 = vcmask 1046528   ;;  %vm758_vm10 = vcmask 1045504  }
  0x70   : > { %4305 = vmatpush3.bf16.msra.mxu0 %v4302_v3  ;;  %v4314_v12 = vpack.c.bf16 %v380_v11, %v379_v10  ;;  %v368_v15 = vld [vmem:[%s5261_s18 + $0x18] sm:$0xff]  ;;  %v369_v16 = vld [vmem:[%s5261_s18 + $0x20] sm:$0xff]  ;;  %v370_v17 = vld [vmem:[%s5261_s18 + $0x28] sm:$0xff]  ;;  %vm764_vm11 = vcmask 1044480   ;;  %vm770_vm12 = vcmask 1043456   ;;  %vm776_vm13 = vcmask 1042432  }
  0x71   : > { %4307 = vmatprep.subr.bf16.mxu0 %v4306_v5  ;;  %v371_v18 = vld [vmem:[%s5261_s18 + $0x30] sm:$0xff]  ;;  %v372_v19 = vld [vmem:[%s5261_s18 + $0x38] sm:$0xff]  ;;  %v793_v20 = vld [vmem:[#allocation5] sm:$0xff]  ;;  %s5024_s18 = smov 32   ;;  %vm782_vm14 = vcmask 1041408   ;;  %vm788_vm15 = vcmask 1040384  }
  0x72   : > { %v794_v21 = vld [vmem:[#allocation5 + $0x8] sm:$0xff]  ;;  %v928_v22 = vld [vmem:[#allocation5 + $0x40] sm:$0xff]  ;;  %v795_v31 = vld [vmem:[#allocation5 + $0x10] sm:$0xff]  ;;  %s3373_s13 = sshll.u32 %s5257_s19, 3  ;;  %s5028_s17 = smov 64  }
  0x73   : > { %v4318_v23 = vpack.c.bf16 %v794_v21, %v793_v20  ;;  %v929_v24 = vld [vmem:[#allocation5 + $0x48] sm:$0xff]  ;;  %v5314_v26 = vld [vmem:[%s6283_s2] ss:$0 sm:$0xff]  ;;  %v796_v32 = vld [vmem:[#allocation5 + $0x18] sm:$0xff]  ;;  %s6142_s10 = scalar_lea.vmem [#allocation9], %s3373_s13  ;;  %s3449_s21 = sshll.u32 %s5097_s9, 7 }
  0x74   : > { %4309 = vmatpush3.bf16.msra.mxu0 %v4306_v5  ;;  %v4334_v25 = vpack.c.bf16 %v929_v24, %v928_v22  ;;  %v930_v33 = vld [vmem:[#allocation5 + $0x50] sm:$0xff]  ;;  %v4322_v35 = vpack.c.bf16 %v796_v32, %v795_v31  ;;  %v931_v36 = vld [vmem:[#allocation5 + $0x58] sm:$0xff]  ;;  %s3239_s20 = sshll.u32 %s6142_s10, 4  ;;  %s3212_s14 = scalar_lea.sflag [#allocation10], %s5257_s19  ;;  %s3240_s20 = int_to_ptr.vmem [resolvable:$true] %s3239_s20 }
  0x75   : > { %4311 = vmatprep.subr.bf16.mxu0 %v4310_v9  ;;  %4319 = vmatprep.subr.bf16.mxu1 %v4318_v23  ;;  %v4338_v39 = vpack.c.bf16 %v931_v36, %v930_v33  ;;  %s4915_s26 = scalar_lea.vmem %s3240_s20, 128  ;;  %p6307_p0 = scmp.ne.s32.totalorder %s6300_s22, 0 }
  0x76   : > { %4321 = vmatpush3.bf16.msra.mxu1 %v4318_v23  ;;  %p4916_p11 = scmp.ne.s32.totalorder %s3240_s20, %s4915_s26  ;;  %s5029_s24 = smov [#allocation9]  }
  0x77   : > { %4323 = vmatprep.subr.bf16.mxu1 %v4322_v35  ;;  %s4919_s25 = sshll.u32 %s5029_s24, 4  ;;  %s4920_s25 = int_to_ptr.vmem [resolvable:$false] %s4919_s25 }
  0x78   : > { %4313 = vmatpush3.bf16.msra.mxu0 %v4310_v9  ;;  %p4917_p2 = pnand %p4916_p11, %p6307_p0  ;;  %s4921_s13 = scalar_lea.vmem %s4920_s25, 256 }
  0x79   : > { %4315 = vmatprep.subr.bf16.mxu0 %v4314_v12  ;;  %p4922_p7 = scmp.lt.s32.totalorder %s3240_s20, %s4920_s25  ;;  %p4923_p9 = scmp.lt.s32.totalorder %s4921_s13, %s4915_s26 }
  0x7a   : > { %4325 = vmatpush3.bf16.msra.mxu1 %v4322_v35  ;;  %p4918_p3 = pneg %p4917_p2 }
  0x7b   : > { %p4924_p12 = por %p4923_p9, %p4922_p7 }
  0x7c   : > { %4317 = vmatpush3.bf16.msra.mxu0 %v4314_v12 }
  0x7d   : > { %4335 = vmatprep.subr.bf16.mxu0 %v4334_v25  ;;  %p4925_p1 = pnand %p4924_p12, %p4918_p3 }
  0x7f   : > { %3751 = vmatmul.mubr.msk.f32.vlgmr.msra.gmra.mrb[0].mxu0 %vm388_vm0, %v366_v13 }
  0x80   : > { %3753 = vmatprep.mubr.msk.f32.mxu0 %vm388_vm0, %v367_v14  ;;  %4337 = vmatpush3.bf16.msra.mxu0 %v4334_v25 }
  0x81   : > { %4339 = vmatprep.subr.bf16.mxu0 %v4338_v39 }
  0x83   : > { %3754 = vmatmul.mubr.msk.f32.gmra.mrb[2].mxu0 %vm388_vm0, %v368_v15 }
  0x84   : > { %3756 = vmatprep.mubr.msk.f32.mxu0 %vm388_vm0, %v369_v16  ;;  %4341 = vmatpush3.bf16.msra.mxu0 %v4338_v39 }
  0x87   : > { %3757 = vmatmul.mubr.msk.f32.gmra.mrb[4].mxu0 %vm388_vm0, %v370_v17 }
  0x88   : > { %3759 = vmatprep.mubr.msk.f32.mxu0 %vm388_vm0, %v371_v18 }
  0x8b   : > { %3760 = vmatmul.mubr.msk.f32.gmra.mrb[6].mxu0 %vm388_vm0, %v372_v19 }
 0x152   : > { %v3752_v27 = vpop.f32.mrb[0].mxu0 }
 0x153   : > { %v485_v28 = vadd.f32 %v3752_v27, %v5314_v26  ;;  %v479_v29 = vpop.f32.mrb[1].mxu0 }
 0x154   : > { %v480_v30 = vadd.f32 %v5314_v26, %v479_v29 }
 0x155   : > { %v5318_v34 = vmax.f32 %v485_v28, 0.0 }
 0x156   : > { %v5320_v37 = vmax.f32 %v480_v30, 0.0  ;;  %v3755_v38 = vpop.f32.mrb[2].mxu0 }
 0x157   : > { %v5323_v40 = vrot.slane %v5318_v34, 7  ;;  %v495_v41 = vadd.f32 %v3755_v38, %v5314_v26  ;;  %v489_v42 = vpop.f32.mrb[3].mxu0  ;;  %v557_v43 = vrot.slane %v5318_v34, 6  ;;  %v613_v47 = vrot.slane %v5318_v34, 2 }
 0x158   : > { %v490_v44 = vadd.f32 %v5314_v26, %v489_v42  ;;  %v556_v45 = vrot.slane %v5320_v37, 7  ;;  %v641_v46 = vrot.slane %v5320_v37, 1  ;;  %v612_v49 = vrot.slane %v5320_v37, 3 }
 0x159   : > { %v5331_v48 = vmax.f32 %v495_v41, 0.0  ;;  %v583_v50 = vrot.slane %v5320_v37, 5  ;;  %v5338_v51 = vsel %vm547_vm4, %v5323_v40, %v5320_v37  ;;  %v584_v56 = vrot.slane %v5318_v34, 4 }
 0x15a   : > { %v5340_v52 = vmax.f32 %v490_v44, 0.0  ;;  %v3758_v53 = vpop.f32.mrb[4].mxu0  ;;  %v670_v54 = vsel %vm547_vm4, %v557_v43, %v556_v45  ;;  %v558_v55 = vsel %vm535_vm1, %v557_v43, %v556_v45  ;;  %v642_v61 = vsel %vm544_vm7, %v5318_v34, %v641_v46 }
 0x15b   : > { %v5346_v57 = vrot.slane %v5331_v48, 5  ;;  %v505_v58 = vadd.f32 %v3758_v53, %v5314_v26  ;;  %v499_v59 = vpop.f32.mrb[5].mxu0  ;;  %v561_v60 = vrot.slane %v5331_v48, 4  ;;  %v645_v1 = vrot.slane %v5331_v48, 6 }
 0x15c   : > { %v5355_v62 = vrot.slane %v5340_v52, 6  ;;  %v500_v63 = vadd.f32 %v5314_v26, %v499_v59  ;;  %v559_v0 = vrot.slane %v5340_v52, 5  ;;  %v586_v2 = vrot.slane %v5340_v52, 3 }
 0x15d   : > { %v5361_v3 = vmax.f32 %v505_v58, 0.0  ;;  %v643_v4 = vrot.slane %v5340_v52, 7  ;;  %v615_v5 = vrot.slane %v5340_v52, 1  ;;  %v614_v10 = vsel %vm541_vm3, %v613_v47, %v612_v49 }
 0x15e   : > { %v5365_v6 = vmax.f32 %v500_v63, 0.0  ;;  %v3761_v7 = vpop.f32.mrb[6].mxu0  ;;  %v671_v8 = vsel %vm550_vm5, %v559_v0, %v670_v54  ;;  %v560_v9 = vsel %vm538_vm2, %v559_v0, %v558_v55  ;;  %v585_v15 = vsel %vm538_vm2, %v584_v56, %v583_v50 }
 0x15f   : > { %v515_v11 = vadd.f32 %v3761_v7, %v5314_v26  ;;  %v509_v12 = vpop.f32.mrb[7].mxu0  ;;  %v672_v13 = vsel %vm553_vm6, %v561_v60, %v671_v8  ;;  %v562_v14 = vsel %vm541_vm3, %v561_v60, %v560_v9  ;;  %v644_v18 = vsel %vm547_vm4, %v643_v4, %v642_v61 }
 0x160   : > { %v5381_v16 = vrot.slane %v5365_v6, 4  ;;  %v510_v17 = vadd.f32 %v5314_v26, %v509_v12  ;;  %676 = vrot.lane.b32.xlu1 %v672_v13, %s5024_s18  ;;  %v647_v19 = vrot.slane %v5365_v6, 5  ;;  %v646_v21 = vsel %vm550_vm5, %v645_v1, %v644_v18 }
 0x161   : > { %v5389_v20 = vmax.f32 %v515_v11, 0.0  ;;  %v616_v22 = vsel %vm544_vm7, %v615_v5, %v614_v10  ;;  %v618_v23 = vrot.slane %v5365_v6, 7  ;;  %v620_v27 = vrot.slane %v5361_v3, 6 }
 0x162   : > { %v5398_v24 = vmax.f32 %v510_v17, 0.0  ;;  %v648_v25 = vsel %vm553_vm6, %v647_v19, %v646_v21  ;;  %v617_v26 = vsel %vm547_vm4, %v5331_v48, %v616_v22  ;;  %v587_v31 = vsel %vm541_vm3, %v586_v2, %v585_v15  ;;  %v797_v21 = vld [vmem:[#allocation5 + $0x20] sm:$0xff]  ;;  %v798_v22 = vld [vmem:[#allocation5 + $0x28] sm:$0xff] }
 0x163   : > { %v5407_v28 = vrot.slane %v5389_v20, 1  ;;  %v595_v29 = vrot.slane %v5389_v20, 6  ;;  %v619_v30 = vsel %vm550_vm5, %v618_v23, %v617_v26  ;;  %v588_v35 = vrot.slane %v5331_v48, 2  ;;  %v933_v26 = vld [vmem:[#allocation5 + $0x68] sm:$0xff] }
 0x164   : > { %v5413_v32 = vrot.slane %v5398_v24, 2  ;;  %654 = vrot.lane.b32.xlu1 %v648_v25, %s5024_s18  ;;  %v621_v33 = vsel %vm553_vm6, %v620_v27, %v619_v30  ;;  %v590_v36 = vrot.slane %v5365_v6, 1  ;;  %v593_v38 = vrot.slane %v5398_v24, 7  ;;  %v932_v25 = vld [vmem:[#allocation5 + $0x60] sm:$0xff]  ;;  %v800_v30 = vld [vmem:[#allocation5 + $0x38] sm:$0xff] }
 0x165   : > { %598 = vrot.lane.b32.xlu0 %v595_v29, %s5024_s18  ;;  %v563_v39 = vrot.slane %v5365_v6, 3  ;;  %v565_v41 = vrot.slane %v5361_v3, 2  ;;  %v567_v42 = vrot.slane %v5398_v24, 1  ;;  %v589_v43 = vsel %vm544_vm7, %v588_v35, %v587_v31  ;;  %v799_v6 = vld [vmem:[#allocation5 + $0x30] sm:$0xff] }
 0x166   : > { %v622_v44 = vrot.slane %v5398_v24, 5  ;;  %v623_v45 = vrot.slane %v5389_v20, 4  ;;  %v692_v53 = vsel %vm550_vm5, %v584_v56, %v583_v50  ;;  %v591_v54 = vsel %vm547_vm4, %v590_v36, %v589_v43 }
 0x167   : > { %v564_v55 = vsel %vm544_vm7, %v563_v39, %v562_v14  ;;  %v693_v58 = vsel %vm553_vm6, %v586_v2, %v692_v53  ;;  %v649_v59 = vrot.slane %v5361_v3, 4  ;;  %v592_v60 = vsel %vm550_vm5, %v5361_v3, %v591_v54 }
 0x168   : > { %625 = vrot.lane.b32.xlu1 %v621_v33, %s5024_s18  ;;  %v566_v61 = vsel %vm547_vm4, %v565_v41, %v564_v55  ;;  %v624_v63 = vsel %vm535_vm1, %v623_v45, %v622_v44  ;;  %v650_v0 = vrot.slane %v5398_v24, 3  ;;  %v594_v50 = vsel %vm553_vm6, %v593_v38, %v592_v60 }
 0x169   : > { %v568_v56 = vsel %vm550_vm5, %v567_v42, %v566_v61  ;;  %v652_v7 = vrot.slane %v5389_v20, 2  ;;  %v714_v2 = vsel %vm553_vm6, %v613_v47, %v612_v49  ;;  %596 = vrot.lane.b32.xlu0 %v594_v50, %s5024_s18  ;;  %v673_v10 = vsel %vm535_vm1, %v565_v41, %v563_v39 }
 0x16a   : > { %v569_v8 = vsel %vm553_vm6, %v5389_v20, %v568_v56  ;;  %v651_v9 = vsel %vm535_vm1, %v650_v0, %v649_v59  ;;  %v694_v11 = vsel %vm535_vm1, %v590_v36, %v588_v35  ;;  %v674_v13 = vsel %vm538_vm2, %v567_v42, %v673_v10  ;;  %v934_v36 = vld [vmem:[#allocation5 + $0x70] sm:$0xff] }
 0x16b   : > { %v653_v12 = vsel %vm538_vm2, %v652_v7, %v651_v9  ;;  %v695_v14 = vsel %vm538_vm2, %v5361_v3, %v694_v11  ;;  %v715_v47 = vsel %vm535_vm1, %v5331_v48, %v615_v5  ;;  %v675_v49 = vsel %vm541_vm3, %v5389_v20, %v674_v13 }
 0x16c   : > { %570 = vrot.lane.b32.xlu1 %v569_v8, %s5024_s18  ;;  %v696_v15 = vsel %vm541_vm3, %v593_v38, %v695_v14  ;;  %v716_v17 = vsel %vm538_vm2, %v618_v23, %v715_v47  ;;  %v736_v18 = vsel %vm535_vm1, %v643_v4, %v5318_v34  ;;  %v663_v23 = vsel %vm550_vm5, %v5355_v62, %v5338_v51  ;;  %v935_v38 = vld [vmem:[#allocation5 + $0x78] sm:$0xff] }
 0x16d   : > { %v5472_v24 = vsel %vm544_vm7, %v595_v29, %v696_v15  ;;  %v717_v5 = vsel %vm541_vm3, %v620_v27, %v716_v17  ;;  %v737_v20 = vsel %vm538_vm2, %v645_v1, %v736_v18  ;;  %627 = vrot.lane.b32.xlu0 %v624_v63, %s5024_s18  ;;  %v5488_v4 = vsel %vm553_vm6, %v5346_v57, %v663_v23 }
 0x16e   : > { %v718_v34 = vsel %vm544_vm7, %v622_v44, %v717_v5  ;;  %v738_v52 = vsel %vm541_vm3, %v647_v19, %v737_v20  ;;  %v633_v48 = vsel %vm544_vm7, %v5323_v40, %v5320_v37  ;;  %v4326_v29 = vpack.c.bf16 %v798_v22, %v797_v21 }
 0x16f   : > { %v5494_v51 = vsel %vm547_vm4, %v623_v45, %v718_v34  ;;  %v739_v1 = vsel %vm544_vm7, %v649_v59, %v738_v52  ;;  %v634_v27 = vsel %vm547_vm4, %v5355_v62, %v633_v48  ;;  %v4342_v33 = vpack.c.bf16 %v933_v26, %v932_v25 }
 0x170   : > { %698 = vrot.lane.b32.xlu1 %v693_v58, %s5024_s18  ;;  %v740_v19 = vsel %vm547_vm4, %v650_v0, %v739_v1  ;;  %v635_v31 = vsel %vm550_vm5, %v5346_v57, %v634_v27  ;;  %v604_v35 = vsel %vm541_vm3, %v5323_v40, %v5320_v37  ;;  %4327 = vmatprep.subr.bf16.mxu1 %v4326_v29  ;;  %v546_v44 = vrot.slane %v5361_v3, 3 }
 0x171   : > { %v5507_v39 = vsel %vm550_vm5, %v652_v7, %v740_v19  ;;  %v5511_v41 = vsel %vm553_vm6, %v5381_v16, %v635_v31  ;;  %v605_v42 = vsel %vm544_vm7, %v5355_v62, %v604_v35  ;;  %v575_v43 = vsel %vm538_vm2, %v5323_v40, %v5320_v37  ;;  %656 = vrot.lane.b32.xlu0 %v653_v12, %s5024_s18  ;;  %v1046_v7 = vld [vmem:[#allocation5 + $0x80] sm:$0xff] }
 0x172   : > { %4343 = vmatprep.subr.bf16.mxu0 %v4342_v33  ;;  %v606_v45 = vsel %vm547_vm4, %v5346_v57, %v605_v42  ;;  %v576_v53 = vsel %vm541_vm3, %v5355_v62, %v575_v43  ;;  %v4330_v54 = vpack.c.bf16 %v800_v30, %v799_v6  ;;  %4329 = vmatpush3.bf16.msra.mxu1 %v4326_v29  ;;  %v5025_v25 = vmov 0.0|0.0   ;;  %v1163_v31 = vld [vmem:[#allocation7] sm:$0xff] }
 0x173   : > { %4345 = vmatpush3.bf16.msra.mxu0 %v4342_v33  ;;  %v607_v55 = vsel %vm550_vm5, %v5381_v16, %v606_v45  ;;  %v577_v58 = vsel %vm544_vm7, %v5346_v57, %v576_v53  ;;  %v4346_v59 = vpack.c.bf16 %v935_v38, %v934_v36  ;;  %v5537_v61 = vsel %vm535_vm1, %v5407_v28, %v5413_v32  ;;  %v1164_v33 = vld [vmem:[#allocation7 + $0x8] sm:$0xff]  ;;  %v1048_v36 = vld [vmem:[#allocation5 + $0x90] sm:$0xff] }
 0x174   : > { %720 = vrot.lane.b32.xlu1 %v714_v2, %s5024_s18  ;;  %v5530_v3 = vsel %vm553_vm6, %v546_v44, %v607_v55  ;;  %v578_v60 = vsel %vm547_vm4, %v5381_v16, %v577_v58  ;;  %4331 = vmatprep.subr.bf16.mxu1 %v4330_v54  ;;  %v536_v0 = vsel %vm535_vm1, %v5323_v40, %v5320_v37  ;;  %v1047_v2 = vld [vmem:[#allocation5 + $0x88] sm:$0xff]  ;;  %v1166_v55 = vld [vmem:[#allocation7 + $0x18] sm:$0xff] }
 0x175   : > { %v579_v63 = vsel %vm550_vm5, %v546_v44, %v578_v60  ;;  %4347 = vmatprep.subr.bf16.mxu0 %v4346_v59  ;;  %v684_v50 = vsel %vm550_vm5, %v5323_v40, %v5320_v37  ;;  %v637_v56 = vsel %vm535_vm1, %v5413_v32, %v546_v44  ;;  %678 = vrot.lane.b32.xlu0 %v675_v49, %s5024_s18  ;;  %v1050_v60 = vld [vmem:[#allocation5 + $0xa0] sm:$0xff] }
 0x176   : > { %v580_v8 = vsel %vm553_vm6, %v5413_v32, %v579_v63  ;;  %v539_v9 = vsel %vm538_vm2, %v5355_v62, %v536_v0  ;;  %v5555_v10 = vsel %vm553_vm6, %v5355_v62, %v684_v50  ;;  %v5559_v11 = vsel %vm538_vm2, %v5407_v28, %v637_v56  ;;  %4333 = vmatpush3.bf16.msra.mxu1 %v4330_v54  ;;  %v1165_v54 = vld [vmem:[#allocation7 + $0x10] sm:$0xff]  ;;  %v1051_v63 = vld [vmem:[#allocation5 + $0xa8] sm:$0xff] }
 0x177   : > { %4349 = vmatpush3.bf16.msra.mxu0 %v4346_v59  ;;  %v542_v12 = vsel %vm541_vm3, %v5346_v57, %v539_v9  ;;  %v5566_v13 = vsel %vm553_vm6, %v5323_v40, %v5320_v37  ;;  %v665_v14 = vsel %vm535_vm1, %v546_v44, %v5381_v16  ;;  %v4350_v15 = vpack.c.bf16 %v1047_v2, %v1046_v7  ;;  %v1167_v2 = vld [vmem:[#allocation7 + $0x20] sm:$0xff] }
 0x178   : > { %742 = vrot.lane.b32.xlu1 %v641_v46, %s5024_s18  ;;  %v545_v47 = vsel %vm544_vm7, %v5381_v16, %v542_v12  ;;  %v666_v49 = vsel %vm538_vm2, %v5413_v32, %v665_v14  ;;  %v686_v17 = vsel %vm535_vm1, %v5381_v16, %v5346_v57  ;;  %4366 = vmatprep.subr.bf16.mxu0 %v5025_v25 }
 0x179   : > { %v548_v18 = vsel %vm547_vm4, %v546_v44, %v545_v47  ;;  %v5583_v21 = vsel %vm541_vm3, %v5407_v28, %v666_v49  ;;  %v687_v22 = vsel %vm538_vm2, %v546_v44, %v686_v17  ;;  %700 = vrot.lane.b32.xlu0 %v5472_v24, %s5024_s18  ;;  %4351 = vmatprep.subr.bf16.mxu1 %v4350_v15  ;;  %v1052_v47 = vld [vmem:[#allocation5 + $0xb0] sm:$0xff]  ;;  %v1053_v49 = vld [vmem:[#allocation5 + $0xb8] sm:$0xff] }
 0x17a   : > { %v551_v46 = vsel %vm550_vm5, %v5413_v32, %v548_v18  ;;  %v688_v5 = vsel %vm541_vm3, %v5413_v32, %v687_v22  ;;  %v707_v24 = vsel %vm535_vm1, %v5346_v57, %v5355_v62  ;;  %v728_v34 = vsel %vm535_vm1, %v5355_v62, %v5323_v40 }
 0x17b   : > { %v554_v20 = vsel %vm553_vm6, %v5407_v28, %v551_v46  ;;  %v5596_v23 = vsel %vm544_vm7, %v5407_v28, %v688_v5  ;;  %v708_v26 = vsel %vm538_vm2, %v5381_v16, %v707_v24  ;;  %v729_v48 = vsel %vm538_vm2, %v5346_v57, %v728_v34  ;;  %v1169_v46 = vld [vmem:[#allocation7 + $0x30] sm:$0xff]  ;;  %v1170_v5 = vld [vmem:[#allocation7 + $0x38] sm:$0xff] }
 0x17c   : > { %v709_v52 = vsel %vm541_vm3, %v546_v44, %v708_v26  ;;  %v730_v27 = vsel %vm541_vm3, %v5381_v16, %v729_v48  ;;  %v5652_v56 = vpack.c.bf16 %v1166_v55, %v1165_v54  ;;  %v5680_v48 = vpack.c.bf16 %v1170_v5, %v1169_v46  ;;  %v1175_v54 = vld [vmem:[#allocation7 + $0x58] sm:$0xff] }
 0x17d   : > { %722 = vrot.lane.b32.xlu0 %v5494_v51, %s5024_s18  ;;  %v710_v1 = vsel %vm544_vm7, %v5413_v32, %v709_v52  ;;  %v731_v40 = vsel %vm544_vm7, %v546_v44, %v730_v27  ;;  %vm5026_vm1 = vmmov 0  }
 0x17e   : > { %v5618_v29 = vsel %vm547_vm4, %v5407_v28, %v710_v1  ;;  %v732_v62 = vsel %vm547_vm4, %v5413_v32, %v731_v40  ;;  %v1049_v32 = vld [vmem:[#allocation5 + $0x98] sm:$0xff] }
 0x17f   : > { %v5625_v57 = vsel %vm550_vm5, %v5407_v28, %v732_v62 }
 0x181   : > { %744 = vrot.lane.b32.xlu0 %v5507_v39, %s5024_s18  ;;  %v5632_v39 = vpack.c.bf16 %v1164_v33, %v1163_v31  ;;  %s6202_s18 = scalar_lea.hbm %s6289_s8, %s3449_s21 }
 0x1d2   : > { %v677_v51 = vpop.permute.xlu1 %676 }
 0x1d3   : > { %v682_v22 = vsel %vm573_vm8, %v5488_v4, %v677_v51 }
 0x1d4   : > { %v771_v4 = vrot.slane %v682_v22, 4  ;;  %v792_v22 = vld [vmem:[%s6286_s5] sm:$0x7] }
 0x1d6   : > { %v655_v6 = vpop.permute.xlu1 %654 }
 0x1d7   : > { %v599_v30 = vpop.permute.xlu0 %598  ;;  %v660_v7 = vsel %vm573_vm8, %v5511_v41, %v655_v6 }
 0x1d8   : > { %v603_v19 = vsel %vm573_vm8, %v5407_v28, %v599_v30  ;;  %v4354_v28 = vpack.c.bf16 %v1049_v32, %v1048_v36  ;;  %v765_v41 = vrot.slane %v660_v7, 3 }
 0x1d9   : > { %v754_v42 = vrot.slane %v603_v19, 1 }
 0x1da   : > { %v626_v16 = vpop.permute.xlu1 %625 }
 0x1db   : > { %v597_v35 = vpop.permute.xlu0 %596  ;;  %v631_v45 = vsel %vm573_vm8, %v5530_v3, %v626_v16 }
 0x1dc   : > { %v602_v38 = vsel %vm573_vm8, %v580_v8, %v597_v35  ;;  %v759_v0 = vrot.slane %v631_v45, 2  ;;  %v1168_v8 = vld [vmem:[#allocation7 + $0x28] sm:$0xff] }
 0x1dd   : > { %v753_v43 = vrot.slane %v602_v38, 1  ;;  %v5666_v18 = vpack.c.bf16 %v1168_v8, %v1167_v2  ;;  %v1172_v38 = vld [vmem:[#allocation7 + $0x40] sm:$0xff]  ;;  %v1182_v45 = vld [vmem:[#allocation7 + $0x88] sm:$0xff]  ;;  %v1179_v2 = vld [vmem:[#allocation7 + $0x78] sm:$0xff] }
 0x1de   : > { %v571_v44 = vpop.permute.xlu1 %570 }
 0x1df   : > { %v5637_v53 = vsel %vm573_vm8, %v554_v20, %v571_v44  ;;  %v628_v58 = vpop.permute.xlu0 %627  ;;  %v5643_v59 = vsel %vm752_vm9, %v753_v43, %v754_v42  ;;  %v1173_v42 = vld [vmem:[#allocation7 + $0x48] sm:$0xff]  ;;  %v1181_v44 = vld [vmem:[#allocation7 + $0x80] sm:$0xff] }
 0x1e0   : > { %3778 = vmatprep.mubr.msk.f32.mxu1 %vm388_vm0, %v5637_v53  ;;  %3806 = vmatprep.mubr.msk.f32.mxu0 %vm388_vm0, %v5637_v53  ;;  %v632_v3 = vsel %vm573_vm8, %v5537_v61, %v628_v58  ;;  %v4358_v61 = vpack.c.bf16 %v1051_v63, %v1050_v60  ;;  %v5716_v55 = vpack.c.bf16 %v1182_v45, %v1181_v44  ;;  %v1183_v58 = vld [vmem:[#allocation7 + $0x90] sm:$0xff]  ;;  %v1184_v60 = vld [vmem:[#allocation7 + $0x98] sm:$0xff]  ;;  %v1176_v63 = vld [vmem:[#allocation7 + $0x60] sm:$0xff] }
 0x1e1   : > { %3779 = vmatmul.mubr.msk.f32.vlgmr.msra.gmra.mrb[0].mxu1 %vm388_vm0, %v5643_v59  ;;  %3807 = vmatmul.mubr.msk.f32.vlgmr.msra.gmra.mrb[8].mxu0 %vm388_vm0, %v5643_v59  ;;  %v760_v50 = vrot.slane %v632_v3, 2  ;;  %v1177_v3 = vld [vmem:[#allocation7 + $0x68] sm:$0xff] }
 0x1e2   : > { %4353 = vmatpush3.bf16.msra.mxu1 %v4350_v15  ;;  %4368 = vmatpush3.bf16.msra.mxu0 %v5632_v39  ;;  %v699_v9 = vpop.permute.xlu1 %698  ;;  %v5738_v7 = vpack.c.bf16 %v1177_v3, %v1176_v63 }
 0x1e3   : > { %4355 = vmatprep.subr.bf16.mxu1 %v4354_v28  ;;  %4369 = vmatprep.subr.bf16.mxu0 %v5025_v25  ;;  %v657_v12 = vpop.permute.xlu0 %656  ;;  %v5657_v14 = vsel %vm758_vm10, %v759_v0, %v760_v50  ;;  %v704_v1 = vsel %vm573_vm8, %v5555_v10, %v699_v9  ;;  %v5728_v0 = vpack.c.bf16 %v1184_v60, %v1183_v58  ;;  %v1186_v50 = vld [vmem:[#allocation7 + $0xa8] sm:$0xff]  ;;  %v1187_v9 = vld [vmem:[#allocation7 + $0xb0] sm:$0xff] }
 0x1e4   : > { %v661_v15 = vsel %vm573_vm8, %v5559_v11, %v657_v12  ;;  %3781 = vmatprep.mubr.msk.f32.mxu1 %vm388_vm0, %v5657_v14  ;;  %3809 = vmatprep.mubr.msk.f32.mxu0 %vm388_vm0, %v5657_v14  ;;  %v4362_v11 = vpack.c.bf16 %v1053_v49, %v1052_v47  ;;  %v777_v62 = vrot.slane %v704_v1, 5  ;;  %v1188_v12 = vld [vmem:[#allocation7 + $0xb8] sm:$0xff]  ;;  %v801_v49 = vlaneseq }
 0x1e5   : > { %v766_v17 = vrot.slane %v661_v15, 3  ;;  %v5752_v47 = vpack.c.bf16 %v1188_v12, %v1187_v9 }
 0x1e6   : > { %4357 = vmatpush3.bf16.msra.mxu1 %v4354_v28  ;;  %4371 = vmatpush3.bf16.msra.mxu0 %v5652_v56  ;;  %v721_v34 = vpop.permute.xlu1 %720  ;;  %v1174_v28 = vld [vmem:[#allocation7 + $0x50] sm:$0xff]  ;;  %v802_v15 = vshrl.u32 %v801_v49, 7 }
 0x1e7   : > { %4359 = vmatprep.subr.bf16.mxu1 %v4358_v61  ;;  %4372 = vmatprep.subr.bf16.mxu0 %v5025_v25  ;;  %v679_v20 = vpop.permute.xlu0 %678  ;;  %v5671_v24 = vsel %vm764_vm11, %v765_v41, %v766_v17  ;;  %v726_v10 = vsel %vm573_vm8, %v5566_v13, %v721_v34 }
 0x1e8   : > { %v683_v26 = vsel %vm573_vm8, %v5583_v21, %v679_v20  ;;  %3782 = vmatmul.mubr.msk.f32.gmra.mrb[2].mxu1 %vm388_vm0, %v5671_v24  ;;  %3810 = vmatmul.mubr.msk.f32.gmra.mrb[10].mxu0 %vm388_vm0, %v5671_v24  ;;  %v783_v19 = vrot.slane %v726_v10, 6  ;;  %v803_v41 = vsub.s32 0, %v802_v15  ;;  %v938_v17 = vsub.s32 1, %v802_v15 }
 0x1e9   : > { %v772_v52 = vrot.slane %v683_v26, 4 }
 0x1ea   : > { %4361 = vmatpush3.bf16.msra.mxu1 %v4358_v61  ;;  %4374 = vmatpush3.bf16.msra.mxu0 %v5666_v18  ;;  %v1178_v61 = vld [vmem:[#allocation7 + $0x70] sm:$0xff]  ;;  %v939_v46 = vrot.slane %v792_v22, %v938_v17 }
 0x1eb   : > { %4363 = vmatprep.subr.bf16.mxu1 %v4362_v11  ;;  %4375 = vmatprep.subr.bf16.mxu0 %v5025_v25  ;;  %v701_v21 = vpop.permute.xlu0 %700  ;;  %v5685_v27 = vsel %vm770_vm12, %v771_v4, %v772_v52 }
 0x1ec   : > { %v705_v40 = vsel %vm573_vm8, %v5596_v23, %v701_v21  ;;  %3784 = vmatprep.mubr.msk.f32.mxu1 %vm388_vm0, %v5685_v27  ;;  %3812 = vmatprep.mubr.msk.f32.mxu0 %vm388_vm0, %v5685_v27  ;;  %v743_v23 = vpop.permute.xlu1 %742 }
 0x1ed   : > { %v778_v51 = vrot.slane %v705_v40, 5  ;;  %v748_v13 = vsel %vm573_vm8, %v5320_v37, %v743_v23  ;;  %v5027_v37 = vmov 0.0  }
 0x1ee   : > { %4365 = vmatpush3.bf16.msra.mxu1 %v4362_v11  ;;  %4377 = vmatpush3.bf16.msra.mxu0 %v5680_v48  ;;  %v804_v11 = vrot.slane %v792_v22, %v803_v41 }
 0x1ef   : > { %4378 = vmatprep.subr.bf16.mxu1 %v5025_v25  ;;  %4390 = vmatprep.subr.bf16.mxu0 %v5025_v25  ;;  %v723_v6 = vpop.permute.xlu0 %722  ;;  %v779_v30 = vsel %vm776_vm13, %v777_v62, %v778_v51 }
 0x1f0   : > { %v727_v16 = vsel %vm573_vm8, %v5618_v29, %v723_v6  ;;  %3785 = vmatmul.mubr.msk.f32.gmra.mrb[4].mxu1 %vm388_vm0, %v779_v30  ;;  %3813 = vmatmul.mubr.msk.f32.gmra.mrb[12].mxu0 %vm388_vm0, %v779_v30  ;;  %v789_v29 = vrot.slane %v748_v13, 7 }
 0x1f1   : > { %v784_v31 = vrot.slane %v727_v16, 6 }
 0x1f3   : > { %v745_v33 = vpop.permute.xlu0 %744  ;;  %v785_v35 = vsel %vm782_vm14, %v783_v19, %v784_v31 }
 0x1f4   : > { %v749_v36 = vsel %vm573_vm8, %v5625_v57, %v745_v33  ;;  %3787 = vmatprep.mubr.msk.f32.mxu1 %vm388_vm0, %v785_v35  ;;  %3815 = vmatprep.mubr.msk.f32.mxu0 %vm388_vm0, %v785_v35  ;;  %v5714_v57 = vpack.c.bf16 %v1173_v42, %v1172_v38 }
 0x1f5   : > { %v790_v32 = vrot.slane %v749_v36, 7 }
 0x1f7   : > { %v791_v43 = vsel %vm788_vm15, %v789_v29, %v790_v32 }
 0x1f8   : > { %3788 = vmatmul.mubr.msk.f32.gmra.mrb[6].mxu1 %vm388_vm0, %v791_v43  ;;  %3816 = vmatmul.mubr.msk.f32.gmra.mrb[14].mxu0 %vm388_vm0, %v791_v43 }
 0x1f9   : > { %3834 = vmatprep.mubr.msk.f32.mxu1 %vm388_vm0, %v5637_v53  ;;  %3862 = vmatprep.mubr.msk.f32.mxu0 %vm5026_vm1, %v5027_v37  ;;  %v5724_v53 = vpack.c.bf16 %v1175_v54, %v1174_v28 }
 0x1fc   : > { %3835 = vmatmul.mubr.msk.f32.vlgmr.msra.gmra.mrb[8].mxu1 %vm388_vm0, %v5643_v59  ;;  %3863 = vmatmul.mubr.f32.vlgmr.msra.gmra.mrb[16].mxu0 %v5027_v37  ;;  %v1185_v59 = vld [vmem:[#allocation7 + $0xa0] sm:$0xff] }
 0x1fd   : > { %4380 = vmatpush3.bf16.msra.mxu1 %v5714_v57  ;;  %3837 = vmatprep.mubr.msk.f32.mxu1 %vm388_vm0, %v5657_v14  ;;  %v5742_v8 = vpack.c.bf16 %v1186_v50, %v1185_v59  ;;  %v5748_v14 = vpack.c.bf16 %v1179_v2, %v1178_v61 }
 0x1fe   : > { %4381 = vmatprep.subr.bf16.mxu1 %v5025_v25  ;;  %4392 = vmatpush3.bf16.msra.mxu0 %v5716_v55 }
 0x1ff   : > { %4393 = vmatprep.subr.bf16.mxu0 %v5025_v25  ;;  %3900 = vmatprep.mubr.msk.f32.mxu0 %vm5026_vm1, %v5027_v37 }
 0x200   : > { %3838 = vmatmul.mubr.msk.f32.gmra.mrb[10].mxu1 %vm388_vm0, %v5671_v24 }
 0x201   : > { %4383 = vmatpush3.bf16.msra.mxu1 %v5724_v53  ;;  %3840 = vmatprep.mubr.msk.f32.mxu1 %vm388_vm0, %v5685_v27 }
 0x202   : > { %4384 = vmatprep.subr.bf16.mxu1 %v5025_v25  ;;  %4395 = vmatpush3.bf16.msra.mxu0 %v5728_v0 }
 0x203   : > { %4396 = vmatprep.subr.bf16.mxu0 %v5025_v25 }
 0x204   : > { %3841 = vmatmul.mubr.msk.f32.gmra.mrb[12].mxu1 %vm388_vm0, %v779_v30 }
 0x205   : > { %4386 = vmatpush3.bf16.msra.mxu1 %v5738_v7  ;;  %3843 = vmatprep.mubr.msk.f32.mxu1 %vm388_vm0, %v785_v35  ;;  %v1056_v35 = vsub.s32 2, %v802_v15 }
 0x206   : > { %4387 = vmatprep.subr.bf16.mxu1 %v5025_v25  ;;  %4398 = vmatpush3.bf16.msra.mxu0 %v5742_v8 }
 0x207   : > { %4399 = vmatprep.subr.bf16.mxu0 %v5025_v25  ;;  %v1057_v44 = vrot.slane %v792_v22, %v1056_v35 }
 0x208   : > { %3844 = vmatmul.mubr.msk.f32.gmra.mrb[14].mxu1 %vm388_vm0, %v791_v43 }
 0x209   : > { %4389 = vmatpush3.bf16.msra.mxu1 %v5748_v14  ;;  %3881 = vmatprep.mubr.msk.f32.mxu1 %vm5026_vm1, %v5027_v37 }
 0x20a   : > { %4401 = vmatpush3.bf16.msra.mxu0 %v5752_v47  ;;  %4402 = vmatprep.subr.bf16.mxu1 %v5025_v25 }
 0x20b   : > { %4414 = vmatprep.subr.bf16.mxu0 %v5025_v25 }
 0x20c   : > { %3882 = vmatmul.mubr.f32.vlgmr.msra.gmra.mrb[16].mxu1 %v5027_v37 }
 0x20d   : > { %3901 = vmatmul.mubr.f32.vlgmr.msra.gmra.mrb[18].mxu0 %v5027_v37  ;;  %4404 = vmatpush3.bf16.msra.mxu1 %v5632_v39 }
 0x20e   : > { %4416 = vmatpush3.bf16.msra.mxu0 %v5714_v57  ;;  %4405 = vmatprep.subr.bf16.mxu1 %v5025_v25 }
 0x20f   : > { %4417 = vmatprep.subr.bf16.mxu0 %v5025_v25  ;;  %3919 = vmatprep.mubr.msk.f32.mxu1 %vm5026_vm1, %v5027_v37 }
 0x210   : > { %3938 = vmatprep.mubr.msk.f32.mxu0 %vm5026_vm1, %v5027_v37 }
 0x211   : > { %4407 = vmatpush3.bf16.msra.mxu1 %v5652_v56 }
 0x212   : > { %4419 = vmatpush3.bf16.msra.mxu0 %v5724_v53  ;;  %4408 = vmatprep.subr.bf16.mxu1 %v5025_v25 }
 0x213   : > { %4420 = vmatprep.subr.bf16.mxu0 %v5025_v25 }
 0x215   : > { %4410 = vmatpush3.bf16.msra.mxu1 %v5666_v18 }
 0x216   : > { %4422 = vmatpush3.bf16.msra.mxu0 %v5738_v7  ;;  %4411 = vmatprep.subr.bf16.mxu1 %v5025_v25 }
 0x217   : > { %4423 = vmatprep.subr.bf16.mxu0 %v5025_v25 }
 0x219   : > { %4413 = vmatpush3.bf16.msra.mxu1 %v5680_v48 }
 0x21a   : > { %4425 = vmatpush3.bf16.msra.mxu0 %v5748_v14  ;;  %4426 = vmatprep.subr.bf16.mxu1 %v5025_v25 }
 0x21b   : > { %4438 = vmatprep.subr.bf16.mxu0 %v5025_v25 }
 0x2b4   : > { %v3780_v5 = vpop.f32.mrb[0].mxu1  ;;  %v3808_v20 = vpop.f32.mrb[8].mxu0 }
 0x2b5   : > { %v5787_v24 = vadd.f32 %v3780_v5, %v804_v11  ;;  %v5789_v26 = vadd.f32 %v3808_v20, %v939_v46  ;;  %v888_v4 = vpop.f32.mrb[1].mxu1  ;;  %v1006_v34 = vpop.f32.mrb[9].mxu0 }
 0x2b6   : > { %v889_v54 = vadd.f32 %v888_v4, %v804_v11 }
 0x2bb   : > { %v3783_v52 = vpop.f32.mrb[2].mxu1  ;;  %v3811_v1 = vpop.f32.mrb[10].mxu0 }
 0x2bc   : > { %v5791_v21 = vadd.f32 %v3783_v52, %v804_v11  ;;  %v5793_v27 = vadd.f32 %v3811_v1, %v939_v46  ;;  %v898_v40 = vpop.f32.mrb[3].mxu1  ;;  %v1016_v62 = vpop.f32.mrb[11].mxu0  ;;  %v1007_v1 = vadd.f32 %v1006_v34, %v939_v46 }
 0x2bd   : > { %v5795_v51 = vadd.f32 %v898_v40, %v804_v11  ;;  %v5797_v10 = vadd.f32 %v1016_v62, %v939_v46 }
 0x2c3   : > { %v3786_v23 = vpop.f32.mrb[4].mxu1  ;;  %v3814_v6 = vpop.f32.mrb[12].mxu0 }
 0x2c4   : > { %v5799_v30 = vadd.f32 %v3786_v23, %v804_v11  ;;  %v5801_v16 = vadd.f32 %v3814_v6, %v939_v46  ;;  %v908_v19 = vpop.f32.mrb[5].mxu1  ;;  %v1026_v31 = vpop.f32.mrb[13].mxu0 }
 0x2c5   : > { %v5803_v13 = vadd.f32 %v908_v19, %v804_v11  ;;  %v5805_v33 = vadd.f32 %v1026_v31, %v939_v46 }
 0x2cb   : > { %v3789_v36 = vpop.f32.mrb[6].mxu1  ;;  %v3817_v29 = vpop.f32.mrb[14].mxu0 }
 0x2cc   : > { %v5807_v32 = vadd.f32 %v3789_v36, %v804_v11  ;;  %v5809_v38 = vadd.f32 %v3817_v29, %v939_v46  ;;  %v918_v42 = vpop.f32.mrb[7].mxu1  ;;  %v1036_v43 = vpop.f32.mrb[15].mxu0  ;;  %v5832_v36 = vld [vmem:[%s6287_s6] ss:$0 sm:$0xff] }
 0x2cd   : > { %v5811_v45 = vadd.f32 %v918_v42, %v804_v11  ;;  %v5813_v28 = vadd.f32 %v1036_v43, %v939_v46 }
 0x2cf   : > { %v3836_v58 = vpop.f32.mrb[8].mxu1  ;;  %v1265_v60 = vpop.f32.mrb[16].mxu0 }
 0x2d0   : > { %v5815_v63 = vadd.f32 %v3836_v58, %v1057_v44  ;;  %v1269_v3 = vadd.f32 %v1265_v60, %v889_v54  ;;  %v1124_v59 = vpop.f32.mrb[9].mxu1  ;;  %v3864_v50 = vpop.f32.mrb[17].mxu0 }
 0x2d1   : > { %v1125_v43 = vadd.f32 %v1124_v59, %v1057_v44 }
 0x2d2   : > { %v3408_v61 = vmul.f32 -1.442695, %v1269_v3 }
 0x2d3   : > { %v3839_v2 = vpop.f32.mrb[10].mxu1 }
 0x2d4   : > { %4733 = vpow2.f32 %v3408_v61  ;;  %v5817_v9 = vadd.f32 %v3839_v2, %v1057_v44  ;;  %v1134_v12 = vpop.f32.mrb[11].mxu1 }
 0x2d5   : > { %v5819_v49 = vadd.f32 %v1134_v12, %v1057_v44 }
 0x2d7   : > { %v3842_v15 = vpop.f32.mrb[12].mxu1 }
 0x2d8   : > { %v5821_v41 = vadd.f32 %v3842_v15, %v1057_v44  ;;  %v1144_v17 = vpop.f32.mrb[13].mxu1 }
 0x2d9   : > { %v5823_v22 = vadd.f32 %v1144_v17, %v1057_v44 }
 0x2db   : > { %v3845_v11 = vpop.f32.mrb[14].mxu1 }
 0x2dc   : > { %v5825_v5 = vadd.f32 %v3845_v11, %v1057_v44  ;;  %v1154_v20 = vpop.f32.mrb[15].mxu1 }
 0x2dd   : > { %v5827_v4 = vadd.f32 %v1154_v20, %v1057_v44 }
 0x2de   : > { %v4734_v52 = vpop.eup %4733 }
 0x2df   : > { %v1273_v40 = vadd.f32 1.0, %v4734_v52  ;;  %v1342_v62 = vpop.f32.mrb[16].mxu1 }
 0x2e0   : > { %v1346_v23 = vadd.f32 %v1342_v62, %v1007_v1  ;;  %v3883_v6 = vpop.f32.mrb[17].mxu1  ;;  %v1419_v19 = vpop.f32.mrb[18].mxu0 }
 0x2e1   : > { %4735 = vrcp.f32 %v1273_v40  ;;  %v3902_v31 = vpop.f32.mrb[19].mxu0  ;;  %v1420_v29 = vadd.f32 %v5832_v36, %v1419_v19 }
 0x2e2   : > { %v3409_v35 = vmul.f32 -1.442695, %v1346_v23 }
 0x2e4   : > { %4737 = vpow2.f32 %v3409_v35 }
 0x2eb   : > { %v4736_v42 = vpop.eup %4735 }
 0x2ec   : > { %v1423_v54 = vmul.f32 %v4736_v42, %v1420_v29 }
 0x2ee   : > { %v4738_v46 = vpop.eup %4737  ;;  %v1424_v34 = vadd.f32 %v1423_v54, %v1125_v43 }
 0x2ef   : > { %v1350_v58 = vadd.f32 1.0, %v4738_v46 }
 0x2f1   : > { %4739 = vrcp.f32 %v1350_v58 }
 0x2f2   : > { %4741 = vtanh.f32 %v1424_v34 }
 0x2fb   : > { %v4740_v60 = vpop.eup %4739 }
 0x2fc   : > { %v1426_v3 = vsub.f32 1.0, %v4740_v60  ;;  %v4742_v50 = vpop.eup %4741  ;;  %v1428_v61 = vmul.f32 0.0, %v4740_v60 }
 0x2fe   : > { %v1427_v2 = vmul.f32 %v4742_v50, %v1426_v3 }
 0x300   : > { %v5835_v12 = vadd.f32 %v1428_v61, %v1427_v2 }
 0x302   : > { %3920 = vmatmul.mubr.msk.f32.vlgmr.msra.gmra.mrb[18].mxu1 %vm388_vm0, %v5835_v12  ;;  %3939 = vmatmul.mubr.msk.f32.vlgmr.msra.gmra.mrb[20].mxu0 %vm388_vm0, %v5835_v12 }
 0x303   : > { %4428 = vmatpush3.bf16.msra.mxu1 %v5716_v55  ;;  %3957 = vmatprep.mubr.msk.f32.mxu1 %vm5026_vm1, %v5027_v37 }
 0x304   : > { %4429 = vmatprep.subr.bf16.mxu1 %v5025_v25  ;;  %4440 = vmatpush3.bf16.msra.mxu0 %v5632_v39 }
 0x305   : > { %4441 = vmatprep.subr.bf16.mxu0 %v5025_v25  ;;  %3976 = vmatprep.mubr.msk.f32.mxu0 %vm5026_vm1, %v5027_v37 }
 0x307   : > { %4431 = vmatpush3.bf16.msra.mxu1 %v5728_v0 }
 0x308   : > { %4432 = vmatprep.subr.bf16.mxu1 %v5025_v25  ;;  %4443 = vmatpush3.bf16.msra.mxu0 %v5652_v56 }
 0x309   : > { %4444 = vmatprep.subr.bf16.mxu0 %v5025_v25 }
 0x30b   : > { %4434 = vmatpush3.bf16.msra.mxu1 %v5742_v8 }
 0x30c   : > { %4435 = vmatprep.subr.bf16.mxu1 %v5025_v25  ;;  %4446 = vmatpush3.bf16.msra.mxu0 %v5666_v18 }
 0x30d   : > { %4447 = vmatprep.subr.bf16.mxu0 %v5025_v25 }
 0x30f   : > { %4437 = vmatpush3.bf16.msra.mxu1 %v5752_v47 }
 0x310   : > { %4450 = vmatprep.subr.bf16.mxu1 %v5025_v25  ;;  %4449 = vmatpush3.bf16.msra.mxu0 %v5680_v48 }
 0x311   : > { %4462 = vmatprep.subr.bf16.mxu0 %v5025_v25 }
 0x312   : > { %3958 = vmatmul.mubr.msk.f32.vlgmr.msra.gmra.mrb[20].mxu1 %vm388_vm0, %v5835_v12 }
 0x313   : > { %4452 = vmatpush3.bf16.msra.mxu1 %v5714_v57  ;;  %3995 = vmatprep.mubr.msk.f32.mxu1 %vm5026_vm1, %v5027_v37 }
 0x314   : > { %4453 = vmatprep.subr.bf16.mxu1 %v5025_v25 }
 0x317   : > { %4455 = vmatpush3.bf16.msra.mxu1 %v5724_v53 }
 0x318   : > { %4456 = vmatprep.subr.bf16.mxu1 %v5025_v25 }
 0x31b   : > { %4458 = vmatpush3.bf16.msra.mxu1 %v5738_v7 }
 0x31c   : > { %4459 = vmatprep.subr.bf16.mxu1 %v5025_v25 }
 0x31f   : > { %4461 = vmatpush3.bf16.msra.mxu1 %v5748_v14 }
 0x320   : > { %4474 = vmatprep.subr.bf16.mxu1 %v5025_v25 }
 0x3d5   : > { %v1499_v44 = vpop.f32.mrb[18].mxu1  ;;  %v1576_v59 = vpop.f32.mrb[20].mxu0 }
 0x3d6   : > { %v1503_v15 = vadd.f32 %v1499_v44, %v5787_v24  ;;  %v1580_v17 = vadd.f32 %v1576_v59, %v5789_v26  ;;  %v3921_v11 = vpop.f32.mrb[19].mxu1  ;;  %v3940_v20 = vpop.f32.mrb[21].mxu0 }
 0x3d8   : > { %v3411_v52 = vmul.f32 -1.442695, %v1503_v15  ;;  %v3413_v1 = vmul.f32 -1.442695, %v1580_v17 }
 0x3da   : > { %4743 = vpow2.f32 %v3411_v52 }
 0x3db   : > { %4745 = vpow2.f32 %v3413_v1 }
 0x3e4   : > { %v4744_v40 = vpop.eup %4743 }
 0x3e5   : > { %v1507_v62 = vadd.f32 1.0, %v4744_v40  ;;  %v1653_v23 = vpop.f32.mrb[20].mxu1  ;;  %v4746_v19 = vpop.eup %4745 }
 0x3e6   : > { %v3959_v6 = vpop.f32.mrb[21].mxu1  ;;  %v1584_v31 = vadd.f32 1.0, %v4746_v19  ;;  %v1654_v35 = vadd.f32 %v5832_v36, %v1653_v23 }
 0x3e7   : > { %4747 = vrcp.f32 %v1507_v62 }
 0x3e8   : > { %4749 = vrcp.f32 %v1584_v31 }
 0x3f1   : > { %v4748_v29 = vpop.eup %4747 }
 0x3f2   : > { %v1657_v24 = vmul.f32 %v4748_v29, %v1654_v35  ;;  %v4750_v42 = vpop.eup %4749 }
 0x3f3   : > { %v1660_v43 = vsub.f32 1.0, %v4750_v42  ;;  %v1662_v46 = vmul.f32 %v4750_v42, %v5835_v12 }
 0x3f4   : > { %v1658_v26 = vadd.f32 %v1657_v24, %v5815_v63 }
 0x3f6   : > { %4751 = vtanh.f32 %v1658_v26 }
 0x400   : > { %v4752_v54 = vpop.eup %4751 }
 0x401   : > { %v1661_v34 = vmul.f32 %v4752_v54, %v1660_v43 }
 0x403   : > { %v5878_v58 = vadd.f32 %v1662_v46, %v1661_v34 }
 0x405   : > { %3977 = vmatmul.mubr.msk.f32.vlgmr.msra.gmra.mrb[22].mxu0 %vm388_vm0, %v5878_v58  ;;  %3996 = vmatmul.mubr.msk.f32.vlgmr.msra.gmra.mrb[22].mxu1 %vm388_vm0, %v5878_v58 }
 0x406   : > { %4464 = vmatpush3.bf16.msra.mxu0 %v5716_v55  ;;  %4014 = vmatprep.mubr.msk.f32.mxu0 %vm5026_vm1, %v5027_v37 }
 0x407   : > { %4465 = vmatprep.subr.bf16.mxu0 %v5025_v25  ;;  %4476 = vmatpush3.bf16.msra.mxu1 %v5632_v39 }
 0x408   : > { %4477 = vmatprep.subr.bf16.mxu1 %v5025_v25  ;;  %4033 = vmatprep.mubr.msk.f32.mxu1 %vm5026_vm1, %v5027_v37 }
 0x40a   : > { %4467 = vmatpush3.bf16.msra.mxu0 %v5728_v0 }
 0x40b   : > { %4468 = vmatprep.subr.bf16.mxu0 %v5025_v25  ;;  %4479 = vmatpush3.bf16.msra.mxu1 %v5652_v56 }
 0x40c   : > { %4480 = vmatprep.subr.bf16.mxu1 %v5025_v25 }
 0x40e   : > { %4470 = vmatpush3.bf16.msra.mxu0 %v5742_v8 }
 0x40f   : > { %4471 = vmatprep.subr.bf16.mxu0 %v5025_v25  ;;  %4482 = vmatpush3.bf16.msra.mxu1 %v5666_v18 }
 0x410   : > { %4483 = vmatprep.subr.bf16.mxu1 %v5025_v25 }
 0x412   : > { %4473 = vmatpush3.bf16.msra.mxu0 %v5752_v47 }
 0x413   : > { %4486 = vmatprep.subr.bf16.mxu0 %v5025_v25  ;;  %4485 = vmatpush3.bf16.msra.mxu1 %v5680_v48 }
 0x414   : > { %4498 = vmatprep.subr.bf16.mxu1 %v5025_v25 }
 0x415   : > { %4015 = vmatmul.mubr.msk.f32.vlgmr.msra.gmra.mrb[24].mxu0 %vm388_vm0, %v5878_v58 }
 0x416   : > { %4488 = vmatpush3.bf16.msra.mxu0 %v5714_v57  ;;  %4052 = vmatprep.mubr.msk.f32.mxu0 %vm5026_vm1, %v5027_v37 }
 0x417   : > { %4489 = vmatprep.subr.bf16.mxu0 %v5025_v25 }
 0x41a   : > { %4491 = vmatpush3.bf16.msra.mxu0 %v5724_v53 }
 0x41b   : > { %4492 = vmatprep.subr.bf16.mxu0 %v5025_v25 }
 0x41e   : > { %4494 = vmatpush3.bf16.msra.mxu0 %v5738_v7 }
 0x41f   : > { %4495 = vmatprep.subr.bf16.mxu0 %v5025_v25 }
 0x422   : > { %4497 = vmatpush3.bf16.msra.mxu0 %v5748_v14 }
 0x423   : > { %4510 = vmatprep.subr.bf16.mxu0 %v5025_v25 }
 0x4d8   : > { %v1733_v63 = vpop.f32.mrb[22].mxu0  ;;  %v1810_v60 = vpop.f32.mrb[22].mxu1 }
 0x4d9   : > { %v1737_v3 = vadd.f32 %v1733_v63, %v5795_v51  ;;  %v1814_v50 = vadd.f32 %v1810_v60, %v5797_v10  ;;  %v3978_v61 = vpop.f32.mrb[23].mxu0  ;;  %v3997_v2 = vpop.f32.mrb[23].mxu1 }
 0x4db   : > { %v3416_v44 = vmul.f32 -1.442695, %v1737_v3  ;;  %v3418_v59 = vmul.f32 -1.442695, %v1814_v50 }
 0x4dd   : > { %4753 = vpow2.f32 %v3416_v44 }
 0x4de   : > { %4755 = vpow2.f32 %v3418_v59 }
 0x4e7   : > { %v4754_v15 = vpop.eup %4753 }
 0x4e8   : > { %v1741_v17 = vadd.f32 1.0, %v4754_v15  ;;  %v1887_v11 = vpop.f32.mrb[24].mxu0  ;;  %v4756_v52 = vpop.eup %4755 }
 0x4e9   : > { %v4016_v20 = vpop.f32.mrb[25].mxu0  ;;  %v1818_v1 = vadd.f32 1.0, %v4756_v52  ;;  %v1888_v40 = vadd.f32 %v5832_v36, %v1887_v11 }
 0x4ea   : > { %4757 = vrcp.f32 %v1741_v17 }
 0x4eb   : > { %4759 = vrcp.f32 %v1818_v1 }
 0x4f4   : > { %v4758_v62 = vpop.eup %4757 }
 0x4f5   : > { %v1891_v51 = vmul.f32 %v4758_v62, %v1888_v40  ;;  %v4760_v23 = vpop.eup %4759 }
 0x4f6   : > { %v1894_v6 = vsub.f32 1.0, %v4760_v23  ;;  %v1896_v31 = vmul.f32 %v4760_v23, %v5878_v58 }
 0x4f7   : > { %v1892_v10 = vadd.f32 %v1891_v51, %v5819_v49 }
 0x4f9   : > { %4761 = vtanh.f32 %v1892_v10 }
 0x503   : > { %v4762_v19 = vpop.eup %4761 }
 0x504   : > { %v1895_v35 = vmul.f32 %v4762_v19, %v1894_v6 }
 0x506   : > { %v5921_v29 = vadd.f32 %v1896_v31, %v1895_v35 }
 0x508   : > { %4034 = vmatmul.mubr.msk.f32.vlgmr.msra.gmra.mrb[24].mxu1 %vm388_vm0, %v5921_v29  ;;  %4053 = vmatmul.mubr.msk.f32.vlgmr.msra.gmra.mrb[26].mxu0 %vm388_vm0, %v5921_v29 }
 0x509   : > { %4500 = vmatpush3.bf16.msra.mxu1 %v5716_v55  ;;  %4071 = vmatprep.mubr.msk.f32.mxu1 %vm5026_vm1, %v5027_v37 }
 0x50a   : > { %4501 = vmatprep.subr.bf16.mxu1 %v5025_v25  ;;  %4512 = vmatpush3.bf16.msra.mxu0 %v5632_v39 }
 0x50b   : > { %4513 = vmatprep.subr.bf16.mxu0 %v5025_v25  ;;  %4090 = vmatprep.mubr.msk.f32.mxu0 %vm5026_vm1, %v5027_v37 }
 0x50d   : > { %4503 = vmatpush3.bf16.msra.mxu1 %v5728_v0 }
 0x50e   : > { %4504 = vmatprep.subr.bf16.mxu1 %v5025_v25  ;;  %4515 = vmatpush3.bf16.msra.mxu0 %v5652_v56 }
 0x50f   : > { %4516 = vmatprep.subr.bf16.mxu0 %v5025_v25 }
 0x511   : > { %4506 = vmatpush3.bf16.msra.mxu1 %v5742_v8 }
 0x512   : > { %4507 = vmatprep.subr.bf16.mxu1 %v5025_v25  ;;  %4518 = vmatpush3.bf16.msra.mxu0 %v5666_v18 }
 0x513   : > { %4519 = vmatprep.subr.bf16.mxu0 %v5025_v25 }
 0x515   : > { %4509 = vmatpush3.bf16.msra.mxu1 %v5752_v47 }
 0x516   : > { %4522 = vmatprep.subr.bf16.mxu1 %v5025_v25  ;;  %4521 = vmatpush3.bf16.msra.mxu0 %v5680_v48 }
 0x517   : > { %4534 = vmatprep.subr.bf16.mxu0 %v5025_v25 }
 0x518   : > { %4072 = vmatmul.mubr.msk.f32.vlgmr.msra.gmra.mrb[26].mxu1 %vm388_vm0, %v5921_v29 }
 0x519   : > { %4524 = vmatpush3.bf16.msra.mxu1 %v5714_v57  ;;  %4109 = vmatprep.mubr.msk.f32.mxu1 %vm5026_vm1, %v5027_v37 }
 0x51a   : > { %4525 = vmatprep.subr.bf16.mxu1 %v5025_v25 }
 0x51d   : > { %4527 = vmatpush3.bf16.msra.mxu1 %v5724_v53 }
 0x51e   : > { %4528 = vmatprep.subr.bf16.mxu1 %v5025_v25 }
 0x521   : > { %4530 = vmatpush3.bf16.msra.mxu1 %v5738_v7 }
 0x522   : > { %4531 = vmatprep.subr.bf16.mxu1 %v5025_v25 }
 0x525   : > { %4533 = vmatpush3.bf16.msra.mxu1 %v5748_v14 }
 0x526   : > { %4546 = vmatprep.subr.bf16.mxu1 %v5025_v25 }
 0x5db   : > { %v1967_v49 = vpop.f32.mrb[24].mxu1  ;;  %v2044_v24 = vpop.f32.mrb[26].mxu0 }
 0x5dc   : > { %v1971_v26 = vadd.f32 %v1967_v49, %v5791_v21  ;;  %v2048_v42 = vadd.f32 %v2044_v24, %v5793_v27  ;;  %v4035_v43 = vpop.f32.mrb[25].mxu1  ;;  %v4054_v54 = vpop.f32.mrb[27].mxu0 }
 0x5de   : > { %v3421_v46 = vmul.f32 -1.442695, %v1971_v26  ;;  %v3423_v34 = vmul.f32 -1.442695, %v2048_v42 }
 0x5e0   : > { %4763 = vpow2.f32 %v3421_v46 }
 0x5e1   : > { %4765 = vpow2.f32 %v3423_v34 }
 0x5ea   : > { %v4764_v63 = vpop.eup %4763 }
 0x5eb   : > { %v1975_v60 = vadd.f32 1.0, %v4764_v63  ;;  %v2121_v3 = vpop.f32.mrb[26].mxu1  ;;  %v4766_v61 = vpop.eup %4765 }
 0x5ec   : > { %v4073_v50 = vpop.f32.mrb[27].mxu1  ;;  %v2052_v2 = vadd.f32 1.0, %v4766_v61  ;;  %v2122_v44 = vadd.f32 %v5832_v36, %v2121_v3 }
 0x5ed   : > { %4767 = vrcp.f32 %v1975_v60 }
 0x5ee   : > { %4769 = vrcp.f32 %v2052_v2 }
 0x5f7   : > { %v4768_v59 = vpop.eup %4767 }
 0x5f8   : > { %v2125_v21 = vmul.f32 %v4768_v59, %v2122_v44  ;;  %v4770_v15 = vpop.eup %4769 }
 0x5f9   : > { %v2128_v17 = vsub.f32 1.0, %v4770_v15  ;;  %v2130_v20 = vmul.f32 %v4770_v15, %v5921_v29 }
 0x5fa   : > { %v2126_v27 = vadd.f32 %v2125_v21, %v5817_v9 }
 0x5fc   : > { %4771 = vtanh.f32 %v2126_v27 }
 0x606   : > { %v4772_v11 = vpop.eup %4771 }
 0x607   : > { %v2129_v52 = vmul.f32 %v4772_v11, %v2128_v17 }
 0x609   : > { %v5964_v1 = vadd.f32 %v2130_v20, %v2129_v52 }
 0x60b   : > { %4091 = vmatmul.mubr.msk.f32.vlgmr.msra.gmra.mrb[28].mxu0 %vm388_vm0, %v5964_v1  ;;  %4110 = vmatmul.mubr.msk.f32.vlgmr.msra.gmra.mrb[28].mxu1 %vm388_vm0, %v5964_v1 }
 0x60c   : > { %4536 = vmatpush3.bf16.msra.mxu0 %v5716_v55  ;;  %4128 = vmatprep.mubr.msk.f32.mxu0 %vm5026_vm1, %v5027_v37 }
 0x60d   : > { %4537 = vmatprep.subr.bf16.mxu0 %v5025_v25  ;;  %4548 = vmatpush3.bf16.msra.mxu1 %v5632_v39 }
 0x60e   : > { %4549 = vmatprep.subr.bf16.mxu1 %v5025_v25  ;;  %4147 = vmatprep.mubr.msk.f32.mxu1 %vm5026_vm1, %v5027_v37 }
 0x610   : > { %4539 = vmatpush3.bf16.msra.mxu0 %v5728_v0 }
 0x611   : > { %4540 = vmatprep.subr.bf16.mxu0 %v5025_v25  ;;  %4551 = vmatpush3.bf16.msra.mxu1 %v5652_v56 }
 0x612   : > { %4552 = vmatprep.subr.bf16.mxu1 %v5025_v25 }
 0x614   : > { %4542 = vmatpush3.bf16.msra.mxu0 %v5742_v8 }
 0x615   : > { %4543 = vmatprep.subr.bf16.mxu0 %v5025_v25  ;;  %4554 = vmatpush3.bf16.msra.mxu1 %v5666_v18 }
 0x616   : > { %4555 = vmatprep.subr.bf16.mxu1 %v5025_v25 }
 0x618   : > { %4545 = vmatpush3.bf16.msra.mxu0 %v5752_v47 }
 0x619   : > { %4558 = vmatprep.subr.bf16.mxu0 %v5025_v25  ;;  %4557 = vmatpush3.bf16.msra.mxu1 %v5680_v48 }
 0x61a   : > { %4570 = vmatprep.subr.bf16.mxu1 %v5025_v25 }
 0x61b   : > { %4129 = vmatmul.mubr.msk.f32.vlgmr.msra.gmra.mrb[30].mxu0 %vm388_vm0, %v5964_v1 }
 0x61c   : > { %4560 = vmatpush3.bf16.msra.mxu0 %v5714_v57  ;;  %4166 = vmatprep.mubr.msk.f32.mxu0 %vm5026_vm1, %v5027_v37 }
 0x61d   : > { %4561 = vmatprep.subr.bf16.mxu0 %v5025_v25 }
 0x620   : > { %4563 = vmatpush3.bf16.msra.mxu0 %v5724_v53 }
 0x621   : > { %4564 = vmatprep.subr.bf16.mxu0 %v5025_v25 }
 0x624   : > { %4566 = vmatpush3.bf16.msra.mxu0 %v5738_v7 }
 0x625   : > { %4567 = vmatprep.subr.bf16.mxu0 %v5025_v25 }
 0x628   : > { %4569 = vmatpush3.bf16.msra.mxu0 %v5748_v14 }
 0x629   : > { %4582 = vmatprep.subr.bf16.mxu0 %v5025_v25 }
 0x6de   : > { %v2201_v9 = vpop.f32.mrb[28].mxu0  ;;  %v2278_v40 = vpop.f32.mrb[28].mxu1 }
 0x6df   : > { %v2205_v62 = vadd.f32 %v2201_v9, %v5803_v13  ;;  %v2282_v51 = vadd.f32 %v2278_v40, %v5805_v33  ;;  %v4092_v10 = vpop.f32.mrb[29].mxu0  ;;  %v4111_v23 = vpop.f32.mrb[29].mxu1 }
 0x6e1   : > { %v3426_v6 = vmul.f32 -1.442695, %v2205_v62  ;;  %v3428_v19 = vmul.f32 -1.442695, %v2282_v51 }
 0x6e3   : > { %4773 = vpow2.f32 %v3426_v6 }
 0x6e4   : > { %4775 = vpow2.f32 %v3428_v19 }
 0x6ed   : > { %v4774_v31 = vpop.eup %4773 }
 0x6ee   : > { %v2209_v35 = vadd.f32 1.0, %v4774_v31  ;;  %v2355_v49 = vpop.f32.mrb[30].mxu0  ;;  %v4776_v26 = vpop.eup %4775 }
 0x6ef   : > { %v4130_v24 = vpop.f32.mrb[31].mxu0  ;;  %v2286_v42 = vadd.f32 1.0, %v4776_v26  ;;  %v2356_v43 = vadd.f32 %v5832_v36, %v2355_v49 }
 0x6f0   : > { %4777 = vrcp.f32 %v2209_v35 }
 0x6f1   : > { %4779 = vrcp.f32 %v2286_v42 }
 0x6fa   : > { %v4778_v54 = vpop.eup %4777 }
 0x6fb   : > { %v2359_v13 = vmul.f32 %v4778_v54, %v2356_v43  ;;  %v4780_v46 = vpop.eup %4779 }
 0x6fc   : > { %v2362_v34 = vsub.f32 1.0, %v4780_v46  ;;  %v2364_v60 = vmul.f32 %v4780_v46, %v5964_v1 }
 0x6fd   : > { %v2360_v33 = vadd.f32 %v2359_v13, %v5823_v22 }
 0x6ff   : > { %4781 = vtanh.f32 %v2360_v33 }
 0x709   : > { %v4782_v63 = vpop.eup %4781 }
 0x70a   : > { %v2363_v3 = vmul.f32 %v4782_v63, %v2362_v34 }
 0x70c   : > { %v6007_v50 = vadd.f32 %v2364_v60, %v2363_v3 }
 0x70e   : > { %4148 = vmatmul.mubr.msk.f32.vlgmr.msra.gmra.mrb[30].mxu1 %vm388_vm0, %v6007_v50  ;;  %4167 = vmatmul.mubr.msk.f32.vlgmr.msra.gmra.mrb[32].mxu0 %vm388_vm0, %v6007_v50  ;;  %v6016_v61 = vsel %vm573_vm8, %v5964_v1, %v6007_v50 }
 0x70f   : > { %4572 = vmatpush3.bf16.msra.mxu1 %v5716_v55  ;;  %v3113_v22 = vsel %vm388_vm0, %v6016_v61, 0.0  ;;  %4185 = vmatprep.mubr.msk.f32.mxu1 %vm5026_vm1, %v5027_v37 }
 0x710   : > { %3114 = vadd.xlane.f32.xlu0 %v3113_v22  ;;  %4573 = vmatprep.subr.bf16.mxu1 %v5025_v25 }
 0x711   : > { %4584 = vmatpush3.bf16.msra.mxu0 %v5632_v39  ;;  %4204 = vmatprep.mubr.msk.f32.mxu0 %vm5026_vm1, %v5027_v37 }
 0x712   : > { %4585 = vmatprep.subr.bf16.mxu0 %v5025_v25 }
 0x713   : > { %4575 = vmatpush3.bf16.msra.mxu1 %v5728_v0 }
 0x714   : > { %4576 = vmatprep.subr.bf16.mxu1 %v5025_v25 }
 0x715   : > { %4587 = vmatpush3.bf16.msra.mxu0 %v5652_v56 }
 0x716   : > { %4588 = vmatprep.subr.bf16.mxu0 %v5025_v25 }
 0x717   : > { %4578 = vmatpush3.bf16.msra.mxu1 %v5742_v8 }
 0x718   : > { %4579 = vmatprep.subr.bf16.mxu1 %v5025_v25 }
 0x719   : > { %4590 = vmatpush3.bf16.msra.mxu0 %v5666_v18 }
 0x71a   : > { %4591 = vmatprep.subr.bf16.mxu0 %v5025_v25 }
 0x71b   : > { %4581 = vmatpush3.bf16.msra.mxu1 %v5752_v47 }
 0x71c   : > { %4594 = vmatprep.subr.bf16.mxu1 %v5025_v25 }
 0x71d   : > { %4593 = vmatpush3.bf16.msra.mxu0 %v5680_v48 }
 0x71e   : > { %4186 = vmatmul.mubr.msk.f32.vlgmr.msra.gmra.mrb[32].mxu1 %vm388_vm0, %v6007_v50  ;;  %4606 = vmatprep.subr.bf16.mxu0 %v5025_v25 }
 0x71f   : > { %4596 = vmatpush3.bf16.msra.mxu1 %v5714_v57  ;;  %4223 = vmatprep.mubr.msk.f32.mxu1 %vm5026_vm1, %v5027_v37 }
 0x720   : > { %4597 = vmatprep.subr.bf16.mxu1 %v5025_v25 }
 0x723   : > { %4599 = vmatpush3.bf16.msra.mxu1 %v5724_v53 }
 0x724   : > { %4600 = vmatprep.subr.bf16.mxu1 %v5025_v25 }
 0x727   : > { %4602 = vmatpush3.bf16.msra.mxu1 %v5738_v7 }
 0x728   : > { %4603 = vmatprep.subr.bf16.mxu1 %v5025_v25 }
 0x72b   : > { %4605 = vmatpush3.bf16.msra.mxu1 %v5748_v14 }
 0x72c   : > { %4618 = vmatprep.subr.bf16.mxu1 %v5025_v25 }
 0x7e1   : > { %v2435_v2 = vpop.f32.mrb[30].mxu1  ;;  %v2512_v44 = vpop.f32.mrb[32].mxu0 }
 0x7e2   : > { %v2439_v59 = vadd.f32 %v2435_v2, %v5799_v30  ;;  %v2516_v21 = vadd.f32 %v2512_v44, %v5801_v16  ;;  %v4149_v27 = vpop.f32.mrb[31].mxu1  ;;  %v4168_v15 = vpop.f32.mrb[33].mxu0 }
 0x7e4   : > { %v3431_v17 = vmul.f32 -1.442695, %v2439_v59  ;;  %v3433_v11 = vmul.f32 -1.442695, %v2516_v21 }
 0x7e6   : > { %4783 = vpow2.f32 %v3431_v17 }
 0x7e7   : > { %4785 = vpow2.f32 %v3433_v11 }
 0x7f0   : > { %v4784_v20 = vpop.eup %4783 }
 0x7f1   : > { %v2443_v52 = vadd.f32 1.0, %v4784_v20  ;;  %v2589_v9 = vpop.f32.mrb[32].mxu1  ;;  %v4786_v62 = vpop.eup %4785 }
 0x7f2   : > { %v4187_v40 = vpop.f32.mrb[33].mxu1  ;;  %v2520_v51 = vadd.f32 1.0, %v4786_v62  ;;  %v2590_v10 = vadd.f32 %v5832_v36, %v2589_v9 }
 0x7f3   : > { %4787 = vrcp.f32 %v2443_v52 }
 0x7f4   : > { %4789 = vrcp.f32 %v2520_v51 }
 0x7fd   : > { %v4788_v23 = vpop.eup %4787 }
 0x7fe   : > { %v2593_v30 = vmul.f32 %v4788_v23, %v2590_v10  ;;  %v4790_v6 = vpop.eup %4789  ;;  %v3115_v23 = vpop.xlane.xlu0 %3114 }
 0x7ff   : > { %v2596_v19 = vsub.f32 1.0, %v4790_v6  ;;  %v2598_v35 = vmul.f32 %v4790_v6, %v6007_v50 }
 0x800   : > { %v2594_v16 = vadd.f32 %v2593_v30, %v5821_v41 }
 0x802   : > { %4791 = vtanh.f32 %v2594_v16 }
 0x80c   : > { %v4792_v31 = vpop.eup %4791 }
 0x80d   : > { %v2597_v49 = vmul.f32 %v4792_v31, %v2596_v19 }
 0x80f   : > { %v6057_v24 = vadd.f32 %v2598_v35, %v2597_v49 }
 0x811   : > { %4205 = vmatmul.mubr.msk.f32.vlgmr.msra.gmra.mrb[34].mxu0 %vm388_vm0, %v6057_v24  ;;  %4224 = vmatmul.mubr.msk.f32.vlgmr.msra.gmra.mrb[34].mxu1 %vm388_vm0, %v6057_v24  ;;  %v6066_v26 = vsel %vm573_vm8, %v6057_v24, %v5921_v29 }
 0x812   : > { %4608 = vmatpush3.bf16.msra.mxu0 %v5716_v55  ;;  %v3141_v41 = vsel %vm388_vm0, %v6066_v26, 0.0  ;;  %4242 = vmatprep.mubr.msk.f32.mxu0 %vm5026_vm1, %v5027_v37 }
 0x813   : > { %3142 = vadd.xlane.f32.xlu0 %v3141_v41  ;;  %4609 = vmatprep.subr.bf16.mxu0 %v5025_v25 }
 0x814   : > { %4620 = vmatpush3.bf16.msra.mxu1 %v5632_v39  ;;  %4261 = vmatprep.mubr.msk.f32.mxu1 %vm5026_vm1, %v5027_v37 }
 0x815   : > { %4621 = vmatprep.subr.bf16.mxu1 %v5025_v25 }
 0x816   : > { %4611 = vmatpush3.bf16.msra.mxu0 %v5728_v0 }
 0x817   : > { %4612 = vmatprep.subr.bf16.mxu0 %v5025_v25 }
 0x818   : > { %4623 = vmatpush3.bf16.msra.mxu1 %v5652_v56 }
 0x819   : > { %4624 = vmatprep.subr.bf16.mxu1 %v5025_v25 }
 0x81a   : > { %4614 = vmatpush3.bf16.msra.mxu0 %v5742_v8 }
 0x81b   : > { %4615 = vmatprep.subr.bf16.mxu0 %v5025_v25 }
 0x81c   : > { %4626 = vmatpush3.bf16.msra.mxu1 %v5666_v18 }
 0x81d   : > { %4627 = vmatprep.subr.bf16.mxu1 %v5025_v25 }
 0x81e   : > { %4617 = vmatpush3.bf16.msra.mxu0 %v5752_v47 }
 0x81f   : > { %4630 = vmatprep.subr.bf16.mxu0 %v5025_v25 }
 0x820   : > { %4629 = vmatpush3.bf16.msra.mxu1 %v5680_v48 }
 0x821   : > { %4243 = vmatmul.mubr.msk.f32.vlgmr.msra.gmra.mrb[36].mxu0 %vm388_vm0, %v6057_v24  ;;  %4642 = vmatprep.subr.bf16.mxu1 %v5025_v25 }
 0x822   : > { %4632 = vmatpush3.bf16.msra.mxu0 %v5714_v57  ;;  %4280 = vmatprep.mubr.msk.f32.mxu0 %vm5026_vm1, %v5027_v37 }
 0x823   : > { %4633 = vmatprep.subr.bf16.mxu0 %v5025_v25 }
 0x826   : > { %4635 = vmatpush3.bf16.msra.mxu0 %v5724_v53 }
 0x827   : > { %4636 = vmatprep.subr.bf16.mxu0 %v5025_v25 }
 0x82a   : > { %4638 = vmatpush3.bf16.msra.mxu0 %v5738_v7 }
 0x82b   : > { %4639 = vmatprep.subr.bf16.mxu0 %v5025_v25 }
 0x82e   : > { %4641 = vmatpush3.bf16.msra.mxu0 %v5748_v14 }
 0x8a0   : > { %v3143_v49 = vpop.xlane.xlu0 %3142 }
 0x8e4   : > { %v2669_v39 = vpop.f32.mrb[34].mxu0  ;;  %v2746_v56 = vpop.f32.mrb[34].mxu1 }
 0x8e5   : > { %v2673_v18 = vadd.f32 %v2669_v39, %v5811_v45  ;;  %v2750_v48 = vadd.f32 %v2746_v56, %v5813_v28  ;;  %v4206_v57 = vpop.f32.mrb[35].mxu0  ;;  %v4225_v42 = vpop.f32.mrb[35].mxu1  ;;  %v3116_v39 = vmul.f32 0.015625, %v3115_v23  ;;  %v3126_v56 = vsel %vm573_vm8, %v6007_v50, %v5964_v1 }
 0x8e6   : > { %v3127_v1 = vsel %vm388_vm0, %v3126_v56, 0.0 }
 0x8e7   : > { %v3436_v43 = vmul.f32 -1.442695, %v2673_v18  ;;  %v3438_v54 = vmul.f32 -1.442695, %v2750_v48  ;;  %v3144_v18 = vmul.f32 0.015625, %v3143_v49  ;;  %v3117_v50 = vsub.f32 %v6016_v61, %v3116_v39 }
 0x8e9   : > { %4793 = vpow2.f32 %v3436_v43  ;;  %v3145_v43 = vsub.f32 %v6066_v26, %v3144_v18 }
 0x8ea   : > { %4795 = vpow2.f32 %v3438_v54 }
 0x8f3   : > { %v4794_v53 = vpop.eup %4793 }
 0x8f4   : > { %v2677_v13 = vadd.f32 1.0, %v4794_v53  ;;  %v2823_v33 = vpop.f32.mrb[36].mxu0  ;;  %v4796_v46 = vpop.eup %4795 }
 0x8f5   : > { %v4244_v7 = vpop.f32.mrb[37].mxu0  ;;  %v2754_v34 = vadd.f32 1.0, %v4796_v46  ;;  %v2824_v14 = vadd.f32 %v5832_v36, %v2823_v33 }
 0x8f6   : > { %4797 = vrcp.f32 %v2677_v13  ;;  %v3146_v7 = vmul.f32 %v3145_v43, %v3145_v43 }
 0x8f7   : > { %4799 = vrcp.f32 %v2754_v34 }
 0x8f8   : > { %v3147_v26 = vsel %vm388_vm0, %v3146_v7, 0.0 }
 0x900   : > { %v4798_v63 = vpop.eup %4797 }
 0x901   : > { %v2827_v45 = vmul.f32 %v4798_v63, %v2824_v14  ;;  %v4800_v60 = vpop.eup %4799 }
 0x902   : > { %v2830_v3 = vsub.f32 1.0, %v4800_v60  ;;  %v2832_v2 = vmul.f32 %v4800_v60, %v6057_v24 }
 0x903   : > { %v2828_v28 = vadd.f32 %v2827_v45, %v5827_v4 }
 0x905   : > { %4801 = vtanh.f32 %v2828_v28 }
 0x90f   : > { %v4802_v22 = vpop.eup %4801 }
 0x910   : > { %v2831_v44 = vmul.f32 %v4802_v22, %v2830_v3 }
 0x912   : > { %v6106_v59 = vadd.f32 %v2832_v2, %v2831_v44 }
 0x914   : > { %4262 = vmatmul.mubr.msk.f32.vlgmr.msra.gmra.mrb[36].mxu1 %vm388_vm0, %v6106_v59  ;;  %4281 = vmatmul.mubr.msk.f32.vlgmr.msra.gmra.mrb[38].mxu0 %vm388_vm0, %v6106_v59  ;;  %v3084_v21 = vsel %vm573_vm8, %v5878_v58, %v6106_v59  ;;  %v3154_v13 = vsel %vm573_vm8, %v6106_v59, %v5878_v58 }
 0x915   : > { %4644 = vmatpush3.bf16.msra.mxu1 %v5716_v55  ;;  %v3085_v4 = vsel %vm388_vm0, %v3084_v21, 0.0  ;;  %4299 = vmatprep.mubr.msk.f32.mxu1 %vm5026_vm1, %v5027_v37  ;;  %v3155_v33 = vsel %vm388_vm0, %v3154_v13, 0.0 }
 0x916   : > { %3086 = vadd.xlane.f32.xlu1 %v3085_v4  ;;  %4645 = vmatprep.subr.bf16.mxu1 %v5025_v25 }
 0x919   : > { %4647 = vmatpush3.bf16.msra.mxu1 %v5728_v0 }
 0x91a   : > { %4648 = vmatprep.subr.bf16.mxu1 %v5025_v25 }
 0x91d   : > { %4650 = vmatpush3.bf16.msra.mxu1 %v5742_v8 }
 0x91e   : > { %4651 = vmatprep.subr.bf16.mxu1 %v5025_v25 }
 0x921   : > { %4653 = vmatpush3.bf16.msra.mxu1 %v5752_v47 }
 0x924   : > { %4300 = vmatmul.mubr.msk.f32.vlgmr.msra.gmra.mrb[38].mxu1 %vm388_vm0, %v6106_v59 }
 0x9a3   : > { %v3087_v30 = vpop.xlane.xlu1 %3086 }
 0x9a4   : > { %v3088_v35 = vmul.f32 0.015625, %v3087_v30 }
 0x9a6   : > { %v6146_v48 = vsub.f32 %v3084_v21, %v3088_v35 }
 0x9a8   : > { %v3090_v53 = vmul.f32 %v6146_v48, %v6146_v48 }
 0x9e7   : > { %v2903_v55 = vpop.f32.mrb[36].mxu1  ;;  %v2980_v27 = vpop.f32.mrb[38].mxu0 }
 0x9e8   : > { %v2907_v37 = vadd.f32 %v2903_v55, %v5807_v32  ;;  %v2984_v15 = vadd.f32 %v2980_v27, %v5809_v38  ;;  %v4263_v17 = vpop.f32.mrb[37].mxu1  ;;  %v4282_v11 = vpop.f32.mrb[39].mxu0 }
 0x9ea   : > { %v3441_v0 = vmul.f32 -1.442695, %v2907_v37  ;;  %v3443_v20 = vmul.f32 -1.442695, %v2984_v15 }
 0x9ec   : > { %4803 = vpow2.f32 %v3441_v0 }
 0x9ed   : > { %4805 = vpow2.f32 %v3443_v20 }
 0x9f6   : > { %v4804_v8 = vpop.eup %4803 }
 0x9f7   : > { %v2911_v52 = vadd.f32 1.0, %v4804_v8  ;;  %v3057_v25 = vpop.f32.mrb[38].mxu1  ;;  %v4806_v9 = vpop.eup %4805 }
 0x9f8   : > { %v4301_v47 = vpop.f32.mrb[39].mxu1  ;;  %v2988_v40 = vadd.f32 1.0, %v4806_v9  ;;  %v3058_v62 = vadd.f32 %v5832_v36, %v3057_v25 }
 0x9f9   : > { %4807 = vrcp.f32 %v2911_v52 }
 0x9fa   : > { %4809 = vrcp.f32 %v2988_v40 }
 0xa03   : > { %v4808_v51 = vpop.eup %4807 }
 0xa04   : > { %v3061_v32 = vmul.f32 %v4808_v51, %v3058_v62  ;;  %v4810_v10 = vpop.eup %4809 }
 0xa05   : > { %v3064_v16 = vsub.f32 1.0, %v4810_v10  ;;  %v3066_v31 = vmul.f32 %v4810_v10, %v6106_v59 }
 0xa06   : > { %v3062_v38 = vadd.f32 %v3061_v32, %v5825_v5 }
 0xa08   : > { %4811 = vtanh.f32 %v3062_v38 }
 0xa12   : > { %v4812_v6 = vpop.eup %4811 }
 0xa13   : > { %v3065_v19 = vmul.f32 %v4812_v6, %v3064_v16 }
 0xa15   : > { %v3067_v41 = vadd.f32 %v3066_v31, %v3065_v19 }
 0xa17   : > { %v3168_v36 = vsel %vm573_vm8, %v3067_v41, %v5835_v12  ;;  %v6137_v5 = vsel %vm573_vm8, %v5835_v12, %v3067_v41  ;;  %3068 = vst.msk [vmem:[%s6142_s10] sm:$0xff] %vm388_vm0, %v3067_v41  ;;  %v3098_v12 = vsel %vm573_vm8, %v5921_v29, %v6057_v24  ;;  %v3091_v29 = vsel %vm388_vm0, %v3090_v53, 0.0 }
 0xa18   : > { %v3169_v57 = vsel %vm388_vm0, %v3168_v36, 0.0  ;;  %v3070_v42 = vsel %vm388_vm0, %v6137_v5, 0.0  ;;  %v3099_v54 = vsel %vm388_vm0, %v3098_v12, 0.0  ;;  %v3118_v24 = vmul.f32 %v3117_v50, %v3117_v50 }
 0xa19   : > { %3170 = vadd.xlane.f32.xlu1 %v3169_v57  ;;  %3071 = vadd.xlane.f32.xlu0 %v3070_v42 }
 0xa1a   : > { %v3119_v61 = vsel %vm388_vm0, %v3118_v24, 0.0 }
 0xa1d   : > { %3100 = vadd.xlane.f32.xlu1 %v3099_v54  ;;  %3128 = vadd.xlane.f32.xlu0 %v3127_v1 }
 0xa21   : > { %3156 = vadd.xlane.f32.xlu1 %v3155_v33  ;;  %3092 = vadd.xlane.f32.xlu0 %v3091_v29 }
 0xa25   : > { %3120 = vadd.xlane.f32.xlu1 %v3119_v61  ;;  %3148 = vadd.xlane.f32.xlu0 %v3147_v26 }
 0xaa6   : > { %v3171_v46 = vpop.xlane.xlu1 %3170  ;;  %v3072_v34 = vpop.xlane.xlu0 %3071 }
 0xaa7   : > { %v3172_v14 = vmul.f32 0.015625, %v3171_v46  ;;  %v3074_v16 = vmul.f32 0.015625, %v3072_v34 }
 0xaa9   : > { %v6167_v63 = vsub.f32 %v3168_v36, %v3172_v14  ;;  %v6192_v6 = vsub.f32 %v6137_v5, %v3074_v16 }
 0xaaa   : > { %v3101_v58 = vpop.xlane.xlu1 %3100  ;;  %v3129_v45 = vpop.xlane.xlu0 %3128 }
 0xaab   : > { %v3102_v28 = vmul.f32 0.015625, %v3101_v58  ;;  %v3130_v60 = vmul.f32 0.015625, %v3129_v45  ;;  %v3174_v3 = vmul.f32 %v6167_v63, %v6167_v63  ;;  %v3076_v19 = vmul.f32 %v6192_v6, %v6192_v6 }
 0xaad   : > { %v6171_v22 = vsub.f32 %v3098_v12, %v3102_v28  ;;  %v6173_v2 = vsub.f32 %v3126_v56, %v3130_v60  ;;  %v3175_v44 = vsel %vm388_vm0, %v3174_v3, 0.0  ;;  %v3077_v31 = vsel %vm388_vm0, %v3076_v19, 0.0 }
 0xaae   : > { %3176 = vadd.xlane.f32.xlu1 %v3175_v44  ;;  %v3157_v59 = vpop.xlane.xlu1 %3156  ;;  %v3093_v21 = vpop.xlane.xlu0 %3092 }
 0xaaf   : > { %v3158_v4 = vmul.f32 0.015625, %v3157_v59  ;;  %v3104_v55 = vmul.f32 %v6171_v22, %v6171_v22  ;;  %v3132_v27 = vmul.f32 %v6173_v2, %v6173_v2  ;;  %v3094_v15 = vmul.f32 0.015625, %v3093_v21 }
 0xab1   : > { %v6180_v37 = vsub.f32 %v3154_v13, %v3158_v4  ;;  %v3105_v17 = vsel %vm388_vm0, %v3104_v55, 0.0  ;;  %v3133_v11 = vsel %vm388_vm0, %v3132_v27, 0.0  ;;  %v3095_v47 = vadd.f32 1e-05, %v3094_v15 }
 0xab2   : > { %3106 = vadd.xlane.f32.xlu1 %v3105_v17  ;;  %v3121_v0 = vpop.xlane.xlu1 %3120  ;;  %3134 = vadd.xlane.f32.xlu0 %v3133_v11  ;;  %v3149_v20 = vpop.xlane.xlu0 %3148 }
 0xab3   : > { %v3122_v8 = vmul.f32 0.015625, %v3121_v0  ;;  %v3160_v52 = vmul.f32 %v6180_v37, %v6180_v37  ;;  %v3150_v25 = vmul.f32 0.015625, %v3149_v20 }
 0xab5   : > { %v3123_v9 = vadd.f32 1e-05, %v3122_v8  ;;  %v3161_v40 = vsel %vm388_vm0, %v3160_v52, 0.0  ;;  %v3151_v62 = vadd.f32 1e-05, %v3150_v25 }
 0xab6   : > { %3162 = vadd.xlane.f32.xlu1 %v3161_v40 }
 0xab7   : > { %4813 = vrsqrt.f32 %v3123_v9 }
 0xab8   : > { %4815 = vrsqrt.f32 %v3095_v47 }
 0xab9   : > { %4817 = vrsqrt.f32 %v3151_v62 }
 0xac1   : > { %v4814_v51 = vpop.eup %4813 }
 0xac2   : > { %v4816_v32 = vpop.eup %4815  ;;  %v3125_v38 = vmul.f32 %v4814_v51, %v3117_v50 }
 0xac3   : > { %v4818_v10 = vpop.eup %4817  ;;  %v3097_v23 = vmul.f32 %v4816_v32, %v6146_v48 }
 0xac4   : > { %v3153_v30 = vmul.f32 %v4818_v10, %v3145_v43 }
 0xac7   : > { %3187 = vrot.lane.b32.xlu1 %v3125_v38, %s5028_s17 }
 0xac8   : > { %3183 = vrot.lane.b32.xlu0 %v3097_v23, %s5028_s17 }
 0xacb   : > { %3191 = vrot.lane.b32.xlu1 %v3153_v30, %s5028_s17 }
 0xae7   : > { %3078 = vadd.xlane.f32.xlu0 %v3077_v31 }
 0xb3b   : > { %v3177_v35 = vpop.xlane.xlu1 %3176 }
 0xb3c   : > { %v3178_v49 = vmul.f32 0.015625, %v3177_v35 }
 0xb3e   : > { %v3179_v41 = vadd.f32 1e-05, %v3178_v49 }
 0xb3f   : > { %v3107_v39 = vpop.xlane.xlu1 %3106  ;;  %v3135_v36 = vpop.xlane.xlu0 %3134 }
 0xb40   : > { %4819 = vrsqrt.f32 %v3179_v41  ;;  %v3108_v56 = vmul.f32 0.015625, %v3107_v39  ;;  %v3136_v18 = vmul.f32 0.015625, %v3135_v36 }
 0xb42   : > { %v3109_v48 = vadd.f32 1e-05, %v3108_v56  ;;  %v3137_v5 = vadd.f32 1e-05, %v3136_v18 }
 0xb43   : > { %v3163_v57 = vpop.xlane.xlu1 %3162 }
 0xb44   : > { %4821 = vrsqrt.f32 %v3109_v48 }
 0xb45   : > { %4823 = vrsqrt.f32 %v3137_v5 }
 0xb46   : > { %4928 = shalt.err (!%p4925_p1)
}
 0xb47   : > { %s4929_s10 = scalar_lea.hbm %s6202_s18, 128  ;;  %s4933_s11 = scalar_lea.hbm %s6289_s8, 256 }
 0xb48   : > { %p4930_p13 = scmp.ne.s32.totalorder %s6202_s18, %s4929_s10  ;;  %p4934_p4 = scmp.lt.u32.totalorder %s6202_s18, %s6289_s8 }
 0xb49   : > { %p4935_p5 = scmp.lt.u32.totalorder %s4933_s11, %s4929_s10  ;;  %p4937_p11 = scmp.lt.u32.totalorder %s4929_s10, %s6202_s18 }
 0xb4a   : > { %p4931_p6 = pnand %p4930_p13, %p6307_p0 }
 0xb4b   : > { %p4936_p8 = por %p4935_p5, %p4934_p4 }
 0xb4c   : > { %p4932_p10 = pneg %p4931_p6 }
 0xb4d   : > { %p4938_p2 = por %p4937_p11, %p4936_p8 }
 0xb4f   : > { %p4939_p3 = pnand %p4938_p2, %p4932_p10 }
 0xb51   : > { %4942 = shalt.err (!%p4939_p3)
}
 0xb52   : > { %4665 = dma.vmem_to_hbm [thread:$0]  (%p6307_p0), %s3240_s20, 128, %s6202_s18, %s3212_s14   ;;  %v4820_v42 = vpop.eup %4819  ;;  %v3188_v12 = vpop.permute.xlu1 %3187 }
 0xb53   : > { %v3181_v1 = vmul.f32 %v4820_v42, %v6167_v63  ;;  %s3372_s26 = sshll.u32 %s5257_s19, 5  ;;  %v4822_v50 = vpop.eup %4821  ;;  %v3184_v24 = vpop.permute.xlu0 %3183  ;;  %v3164_v63 = vmul.f32 0.015625, %v3163_v57  ;;  %s3207_s21 = scalar_lea.sflag [#allocation4], %s5257_s19 }
 0xb54   : > { %v4824_v43 = vpop.eup %4823  ;;  %v3111_v54 = vmul.f32 %v4822_v50, %v6171_v22  ;;  %s356_s13 = scalar_lea.vmem [#allocation8], %s3372_s26 }
 0xb55   : > { %3195 = vrot.lane.b32.xlu0 %v3181_v1, %s5028_s17  ;;  %v3139_v53 = vmul.f32 %v4824_v43, %v6173_v2  ;;  %v3165_v58 = vadd.f32 1e-05, %v3164_v63  ;;  %s3453_s17 = sshll.u32 %s5097_s9, 9  ;;  %s3226_s20 = sshll.u32 %s356_s13, 4  ;;  %s6238_s20 = int_to_ptr.vmem [resolvable:$true] %s3226_s20 }
 0xb56   : > { %v3199_v13 = vsel %vm388_vm0, %v3111_v54, %v3188_v12  ;;  %v3192_v33 = vpop.permute.xlu1 %3191  ;;  %s6236_s10 = scalar_lea.hbm %s6288_s7, %s3453_s17  ;;  %s4943_s15 = scalar_lea.vmem %s6238_s20, 512 }
 0xb57   : > { %3203 = vst [vmem:[%s356_s13 + $0x8] sm:$0xff] %v3199_v13  ;;  %v3200_v29 = vsel %vm388_vm0, %v3139_v53, %v3192_v33  ;;  %p4944_p7 = scmp.ne.s32.totalorder %s6238_s20, %s4943_s15  ;;  %s5030_s9 = smov [#allocation8]  }
 0xb58   : > { %3204 = vst [vmem:[%s356_s13 + $0x10] sm:$0xff] %v3200_v29  ;;  %s4947_s11 = sshll.u32 %s5030_s9, 4  ;;  %s4948_s11 = int_to_ptr.vmem [resolvable:$false] %s4947_s11 }
 0xb59   : > { %p4945_p9 = pnand %p4944_p7, %p6307_p0  ;;  %s4949_s24 = scalar_lea.vmem %s4948_s11, 1024 }
 0xb5a   : > { %p4950_p1 = scmp.lt.s32.totalorder %s6238_s20, %s4948_s11  ;;  %p4951_p13 = scmp.lt.s32.totalorder %s4949_s24, %s4943_s15 }
 0xb5b   : > { %p4946_p12 = pneg %p4945_p9 }
 0xb5c   : > { %p4952_p6 = por %p4951_p13, %p4950_p1 }
 0xb5e   : > { %p4953_p10 = pnand %p4952_p6, %p4946_p12 }
 0xb74   : > { %v3079_v7 = vpop.xlane.xlu0 %3078 }
 0xb75   : > { %v3080_v61 = vmul.f32 0.015625, %v3079_v7 }
 0xb77   : > { %v3081_v26 = vadd.f32 1e-05, %v3080_v61 }
 0xb79   : > { %4825 = vrsqrt.f32 %v3081_v26 }
 0xb7a   : > { %4827 = vrsqrt.f32 %v3165_v58 }
 0xb83   : > { %v4826_v46 = vpop.eup %4825 }
 0xb84   : > { %v3083_v34 = vmul.f32 %v4826_v46, %v6192_v6  ;;  %v4828_v45 = vpop.eup %4827 }
 0xb85   : > { %v3167_v28 = vmul.f32 %v4828_v45, %v6180_v37 }
 0xb86   : > { %v3198_v14 = vsel %vm388_vm0, %v3083_v34, %v3184_v24 }
 0xb87   : > { %3202 = vst [vmem:[%s356_s13] sm:$0xff] %v3198_v14 }
 0xbc7   : > { %v3196_v60 = vpop.permute.xlu0 %3195 }
 0xbc8   : > { %v3201_v3 = vsel %vm388_vm0, %v3167_v28, %v3196_v60 }
 0xbc9   : > { %3205 = vst [vmem:[%s356_s13 + $0x18] sm:$0xff] %v3201_v3 }
 0xbca   : > { %4956 = shalt.err (!%p4953_p10)
}
 0xbcb   : > { %s4957_s19 = scalar_lea.hbm %s6236_s10, 512  ;;  %s4961_s13 = scalar_lea.hbm %s6288_s7, 1024 }
 0xbcc   : > { %p4958_p4 = scmp.ne.s32.totalorder %s6236_s10, %s4957_s19  ;;  %p4962_p11 = scmp.lt.u32.totalorder %s6236_s10, %s6288_s7 }
 0xbcd   : > { %p4963_p2 = scmp.lt.u32.totalorder %s4961_s13, %s4957_s19  ;;  %p4965_p7 = scmp.lt.u32.totalorder %s4957_s19, %s6236_s10 }
 0xbce   : > { %p4959_p5 = pnand %p4958_p4, %p6307_p0 }
 0xbcf   : > { %p4964_p3 = por %p4963_p2, %p4962_p11 }
 0xbd0   : > { %p4960_p8 = pneg %p4959_p5 }
 0xbd1   : > { %p4966_p9 = por %p4965_p7, %p4964_p3 }
 0xbd3   : > { %p4967_p12 = pnand %p4966_p9, %p4960_p8 }
 0xbd5   : > { %4970 = shalt.err (!%p4967_p12)
}
 0xbd6   : > { %4664 = dma.vmem_to_hbm [thread:$0]  (%p6307_p0), %s6238_s20, 512, %s6236_s10, %s3207_s21  }
 0xbd7 PF: > { %s3251_s14 = sand.u32 1, %s5005_s27   ;;  %p6308_p1 = scmp.ne.s32.totalorder %s6296_s12, 0 }
 0xbd8   : > { %p6309_p13 = scmp.ge.s32.totalorder %s5017_s30, 2  ;;  %s3252_s15 = scalar_lea.sflag [#allocation4], %s3251_s14 }
 0xbda   : > { %p4680_p6 = pnand %p6309_p13, %p6308_p1 }
 0xbdc   : > { %4996 = dma.done.wait (!%p4680_p6), %s3252_s15, 512  }
 0xbdd   : > { %4998 = vsyncadd (!%p4680_p6), %s3252_s15, 4294966784  ;;  %s3261_s9 = scalar_lea.sflag [#allocation10], %s3251_s14 }
 0xbde   : > { %5000 = dma.done.wait (!%p4680_p6), %s3261_s9, 128  }
 0xbdf   : > { %5002 = vsyncadd (!%p4680_p6), %s3261_s9, 4294967168  ;;  %p26_p0 = scmp.ge.s32.totalorder %s5192_s16, 4   ;;  %s6310_s27 = smov %s5009_s28 }
 0xbe0   : > { %s6311_s28 = smov %s5013_s29  ;;  %s6312_s29 = smov %s5208_s23 }
 0xbe1   : > { %s6313_s30 = smov %s5192_s16  ;;  %28 = sbr.rel (!%p26_p0) target bundleno = 8 (0x8), region = 122 }
 0xbe8   :  { %3266 = vsyncpa [#allocation3], 1 }
 0xbe9   :  { %3268 = vsyncpa [#allocation3 + $0x1], 1 }
 0xbea   :  { %3269 = vsyncpa [#allocation6], 1 }
 0xbeb   :  { %3270 = vsyncpa [#allocation4], 1 }
 0xbec   :  { %3272 = vsyncpa [#allocation4 + $0x1], 1 }
 0xbed   :  { %3273 = vsyncpa [#allocation10], 1 }
 0xbee   :  { %3275 = vsyncpa [#allocation10 + $0x1], 1 }

</bundles_post_ra>
